<compile_context>
chip_gen: v7x
topology: tpu7x:2x2x1
jax: 0.10.0
libtpu: 0.0.40
codegen_flags: <defaults>
</compile_context>

<pallas_src>
import functools

import jax
import jax.numpy as jnp
from jax.experimental import pallas as pl
from jax.experimental.pallas import tpu as pltpu


def _silu(x):
    return x * jax.nn.sigmoid(x)


def _ser_fused_kernel(
    phases_ref,                    # (4, N, Hp2, Wp2) parity phases of the padded input
    stem_w_ref, stem_b_ref,        # (9, C_stem), (1, C_stem)   (BN folded)
    expand_w_ref, expand_b_ref,    # (C_stem, C_exp), (1, C_exp)
    dw_k_ref, dw_b_ref,            # (9, C_exp), (1, C_exp)
    se_w1_ref, se_b1_ref,          # (C_exp, C_se), (1, C_se)
    se_w2_ref, se_b2_ref,          # (C_se, C_exp), (1, C_exp)
    proj_w_ref, proj_b_ref,        # (C_exp, C_stem), (1, C_stem)
    head_w_ref, head_b_ref,        # (C_stem, C_head), (1, C_head)
    fc_w_ref, fc_b_ref,            # (C_head, 128), (1, 128)
    cls_w_ref, cls_b_ref,          # (128, 4), (1, 4)
    out_ref,                       # (N, 4) logits
    pad_ref,                       # VMEM scratch (N, Ho+2, Wo+2, C_exp)
    *, N, Ho, Wo,
):
    HW = Ho * Wo
    C_stem = stem_w_ref.shape[1]
    C_exp = expand_w_ref.shape[1]
    inv_hw = 1.0 / float(HW)

    # ---- stem: 3x3 conv, stride 2, pad 1 (+ folded BN) + SiLU ----------------
    # phases[(dh%2)*2 + (dw%2), n, i, j] == x_padded[n, 2*i + dh%2, 2*j + dw%2]
    acc = jnp.zeros((N, Ho, Wo, C_stem), jnp.float32)
    for dh in range(3):
        for dw in range(3):
            tap = dh * 3 + dw
            phv = phases_ref[(dh % 2) * 2 + (dw % 2)]            # (N, Hp2, Wp2)
            sh = phv[:, dh // 2:dh // 2 + Ho, dw // 2:dw // 2 + Wo]  # (N, Ho, Wo)
            acc = acc + sh[:, :, :, None] * stem_w_ref[tap:tap + 1, :]
    x0 = acc.reshape(N * HW, C_stem) + stem_b_ref[...]
    x0 = _silu(x0)                                               # residual baseline

    # ---- MBConv expand 1x1 + SiLU --------------------------------------------
    e2d = _silu(jnp.dot(x0, expand_w_ref[...], preferred_element_type=jnp.float32)
                + expand_b_ref[...])                             # (N*HW, C_exp)

    # ---- depthwise 3x3, stride 1, pad 1 + SiLU (shifted MACs in VMEM) --------
    pad_ref[...] = jnp.zeros_like(pad_ref)
    pad_ref[:, 1:Ho + 1, 1:Wo + 1, :] = e2d.reshape(N, Ho, Wo, C_exp)
    dacc = jnp.zeros((N, Ho, Wo, C_exp), jnp.float32)
    for dh in range(3):
        for dw in range(3):
            tap = dh * 3 + dw
            dacc = dacc + pad_ref[:, dh:dh + Ho, dw:dw + Wo, :] * dw_k_ref[tap:tap + 1, :]
    dw2d = _silu(dacc + dw_b_ref[...]).reshape(N * HW, C_exp)    # (N*HW, C_exp)

    # ---- squeeze-excite (batched over N) --------------------------------------
    pooled = jnp.concatenate(
        [jnp.sum(dw2d[n * HW:(n + 1) * HW, :], axis=0, keepdims=True) * inv_hw
         for n in range(N)], axis=0)                             # (N, C_exp)
    h = _silu(jnp.dot(pooled, se_w1_ref[...], preferred_element_type=jnp.float32)
              + se_b1_ref[...])                                  # (N, C_se)
    s = jax.nn.sigmoid(jnp.dot(h, se_w2_ref[...], preferred_element_type=jnp.float32)
                       + se_b2_ref[...])                         # (N, C_exp)
    se2d = jnp.concatenate(
        [dw2d[n * HW:(n + 1) * HW, :] * s[n:n + 1, :] for n in range(N)], axis=0)

    # ---- project 1x1 + residual -----------------------------------------------
    p2d = (jnp.dot(se2d, proj_w_ref[...], preferred_element_type=jnp.float32)
           + proj_b_ref[...] + x0)                               # (N*HW, C_stem)

    # ---- head 1x1 conv + SiLU ---------------------------------------------------
    h2d = _silu(jnp.dot(p2d, head_w_ref[...], preferred_element_type=jnp.float32)
                + head_b_ref[...])                               # (N*HW, C_head)

    # ---- GAP + timm Linear(C_head,128) + SERcnn classifier Linear(128,4) -------
    gap = jnp.concatenate(
        [jnp.sum(h2d[n * HW:(n + 1) * HW, :], axis=0, keepdims=True) * inv_hw
         for n in range(N)], axis=0)                             # (N, C_head)
    feats = (jnp.dot(gap, fc_w_ref[...], preferred_element_type=jnp.float32)
             + fc_b_ref[...])                                    # (N, 128)
    logits = (jnp.dot(feats, cls_w_ref[...], preferred_element_type=jnp.float32)
              + cls_b_ref[...])                                  # (N, 4)
    out_ref[...] = logits.astype(out_ref.dtype)


def _full_spec(shape):
    return pl.BlockSpec(shape, lambda i, _z=(0,) * len(shape): _z)


def ser_cnn_forward(x_nchw, p):
    """x_nchw: (N, 1, H, W) float32 spectrogram (PyTorch layout)."""
    N, Cin, H, W = x_nchw.shape
    assert Cin == 1
    # stride-2, pad-1, 3x3 conv output size (matches PyTorch floor((H-1)/2)+1)
    Ho = (H - 1) // 2 + 1
    Wo = (W - 1) // 2 + 1

    # Host-side glue (same total size as the input, no 9x im2col blow-up):
    # pad by 1 and split into the four (row-parity, col-parity) phases so the
    # in-kernel stride-2 taps become contiguous static slices.
    xp = jnp.pad(x_nchw[:, 0], ((0, 0), (1, 1), (1, 1)))         # (N, H+2, W+2)
    Hp = H + 2 + ((H + 2) % 2)
    Wp = W + 2 + ((W + 2) % 2)
    xp = jnp.pad(xp, ((0, 0), (0, Hp - (H + 2)), (0, Wp - (W + 2))))
    phases = (xp.reshape(N, Hp // 2, 2, Wp // 2, 2)
                .transpose(2, 4, 0, 1, 3)
                .reshape(4, N, Hp // 2, Wp // 2)).astype(jnp.float32)

    C_stem = p["stem_w"].shape[-1]
    C_exp = p["expand_w"].shape[1]
    C_se = p["se_w1"].shape[1]
    C_head = p["head_w"].shape[1]
    FEAT = p["fc_w"].shape[1]
    NCLS = p["cls_w"].shape[1]

    inputs = (
        phases,
        p["stem_w"].reshape(9, C_stem), p["stem_b"].reshape(1, C_stem),
        p["expand_w"], p["expand_b"].reshape(1, C_exp),
        p["dw_k"].reshape(9, C_exp), p["dw_b"].reshape(1, C_exp),
        p["se_w1"], p["se_b1"].reshape(1, C_se),
        p["se_w2"], p["se_b2"].reshape(1, C_exp),
        p["proj_w"], p["proj_b"].reshape(1, C_stem),
        p["head_w"], p["head_b"].reshape(1, C_head),
        p["fc_w"], p["fc_b"].reshape(1, FEAT),
        p["cls_w"], p["cls_b"].reshape(1, NCLS),
    )

    return pl.pallas_call(
        functools.partial(_ser_fused_kernel, N=N, Ho=Ho, Wo=Wo),
        out_shape=jax.ShapeDtypeStruct((N, NCLS), jnp.float32),
        grid=(1,),
        in_specs=[_full_spec(a.shape) for a in inputs],
        out_specs=pl.BlockSpec((N, NCLS), lambda i: (0, 0)),
        scratch_shapes=[pltpu.VMEM((N, Ho + 2, Wo + 2, C_exp), jnp.float32)],
        compiler_params=pltpu.CompilerParams(dimension_semantics=("arbitrary",)),
    )(*inputs)


# ------------------------- deterministic params ----------------------------- #

def init_params(key):
    ks = jax.random.split(key, 18)
    C_stem, C_exp, C_se, C_head, FEAT, NCLS = 8, 32, 8, 32, 128, 4

    def w(k, shape, fan_in):
        return jax.random.normal(k, shape, jnp.float32) / jnp.sqrt(fan_in)

    # BatchNorms are folded into the conv weights/biases (running stats identity).
    return dict(
        stem_w=w(ks[0], (3, 3, 1, C_stem), 9.0),
        stem_b=0.1 * w(ks[1], (C_stem,), 1.0),
        expand_w=w(ks[2], (C_stem, C_exp), C_stem),
        expand_b=0.1 * w(ks[3], (C_exp,), 1.0),
        dw_k=w(ks[4], (3, 3, C_exp), 9.0),
        dw_b=0.1 * w(ks[5], (C_exp,), 1.0),
        se_w1=w(ks[6], (C_exp, C_se), C_exp),
        se_b1=0.1 * w(ks[7], (C_se,), 1.0),
        se_w2=w(ks[8], (C_se, C_exp), C_se),
        se_b2=0.1 * w(ks[9], (C_exp,), 1.0),
        proj_w=w(ks[10], (C_exp, C_stem), C_exp),
        proj_b=0.1 * w(ks[11], (C_stem,), 1.0),
        head_w=w(ks[12], (C_stem, C_head), C_stem),
        head_b=0.1 * w(ks[13], (C_head,), 1.0),
        fc_w=w(ks[14], (C_head, FEAT), C_head),
        fc_b=0.1 * w(ks[15], (FEAT,), 1.0),
        cls_w=w(ks[16], (FEAT, NCLS), FEAT),
        cls_b=0.1 * w(ks[17], (NCLS,), 1.0),
    )


if __name__ == "__main__":
    key = jax.random.PRNGKey(0)
    pkey, xkey = jax.random.split(key)
    params = init_params(pkey)
    # PyTorch-style NCHW spectrogram input: batch=2, in_chans=1, 16x16
    x = jax.random.normal(xkey, (2, 1, 16, 16), jnp.float32)
    out = ser_cnn_forward(x, params)
    out = jax.block_until_ready(out)
    assert out.shape == (2, 4) and out.dtype == jnp.float32
    print("KERNEL_OK")
</pallas_src>

<mosaic_0001>
module attributes {stable_mosaic.version = 11 : i64} {
  func.func @_ser_fused_kernel(%arg0: i32, %arg1: memref<4x2x9x9xf32, #tpu.memory_space<vmem>>, %arg2: memref<9x8xf32, #tpu.memory_space<vmem>>, %arg3: memref<1x8xf32, #tpu.memory_space<vmem>>, %arg4: memref<8x32xf32, #tpu.memory_space<vmem>>, %arg5: memref<1x32xf32, #tpu.memory_space<vmem>>, %arg6: memref<9x32xf32, #tpu.memory_space<vmem>>, %arg7: memref<1x32xf32, #tpu.memory_space<vmem>>, %arg8: memref<32x8xf32, #tpu.memory_space<vmem>>, %arg9: memref<1x8xf32, #tpu.memory_space<vmem>>, %arg10: memref<8x32xf32, #tpu.memory_space<vmem>>, %arg11: memref<1x32xf32, #tpu.memory_space<vmem>>, %arg12: memref<32x8xf32, #tpu.memory_space<vmem>>, %arg13: memref<1x8xf32, #tpu.memory_space<vmem>>, %arg14: memref<8x32xf32, #tpu.memory_space<vmem>>, %arg15: memref<1x32xf32, #tpu.memory_space<vmem>>, %arg16: memref<32x128xf32, #tpu.memory_space<vmem>>, %arg17: memref<1x128xf32, #tpu.memory_space<vmem>>, %arg18: memref<128x4xf32, #tpu.memory_space<vmem>>, %arg19: memref<1x4xf32, #tpu.memory_space<vmem>>, %arg20: memref<2x4xf32, #tpu.memory_space<vmem>>, %arg21: memref<2x10x10x32xf32, #tpu.memory_space<vmem>>) attributes {dimension_semantics = [#tpu.dimension_semantics<arbitrary>], iteration_bounds = array<i64: 1>, scalar_prefetch = 0 : i64, scratch_operands = 1 : i64, tpu.core_type = #tpu.core_type<tc>, window_params = [{pipeline_mode = #tpu.pipeline_mode<synchronous>, transform_indices = @transform_0, window_bounds = array<i64: 4, 2, 9, 9>}, {pipeline_mode = #tpu.pipeline_mode<synchronous>, transform_indices = @transform_1, window_bounds = array<i64: 9, 8>}, {pipeline_mode = #tpu.pipeline_mode<synchronous>, transform_indices = @transform_2, window_bounds = array<i64: 1, 8>}, {pipeline_mode = #tpu.pipeline_mode<synchronous>, transform_indices = @transform_3, window_bounds = array<i64: 8, 32>}, {pipeline_mode = #tpu.pipeline_mode<synchronous>, transform_indices = @transform_4, window_bounds = array<i64: 1, 32>}, {pipeline_mode = #tpu.pipeline_mode<synchronous>, transform_indices = @transform_5, window_bounds = array<i64: 9, 32>}, {pipeline_mode = #tpu.pipeline_mode<synchronous>, transform_indices = @transform_6, window_bounds = array<i64: 1, 32>}, {pipeline_mode = #tpu.pipeline_mode<synchronous>, transform_indices = @transform_7, window_bounds = array<i64: 32, 8>}, {pipeline_mode = #tpu.pipeline_mode<synchronous>, transform_indices = @transform_8, window_bounds = array<i64: 1, 8>}, {pipeline_mode = #tpu.pipeline_mode<synchronous>, transform_indices = @transform_9, window_bounds = array<i64: 8, 32>}, {pipeline_mode = #tpu.pipeline_mode<synchronous>, transform_indices = @transform_10, window_bounds = array<i64: 1, 32>}, {pipeline_mode = #tpu.pipeline_mode<synchronous>, transform_indices = @transform_11, window_bounds = array<i64: 32, 8>}, {pipeline_mode = #tpu.pipeline_mode<synchronous>, transform_indices = @transform_12, window_bounds = array<i64: 1, 8>}, {pipeline_mode = #tpu.pipeline_mode<synchronous>, transform_indices = @transform_13, window_bounds = array<i64: 8, 32>}, {pipeline_mode = #tpu.pipeline_mode<synchronous>, transform_indices = @transform_14, window_bounds = array<i64: 1, 32>}, {pipeline_mode = #tpu.pipeline_mode<synchronous>, transform_indices = @transform_15, window_bounds = array<i64: 32, 128>}, {pipeline_mode = #tpu.pipeline_mode<synchronous>, transform_indices = @transform_16, window_bounds = array<i64: 1, 128>}, {pipeline_mode = #tpu.pipeline_mode<synchronous>, transform_indices = @transform_17, window_bounds = array<i64: 128, 4>}, {pipeline_mode = #tpu.pipeline_mode<synchronous>, transform_indices = @transform_18, window_bounds = array<i64: 1, 4>}, {pipeline_mode = #tpu.pipeline_mode<synchronous>, transform_indices = @transform_19, window_bounds = array<i64: 2, 4>}]} {
    %cst = arith.constant 0.000000e+00 : f32
    %0 = vector.broadcast %cst : f32 to vector<2x8x8x8xf32>
    %c0 = arith.constant 0 : index
    %c0_0 = arith.constant 0 : index
    %c0_1 = arith.constant 0 : index
    %c0_2 = arith.constant 0 : index
    %1 = vector.load %arg1[%c0, %c0_0, %c0_1, %c0_2] : memref<4x2x9x9xf32, #tpu.memory_space<vmem>>, vector<1x2x9x9xf32>
    %2 = vector.shape_cast %1 : vector<1x2x9x9xf32> to vector<2x9x9xf32>
    %3 = vector.extract_strided_slice %2 {offsets = [0, 0, 0], sizes = [2, 8, 8], strides = [1, 1, 1]} : vector<2x9x9xf32> to vector<2x8x8xf32>
    %4 = vector.shape_cast %3 : vector<2x8x8xf32> to vector<2x8x8x1xf32>
    %c0_3 = arith.constant 0 : index
    %c0_4 = arith.constant 0 : index
    %5 = vector.load %arg2[%c0_3, %c0_4] : memref<9x8xf32, #tpu.memory_space<vmem>>, vector<1x8xf32>
    %6 = vector.shape_cast %5 : vector<1x8xf32> to vector<1x1x1x8xf32>
    %7 = vector.broadcast %4 : vector<2x8x8x1xf32> to vector<2x8x8x8xf32>
    %8 = vector.broadcast %6 : vector<1x1x1x8xf32> to vector<2x8x8x8xf32>
    %9 = arith.mulf %7, %8 : vector<2x8x8x8xf32>
    %10 = arith.addf %0, %9 : vector<2x8x8x8xf32>
    %c1 = arith.constant 1 : index
    %c0_5 = arith.constant 0 : index
    %c0_6 = arith.constant 0 : index
    %c0_7 = arith.constant 0 : index
    %11 = vector.load %arg1[%c1, %c0_5, %c0_6, %c0_7] : memref<4x2x9x9xf32, #tpu.memory_space<vmem>>, vector<1x2x9x9xf32>
    %12 = vector.shape_cast %11 : vector<1x2x9x9xf32> to vector<2x9x9xf32>
    %13 = vector.extract_strided_slice %12 {offsets = [0, 0, 0], sizes = [2, 8, 8], strides = [1, 1, 1]} : vector<2x9x9xf32> to vector<2x8x8xf32>
    %14 = vector.shape_cast %13 : vector<2x8x8xf32> to vector<2x8x8x1xf32>
    %c1_8 = arith.constant 1 : index
    %c0_9 = arith.constant 0 : index
    %15 = vector.load %arg2[%c1_8, %c0_9] : memref<9x8xf32, #tpu.memory_space<vmem>>, vector<1x8xf32>
    %16 = vector.shape_cast %15 : vector<1x8xf32> to vector<1x1x1x8xf32>
    %17 = vector.broadcast %14 : vector<2x8x8x1xf32> to vector<2x8x8x8xf32>
    %18 = vector.broadcast %16 : vector<1x1x1x8xf32> to vector<2x8x8x8xf32>
    %19 = arith.mulf %17, %18 : vector<2x8x8x8xf32>
    %20 = arith.addf %10, %19 : vector<2x8x8x8xf32>
    %c0_10 = arith.constant 0 : index
    %c0_11 = arith.constant 0 : index
    %c0_12 = arith.constant 0 : index
    %c0_13 = arith.constant 0 : index
    %21 = vector.load %arg1[%c0_10, %c0_11, %c0_12, %c0_13] : memref<4x2x9x9xf32, #tpu.memory_space<vmem>>, vector<1x2x9x9xf32>
    %22 = vector.shape_cast %21 : vector<1x2x9x9xf32> to vector<2x9x9xf32>
    %23 = vector.extract_strided_slice %22 {offsets = [0, 0, 1], sizes = [2, 8, 8], strides = [1, 1, 1]} : vector<2x9x9xf32> to vector<2x8x8xf32>
    %24 = vector.shape_cast %23 : vector<2x8x8xf32> to vector<2x8x8x1xf32>
    %c2 = arith.constant 2 : index
    %c0_14 = arith.constant 0 : index
    %25 = vector.load %arg2[%c2, %c0_14] : memref<9x8xf32, #tpu.memory_space<vmem>>, vector<1x8xf32>
    %26 = vector.shape_cast %25 : vector<1x8xf32> to vector<1x1x1x8xf32>
    %27 = vector.broadcast %24 : vector<2x8x8x1xf32> to vector<2x8x8x8xf32>
    %28 = vector.broadcast %26 : vector<1x1x1x8xf32> to vector<2x8x8x8xf32>
    %29 = arith.mulf %27, %28 : vector<2x8x8x8xf32>
    %30 = arith.addf %20, %29 : vector<2x8x8x8xf32>
    %c2_15 = arith.constant 2 : index
    %c0_16 = arith.constant 0 : index
    %c0_17 = arith.constant 0 : index
    %c0_18 = arith.constant 0 : index
    %31 = vector.load %arg1[%c2_15, %c0_16, %c0_17, %c0_18] : memref<4x2x9x9xf32, #tpu.memory_space<vmem>>, vector<1x2x9x9xf32>
    %32 = vector.shape_cast %31 : vector<1x2x9x9xf32> to vector<2x9x9xf32>
    %33 = vector.extract_strided_slice %32 {offsets = [0, 0, 0], sizes = [2, 8, 8], strides = [1, 1, 1]} : vector<2x9x9xf32> to vector<2x8x8xf32>
    %34 = vector.shape_cast %33 : vector<2x8x8xf32> to vector<2x8x8x1xf32>
    %c3 = arith.constant 3 : index
    %c0_19 = arith.constant 0 : index
    %35 = vector.load %arg2[%c3, %c0_19] : memref<9x8xf32, #tpu.memory_space<vmem>>, vector<1x8xf32>
    %36 = vector.shape_cast %35 : vector<1x8xf32> to vector<1x1x1x8xf32>
    %37 = vector.broadcast %34 : vector<2x8x8x1xf32> to vector<2x8x8x8xf32>
    %38 = vector.broadcast %36 : vector<1x1x1x8xf32> to vector<2x8x8x8xf32>
    %39 = arith.mulf %37, %38 : vector<2x8x8x8xf32>
    %40 = arith.addf %30, %39 : vector<2x8x8x8xf32>
    %c3_20 = arith.constant 3 : index
    %c0_21 = arith.constant 0 : index
    %c0_22 = arith.constant 0 : index
    %c0_23 = arith.constant 0 : index
    %41 = vector.load %arg1[%c3_20, %c0_21, %c0_22, %c0_23] : memref<4x2x9x9xf32, #tpu.memory_space<vmem>>, vector<1x2x9x9xf32>
    %42 = vector.shape_cast %41 : vector<1x2x9x9xf32> to vector<2x9x9xf32>
    %43 = vector.extract_strided_slice %42 {offsets = [0, 0, 0], sizes = [2, 8, 8], strides = [1, 1, 1]} : vector<2x9x9xf32> to vector<2x8x8xf32>
    %44 = vector.shape_cast %43 : vector<2x8x8xf32> to vector<2x8x8x1xf32>
    %c4 = arith.constant 4 : index
    %c0_24 = arith.constant 0 : index
    %45 = vector.load %arg2[%c4, %c0_24] : memref<9x8xf32, #tpu.memory_space<vmem>>, vector<1x8xf32>
    %46 = vector.shape_cast %45 : vector<1x8xf32> to vector<1x1x1x8xf32>
    %47 = vector.broadcast %44 : vector<2x8x8x1xf32> to vector<2x8x8x8xf32>
    %48 = vector.broadcast %46 : vector<1x1x1x8xf32> to vector<2x8x8x8xf32>
    %49 = arith.mulf %47, %48 : vector<2x8x8x8xf32>
    %50 = arith.addf %40, %49 : vector<2x8x8x8xf32>
    %c2_25 = arith.constant 2 : index
    %c0_26 = arith.constant 0 : index
    %c0_27 = arith.constant 0 : index
    %c0_28 = arith.constant 0 : index
    %51 = vector.load %arg1[%c2_25, %c0_26, %c0_27, %c0_28] : memref<4x2x9x9xf32, #tpu.memory_space<vmem>>, vector<1x2x9x9xf32>
    %52 = vector.shape_cast %51 : vector<1x2x9x9xf32> to vector<2x9x9xf32>
    %53 = vector.extract_strided_slice %52 {offsets = [0, 0, 1], sizes = [2, 8, 8], strides = [1, 1, 1]} : vector<2x9x9xf32> to vector<2x8x8xf32>
    %54 = vector.shape_cast %53 : vector<2x8x8xf32> to vector<2x8x8x1xf32>
    %c5 = arith.constant 5 : index
    %c0_29 = arith.constant 0 : index
    %55 = vector.load %arg2[%c5, %c0_29] : memref<9x8xf32, #tpu.memory_space<vmem>>, vector<1x8xf32>
    %56 = vector.shape_cast %55 : vector<1x8xf32> to vector<1x1x1x8xf32>
    %57 = vector.broadcast %54 : vector<2x8x8x1xf32> to vector<2x8x8x8xf32>
    %58 = vector.broadcast %56 : vector<1x1x1x8xf32> to vector<2x8x8x8xf32>
    %59 = arith.mulf %57, %58 : vector<2x8x8x8xf32>
    %60 = arith.addf %50, %59 : vector<2x8x8x8xf32>
    %c0_30 = arith.constant 0 : index
    %c0_31 = arith.constant 0 : index
    %c0_32 = arith.constant 0 : index
    %c0_33 = arith.constant 0 : index
    %61 = vector.load %arg1[%c0_30, %c0_31, %c0_32, %c0_33] : memref<4x2x9x9xf32, #tpu.memory_space<vmem>>, vector<1x2x9x9xf32>
    %62 = vector.shape_cast %61 : vector<1x2x9x9xf32> to vector<2x9x9xf32>
    %63 = vector.extract_strided_slice %62 {offsets = [0, 1, 0], sizes = [2, 8, 8], strides = [1, 1, 1]} : vector<2x9x9xf32> to vector<2x8x8xf32>
    %64 = vector.shape_cast %63 : vector<2x8x8xf32> to vector<2x8x8x1xf32>
    %c6 = arith.constant 6 : index
    %c0_34 = arith.constant 0 : index
    %65 = vector.load %arg2[%c6, %c0_34] : memref<9x8xf32, #tpu.memory_space<vmem>>, vector<1x8xf32>
    %66 = vector.shape_cast %65 : vector<1x8xf32> to vector<1x1x1x8xf32>
    %67 = vector.broadcast %64 : vector<2x8x8x1xf32> to vector<2x8x8x8xf32>
    %68 = vector.broadcast %66 : vector<1x1x1x8xf32> to vector<2x8x8x8xf32>
    %69 = arith.mulf %67, %68 : vector<2x8x8x8xf32>
    %70 = arith.addf %60, %69 : vector<2x8x8x8xf32>
    %c1_35 = arith.constant 1 : index
    %c0_36 = arith.constant 0 : index
    %c0_37 = arith.constant 0 : index
    %c0_38 = arith.constant 0 : index
    %71 = vector.load %arg1[%c1_35, %c0_36, %c0_37, %c0_38] : memref<4x2x9x9xf32, #tpu.memory_space<vmem>>, vector<1x2x9x9xf32>
    %72 = vector.shape_cast %71 : vector<1x2x9x9xf32> to vector<2x9x9xf32>
    %73 = vector.extract_strided_slice %72 {offsets = [0, 1, 0], sizes = [2, 8, 8], strides = [1, 1, 1]} : vector<2x9x9xf32> to vector<2x8x8xf32>
    %74 = vector.shape_cast %73 : vector<2x8x8xf32> to vector<2x8x8x1xf32>
    %c7 = arith.constant 7 : index
    %c0_39 = arith.constant 0 : index
    %75 = vector.load %arg2[%c7, %c0_39] : memref<9x8xf32, #tpu.memory_space<vmem>>, vector<1x8xf32>
    %76 = vector.shape_cast %75 : vector<1x8xf32> to vector<1x1x1x8xf32>
    %77 = vector.broadcast %74 : vector<2x8x8x1xf32> to vector<2x8x8x8xf32>
    %78 = vector.broadcast %76 : vector<1x1x1x8xf32> to vector<2x8x8x8xf32>
    %79 = arith.mulf %77, %78 : vector<2x8x8x8xf32>
    %80 = arith.addf %70, %79 : vector<2x8x8x8xf32>
    %c0_40 = arith.constant 0 : index
    %c0_41 = arith.constant 0 : index
    %c0_42 = arith.constant 0 : index
    %c0_43 = arith.constant 0 : index
    %81 = vector.load %arg1[%c0_40, %c0_41, %c0_42, %c0_43] : memref<4x2x9x9xf32, #tpu.memory_space<vmem>>, vector<1x2x9x9xf32>
    %82 = vector.shape_cast %81 : vector<1x2x9x9xf32> to vector<2x9x9xf32>
    %83 = vector.extract_strided_slice %82 {offsets = [0, 1, 1], sizes = [2, 8, 8], strides = [1, 1, 1]} : vector<2x9x9xf32> to vector<2x8x8xf32>
    %84 = vector.shape_cast %83 : vector<2x8x8xf32> to vector<2x8x8x1xf32>
    %c8 = arith.constant 8 : index
    %c0_44 = arith.constant 0 : index
    %85 = vector.load %arg2[%c8, %c0_44] : memref<9x8xf32, #tpu.memory_space<vmem>>, vector<1x8xf32>
    %86 = vector.shape_cast %85 : vector<1x8xf32> to vector<1x1x1x8xf32>
    %87 = vector.broadcast %84 : vector<2x8x8x1xf32> to vector<2x8x8x8xf32>
    %88 = vector.broadcast %86 : vector<1x1x1x8xf32> to vector<2x8x8x8xf32>
    %89 = arith.mulf %87, %88 : vector<2x8x8x8xf32>
    %90 = arith.addf %80, %89 : vector<2x8x8x8xf32>
    %91 = vector.shape_cast %90 : vector<2x8x8x8xf32> to vector<128x8xf32>
    %c0_45 = arith.constant 0 : index
    %c0_46 = arith.constant 0 : index
    %92 = vector.load %arg3[%c0_45, %c0_46] : memref<1x8xf32, #tpu.memory_space<vmem>>, vector<1x8xf32>
    %93 = vector.broadcast %92 : vector<1x8xf32> to vector<128x8xf32>
    %94 = arith.addf %91, %93 : vector<128x8xf32>
    %95 = arith.negf %94 : vector<128x8xf32>
    %96 = math.exp %95 : vector<128x8xf32>
    %cst_47 = arith.constant 1.000000e+00 : f32
    %97 = vector.broadcast %cst_47 : f32 to vector<128x8xf32>
    %98 = arith.addf %97, %96 : vector<128x8xf32>
    %99 = arith.divf %97, %98 : vector<128x8xf32>
    %100 = arith.mulf %94, %99 : vector<128x8xf32>
    %c0_48 = arith.constant 0 : index
    %c0_49 = arith.constant 0 : index
    %101 = vector.load %arg4[%c0_48, %c0_49] : memref<8x32xf32, #tpu.memory_space<vmem>>, vector<8x32xf32>
    %cst_50 = arith.constant dense<0.000000e+00> : vector<128x32xf32>
    %102 = tpu.matmul %100, %101, %cst_50 {dimension_numbers = #tpu.dot_dimension_numbers<[1], [0], [0], [1], [0, 0, 1, 1], [], []>} : vector<128x8xf32>, vector<8x32xf32>, vector<128x32xf32> -> vector<128x32xf32>
    %c0_51 = arith.constant 0 : index
    %c0_52 = arith.constant 0 : index
    %103 = vector.load %arg5[%c0_51, %c0_52] : memref<1x32xf32, #tpu.memory_space<vmem>>, vector<1x32xf32>
    %104 = vector.broadcast %103 : vector<1x32xf32> to vector<128x32xf32>
    %105 = arith.addf %102, %104 : vector<128x32xf32>
    %106 = arith.negf %105 : vector<128x32xf32>
    %107 = math.exp %106 : vector<128x32xf32>
    %cst_53 = arith.constant 1.000000e+00 : f32
    %108 = vector.broadcast %cst_53 : f32 to vector<128x32xf32>
    %109 = arith.addf %108, %107 : vector<128x32xf32>
    %110 = arith.divf %108, %109 : vector<128x32xf32>
    %111 = arith.mulf %105, %110 : vector<128x32xf32>
    %cst_54 = arith.constant 0.000000e+00 : f32
    %112 = vector.broadcast %cst_54 : f32 to vector<2x10x10x32xf32>
    %c0_55 = arith.constant 0 : index
    %c0_56 = arith.constant 0 : index
    %c0_57 = arith.constant 0 : index
    %c0_58 = arith.constant 0 : index
    %113 = vector.load %arg21[%c0_55, %c0_56, %c0_57, %c0_58] : memref<2x10x10x32xf32, #tpu.memory_space<vmem>>, vector<2x10x10x32xf32>
    tpu.vector_store %arg21[%c0_55, %c0_56, %c0_57, %c0_58], %112 {strides = array<i32>} : memref<2x10x10x32xf32, #tpu.memory_space<vmem>>, vector<2x10x10x32xf32>,
    %114 = vector.shape_cast %111 : vector<128x32xf32> to vector<2x8x8x32xf32>
    %c0_59 = arith.constant 0 : index
    %c1_60 = arith.constant 1 : index
    %c1_61 = arith.constant 1 : index
    %c0_62 = arith.constant 0 : index
    %115 = vector.load %arg21[%c0_59, %c1_60, %c1_61, %c0_62] : memref<2x10x10x32xf32, #tpu.memory_space<vmem>>, vector<2x8x8x32xf32>
    tpu.vector_store %arg21[%c0_59, %c1_60, %c1_61, %c0_62], %114 {strides = array<i32>} : memref<2x10x10x32xf32, #tpu.memory_space<vmem>>, vector<2x8x8x32xf32>,
    %cst_63 = arith.constant 0.000000e+00 : f32
    %116 = vector.broadcast %cst_63 : f32 to vector<2x8x8x32xf32>
    %c0_64 = arith.constant 0 : index
    %c0_65 = arith.constant 0 : index
    %c0_66 = arith.constant 0 : index
    %c0_67 = arith.constant 0 : index
    %117 = vector.load %arg21[%c0_64, %c0_65, %c0_66, %c0_67] : memref<2x10x10x32xf32, #tpu.memory_space<vmem>>, vector<2x8x8x32xf32>
    %c0_68 = arith.constant 0 : index
    %c0_69 = arith.constant 0 : index
    %118 = vector.load %arg6[%c0_68, %c0_69] : memref<9x32xf32, #tpu.memory_space<vmem>>, vector<1x32xf32>
    %119 = vector.shape_cast %118 : vector<1x32xf32> to vector<1x1x1x32xf32>
    %120 = vector.broadcast %119 : vector<1x1x1x32xf32> to vector<2x8x8x32xf32>
    %121 = arith.mulf %117, %120 : vector<2x8x8x32xf32>
    %122 = arith.addf %116, %121 : vector<2x8x8x32xf32>
    %c0_70 = arith.constant 0 : index
    %c0_71 = arith.constant 0 : index
    %c1_72 = arith.constant 1 : index
    %c0_73 = arith.constant 0 : index
    %123 = vector.load %arg21[%c0_70, %c0_71, %c1_72, %c0_73] : memref<2x10x10x32xf32, #tpu.memory_space<vmem>>, vector<2x8x8x32xf32>
    %c1_74 = arith.constant 1 : index
    %c0_75 = arith.constant 0 : index
    %124 = vector.load %arg6[%c1_74, %c0_75] : memref<9x32xf32, #tpu.memory_space<vmem>>, vector<1x32xf32>
    %125 = vector.shape_cast %124 : vector<1x32xf32> to vector<1x1x1x32xf32>
    %126 = vector.broadcast %125 : vector<1x1x1x32xf32> to vector<2x8x8x32xf32>
    %127 = arith.mulf %123, %126 : vector<2x8x8x32xf32>
    %128 = arith.addf %122, %127 : vector<2x8x8x32xf32>
    %c0_76 = arith.constant 0 : index
    %c0_77 = arith.constant 0 : index
    %c2_78 = arith.constant 2 : index
    %c0_79 = arith.constant 0 : index
    %129 = vector.load %arg21[%c0_76, %c0_77, %c2_78, %c0_79] : memref<2x10x10x32xf32, #tpu.memory_space<vmem>>, vector<2x8x8x32xf32>
    %c2_80 = arith.constant 2 : index
    %c0_81 = arith.constant 0 : index
    %130 = vector.load %arg6[%c2_80, %c0_81] : memref<9x32xf32, #tpu.memory_space<vmem>>, vector<1x32xf32>
    %131 = vector.shape_cast %130 : vector<1x32xf32> to vector<1x1x1x32xf32>
    %132 = vector.broadcast %131 : vector<1x1x1x32xf32> to vector<2x8x8x32xf32>
    %133 = arith.mulf %129, %132 : vector<2x8x8x32xf32>
    %134 = arith.addf %128, %133 : vector<2x8x8x32xf32>
    %c0_82 = arith.constant 0 : index
    %c1_83 = arith.constant 1 : index
    %c0_84 = arith.constant 0 : index
    %c0_85 = arith.constant 0 : index
    %135 = vector.load %arg21[%c0_82, %c1_83, %c0_84, %c0_85] : memref<2x10x10x32xf32, #tpu.memory_space<vmem>>, vector<2x8x8x32xf32>
    %c3_86 = arith.constant 3 : index
    %c0_87 = arith.constant 0 : index
    %136 = vector.load %arg6[%c3_86, %c0_87] : memref<9x32xf32, #tpu.memory_space<vmem>>, vector<1x32xf32>
    %137 = vector.shape_cast %136 : vector<1x32xf32> to vector<1x1x1x32xf32>
    %138 = vector.broadcast %137 : vector<1x1x1x32xf32> to vector<2x8x8x32xf32>
    %139 = arith.mulf %135, %138 : vector<2x8x8x32xf32>
    %140 = arith.addf %134, %139 : vector<2x8x8x32xf32>
    %c0_88 = arith.constant 0 : index
    %c1_89 = arith.constant 1 : index
    %c1_90 = arith.constant 1 : index
    %c0_91 = arith.constant 0 : index
    %141 = vector.load %arg21[%c0_88, %c1_89, %c1_90, %c0_91] : memref<2x10x10x32xf32, #tpu.memory_space<vmem>>, vector<2x8x8x32xf32>
    %c4_92 = arith.constant 4 : index
    %c0_93 = arith.constant 0 : index
    %142 = vector.load %arg6[%c4_92, %c0_93] : memref<9x32xf32, #tpu.memory_space<vmem>>, vector<1x32xf32>
    %143 = vector.shape_cast %142 : vector<1x32xf32> to vector<1x1x1x32xf32>
    %144 = vector.broadcast %143 : vector<1x1x1x32xf32> to vector<2x8x8x32xf32>
    %145 = arith.mulf %141, %144 : vector<2x8x8x32xf32>
    %146 = arith.addf %140, %145 : vector<2x8x8x32xf32>
    %c0_94 = arith.constant 0 : index
    %c1_95 = arith.constant 1 : index
    %c2_96 = arith.constant 2 : index
    %c0_97 = arith.constant 0 : index
    %147 = vector.load %arg21[%c0_94, %c1_95, %c2_96, %c0_97] : memref<2x10x10x32xf32, #tpu.memory_space<vmem>>, vector<2x8x8x32xf32>
    %c5_98 = arith.constant 5 : index
    %c0_99 = arith.constant 0 : index
    %148 = vector.load %arg6[%c5_98, %c0_99] : memref<9x32xf32, #tpu.memory_space<vmem>>, vector<1x32xf32>
    %149 = vector.shape_cast %148 : vector<1x32xf32> to vector<1x1x1x32xf32>
    %150 = vector.broadcast %149 : vector<1x1x1x32xf32> to vector<2x8x8x32xf32>
    %151 = arith.mulf %147, %150 : vector<2x8x8x32xf32>
    %152 = arith.addf %146, %151 : vector<2x8x8x32xf32>
    %c0_100 = arith.constant 0 : index
    %c2_101 = arith.constant 2 : index
    %c0_102 = arith.constant 0 : index
    %c0_103 = arith.constant 0 : index
    %153 = vector.load %arg21[%c0_100, %c2_101, %c0_102, %c0_103] : memref<2x10x10x32xf32, #tpu.memory_space<vmem>>, vector<2x8x8x32xf32>
    %c6_104 = arith.constant 6 : index
    %c0_105 = arith.constant 0 : index
    %154 = vector.load %arg6[%c6_104, %c0_105] : memref<9x32xf32, #tpu.memory_space<vmem>>, vector<1x32xf32>
    %155 = vector.shape_cast %154 : vector<1x32xf32> to vector<1x1x1x32xf32>
    %156 = vector.broadcast %155 : vector<1x1x1x32xf32> to vector<2x8x8x32xf32>
    %157 = arith.mulf %153, %156 : vector<2x8x8x32xf32>
    %158 = arith.addf %152, %157 : vector<2x8x8x32xf32>
    %c0_106 = arith.constant 0 : index
    %c2_107 = arith.constant 2 : index
    %c1_108 = arith.constant 1 : index
    %c0_109 = arith.constant 0 : index
    %159 = vector.load %arg21[%c0_106, %c2_107, %c1_108, %c0_109] : memref<2x10x10x32xf32, #tpu.memory_space<vmem>>, vector<2x8x8x32xf32>
    %c7_110 = arith.constant 7 : index
    %c0_111 = arith.constant 0 : index
    %160 = vector.load %arg6[%c7_110, %c0_111] : memref<9x32xf32, #tpu.memory_space<vmem>>, vector<1x32xf32>
    %161 = vector.shape_cast %160 : vector<1x32xf32> to vector<1x1x1x32xf32>
    %162 = vector.broadcast %161 : vector<1x1x1x32xf32> to vector<2x8x8x32xf32>
    %163 = arith.mulf %159, %162 : vector<2x8x8x32xf32>
    %164 = arith.addf %158, %163 : vector<2x8x8x32xf32>
    %c0_112 = arith.constant 0 : index
    %c2_113 = arith.constant 2 : index
    %c2_114 = arith.constant 2 : index
    %c0_115 = arith.constant 0 : index
    %165 = vector.load %arg21[%c0_112, %c2_113, %c2_114, %c0_115] : memref<2x10x10x32xf32, #tpu.memory_space<vmem>>, vector<2x8x8x32xf32>
    %c8_116 = arith.constant 8 : index
    %c0_117 = arith.constant 0 : index
    %166 = vector.load %arg6[%c8_116, %c0_117] : memref<9x32xf32, #tpu.memory_space<vmem>>, vector<1x32xf32>
    %167 = vector.shape_cast %166 : vector<1x32xf32> to vector<1x1x1x32xf32>
    %168 = vector.broadcast %167 : vector<1x1x1x32xf32> to vector<2x8x8x32xf32>
    %169 = arith.mulf %165, %168 : vector<2x8x8x32xf32>
    %170 = arith.addf %164, %169 : vector<2x8x8x32xf32>
    %c0_118 = arith.constant 0 : index
    %c0_119 = arith.constant 0 : index
    %171 = vector.load %arg7[%c0_118, %c0_119] : memref<1x32xf32, #tpu.memory_space<vmem>>, vector<1x32xf32>
    %172 = vector.shape_cast %171 : vector<1x32xf32> to vector<1x1x1x32xf32>
    %173 = vector.broadcast %172 : vector<1x1x1x32xf32> to vector<2x8x8x32xf32>
    %174 = arith.addf %170, %173 : vector<2x8x8x32xf32>
    %175 = arith.negf %174 : vector<2x8x8x32xf32>
    %176 = math.exp %175 : vector<2x8x8x32xf32>
    %cst_120 = arith.constant 1.000000e+00 : f32
    %177 = vector.broadcast %cst_120 : f32 to vector<2x8x8x32xf32>
    %178 = arith.addf %177, %176 : vector<2x8x8x32xf32>
    %179 = arith.divf %177, %178 : vector<2x8x8x32xf32>
    %180 = arith.mulf %174, %179 : vector<2x8x8x32xf32>
    %181 = vector.shape_cast %180 : vector<2x8x8x32xf32> to vector<128x32xf32>
    %182 = vector.extract_strided_slice %181 {offsets = [0, 0], sizes = [64, 32], strides = [1, 1]} : vector<128x32xf32> to vector<64x32xf32>
    %cst_121 = arith.constant dense<0.000000e+00> : vector<32xf32>
    %183 = vector.multi_reduction <add>, %182, %cst_121 [0] : vector<64x32xf32> to vector<32xf32>
    %184 = vector.shape_cast %183 : vector<32xf32> to vector<1x32xf32>
    %cst_122 = arith.constant 1.562500e-02 : f32
    %185 = vector.broadcast %cst_122 : f32 to vector<1x32xf32>
    %186 = arith.mulf %184, %185 : vector<1x32xf32>
    %187 = vector.extract_strided_slice %181 {offsets = [64, 0], sizes = [64, 32], strides = [1, 1]} : vector<128x32xf32> to vector<64x32xf32>
    %cst_123 = arith.constant dense<0.000000e+00> : vector<32xf32>
    %188 = vector.multi_reduction <add>, %187, %cst_123 [0] : vector<64x32xf32> to vector<32xf32>
    %189 = vector.shape_cast %188 : vector<32xf32> to vector<1x32xf32>
    %cst_124 = arith.constant 1.562500e-02 : f32
    %190 = vector.broadcast %cst_124 : f32 to vector<1x32xf32>
    %191 = arith.mulf %189, %190 : vector<1x32xf32>
    %192 = tpu.concatenate %186, %191 in 0 : vector<1x32xf32>, vector<1x32xf32> -> vector<2x32xf32>
    %c0_125 = arith.constant 0 : index
    %c0_126 = arith.constant 0 : index
    %193 = vector.load %arg8[%c0_125, %c0_126] : memref<32x8xf32, #tpu.memory_space<vmem>>, vector<32x8xf32>
    %cst_127 = arith.constant dense<0.000000e+00> : vector<2x8xf32>
    %194 = tpu.matmul %192, %193, %cst_127 {dimension_numbers = #tpu.dot_dimension_numbers<[1], [0], [0], [1], [0, 0, 1, 1], [], []>} : vector<2x32xf32>, vector<32x8xf32>, vector<2x8xf32> -> vector<2x8xf32>
    %c0_128 = arith.constant 0 : index
    %c0_129 = arith.constant 0 : index
    %195 = vector.load %arg9[%c0_128, %c0_129] : memref<1x8xf32, #tpu.memory_space<vmem>>, vector<1x8xf32>
    %196 = vector.broadcast %195 : vector<1x8xf32> to vector<2x8xf32>
    %197 = arith.addf %194, %196 : vector<2x8xf32>
    %198 = arith.negf %197 : vector<2x8xf32>
    %199 = math.exp %198 : vector<2x8xf32>
    %cst_130 = arith.constant 1.000000e+00 : f32
    %200 = vector.broadcast %cst_130 : f32 to vector<2x8xf32>
    %201 = arith.addf %200, %199 : vector<2x8xf32>
    %202 = arith.divf %200, %201 : vector<2x8xf32>
    %203 = arith.mulf %197, %202 : vector<2x8xf32>
    %c0_131 = arith.constant 0 : index
    %c0_132 = arith.constant 0 : index
    %204 = vector.load %arg10[%c0_131, %c0_132] : memref<8x32xf32, #tpu.memory_space<vmem>>, vector<8x32xf32>
    %cst_133 = arith.constant dense<0.000000e+00> : vector<2x32xf32>
    %205 = tpu.matmul %203, %204, %cst_133 {dimension_numbers = #tpu.dot_dimension_numbers<[1], [0], [0], [1], [0, 0, 1, 1], [], []>} : vector<2x8xf32>, vector<8x32xf32>, vector<2x32xf32> -> vector<2x32xf32>
    %c0_134 = arith.constant 0 : index
    %c0_135 = arith.constant 0 : index
    %206 = vector.load %arg11[%c0_134, %c0_135] : memref<1x32xf32, #tpu.memory_space<vmem>>, vector<1x32xf32>
    %207 = vector.broadcast %206 : vector<1x32xf32> to vector<2x32xf32>
    %208 = arith.addf %205, %207 : vector<2x32xf32>
    %209 = arith.negf %208 : vector<2x32xf32>
    %210 = math.exp %209 : vector<2x32xf32>
    %cst_136 = arith.constant 1.000000e+00 : f32
    %211 = vector.broadcast %cst_136 : f32 to vector<2x32xf32>
    %212 = arith.addf %211, %210 : vector<2x32xf32>
    %213 = arith.divf %211, %212 : vector<2x32xf32>
    %214 = vector.extract_strided_slice %181 {offsets = [0, 0], sizes = [64, 32], strides = [1, 1]} : vector<128x32xf32> to vector<64x32xf32>
    %215 = vector.extract_strided_slice %213 {offsets = [0, 0], sizes = [1, 32], strides = [1, 1]} : vector<2x32xf32> to vector<1x32xf32>
    %216 = vector.broadcast %215 : vector<1x32xf32> to vector<64x32xf32>
    %217 = arith.mulf %214, %216 : vector<64x32xf32>
    %218 = vector.extract_strided_slice %181 {offsets = [64, 0], sizes = [64, 32], strides = [1, 1]} : vector<128x32xf32> to vector<64x32xf32>
    %219 = vector.extract_strided_slice %213 {offsets = [1, 0], sizes = [1, 32], strides = [1, 1]} : vector<2x32xf32> to vector<1x32xf32>
    %220 = vector.broadcast %219 : vector<1x32xf32> to vector<64x32xf32>
    %221 = arith.mulf %218, %220 : vector<64x32xf32>
    %222 = tpu.concatenate %217, %221 in 0 : vector<64x32xf32>, vector<64x32xf32> -> vector<128x32xf32>
    %c0_137 = arith.constant 0 : index
    %c0_138 = arith.constant 0 : index
    %223 = vector.load %arg12[%c0_137, %c0_138] : memref<32x8xf32, #tpu.memory_space<vmem>>, vector<32x8xf32>
    %cst_139 = arith.constant dense<0.000000e+00> : vector<128x8xf32>
    %224 = tpu.matmul %222, %223, %cst_139 {dimension_numbers = #tpu.dot_dimension_numbers<[1], [0], [0], [1], [0, 0, 1, 1], [], []>} : vector<128x32xf32>, vector<32x8xf32>, vector<128x8xf32> -> vector<128x8xf32>
    %c0_140 = arith.constant 0 : index
    %c0_141 = arith.constant 0 : index
    %225 = vector.load %arg13[%c0_140, %c0_141] : memref<1x8xf32, #tpu.memory_space<vmem>>, vector<1x8xf32>
    %226 = vector.broadcast %225 : vector<1x8xf32> to vector<128x8xf32>
    %227 = arith.addf %224, %226 : vector<128x8xf32>
    %228 = arith.addf %227, %100 : vector<128x8xf32>
    %c0_142 = arith.constant 0 : index
    %c0_143 = arith.constant 0 : index
    %229 = vector.load %arg14[%c0_142, %c0_143] : memref<8x32xf32, #tpu.memory_space<vmem>>, vector<8x32xf32>
    %cst_144 = arith.constant dense<0.000000e+00> : vector<128x32xf32>
    %230 = tpu.matmul %228, %229, %cst_144 {dimension_numbers = #tpu.dot_dimension_numbers<[1], [0], [0], [1], [0, 0, 1, 1], [], []>} : vector<128x8xf32>, vector<8x32xf32>, vector<128x32xf32> -> vector<128x32xf32>
    %c0_145 = arith.constant 0 : index
    %c0_146 = arith.constant 0 : index
    %231 = vector.load %arg15[%c0_145, %c0_146] : memref<1x32xf32, #tpu.memory_space<vmem>>, vector<1x32xf32>
    %232 = vector.broadcast %231 : vector<1x32xf32> to vector<128x32xf32>
    %233 = arith.addf %230, %232 : vector<128x32xf32>
    %234 = arith.negf %233 : vector<128x32xf32>
    %235 = math.exp %234 : vector<128x32xf32>
    %cst_147 = arith.constant 1.000000e+00 : f32
    %236 = vector.broadcast %cst_147 : f32 to vector<128x32xf32>
    %237 = arith.addf %236, %235 : vector<128x32xf32>
    %238 = arith.divf %236, %237 : vector<128x32xf32>
    %239 = arith.mulf %233, %238 : vector<128x32xf32>
    %240 = vector.extract_strided_slice %239 {offsets = [0, 0], sizes = [64, 32], strides = [1, 1]} : vector<128x32xf32> to vector<64x32xf32>
    %cst_148 = arith.constant dense<0.000000e+00> : vector<32xf32>
    %241 = vector.multi_reduction <add>, %240, %cst_148 [0] : vector<64x32xf32> to vector<32xf32>
    %242 = vector.shape_cast %241 : vector<32xf32> to vector<1x32xf32>
    %cst_149 = arith.constant 1.562500e-02 : f32
    %243 = vector.broadcast %cst_149 : f32 to vector<1x32xf32>
    %244 = arith.mulf %242, %243 : vector<1x32xf32>
    %245 = vector.extract_strided_slice %239 {offsets = [64, 0], sizes = [64, 32], strides = [1, 1]} : vector<128x32xf32> to vector<64x32xf32>
    %cst_150 = arith.constant dense<0.000000e+00> : vector<32xf32>
    %246 = vector.multi_reduction <add>, %245, %cst_150 [0] : vector<64x32xf32> to vector<32xf32>
    %247 = vector.shape_cast %246 : vector<32xf32> to vector<1x32xf32>
    %cst_151 = arith.constant 1.562500e-02 : f32
    %248 = vector.broadcast %cst_151 : f32 to vector<1x32xf32>
    %249 = arith.mulf %247, %248 : vector<1x32xf32>
    %250 = tpu.concatenate %244, %249 in 0 : vector<1x32xf32>, vector<1x32xf32> -> vector<2x32xf32>
    %c0_152 = arith.constant 0 : index
    %c0_153 = arith.constant 0 : index
    %251 = vector.load %arg16[%c0_152, %c0_153] : memref<32x128xf32, #tpu.memory_space<vmem>>, vector<32x128xf32>
    %cst_154 = arith.constant dense<0.000000e+00> : vector<2x128xf32>
    %252 = tpu.matmul %250, %251, %cst_154 {dimension_numbers = #tpu.dot_dimension_numbers<[1], [0], [0], [1], [0, 0, 1, 1], [], []>} : vector<2x32xf32>, vector<32x128xf32>, vector<2x128xf32> -> vector<2x128xf32>
    %c0_155 = arith.constant 0 : index
    %c0_156 = arith.constant 0 : index
    %253 = vector.load %arg17[%c0_155, %c0_156] : memref<1x128xf32, #tpu.memory_space<vmem>>, vector<1x128xf32>
    %254 = vector.broadcast %253 : vector<1x128xf32> to vector<2x128xf32>
    %255 = arith.addf %252, %254 : vector<2x128xf32>
    %c0_157 = arith.constant 0 : index
    %c0_158 = arith.constant 0 : index
    %256 = vector.load %arg18[%c0_157, %c0_158] : memref<128x4xf32, #tpu.memory_space<vmem>>, vector<128x4xf32>
    %cst_159 = arith.constant dense<0.000000e+00> : vector<2x4xf32>
    %257 = tpu.matmul %255, %256, %cst_159 {dimension_numbers = #tpu.dot_dimension_numbers<[1], [0], [0], [1], [0, 0, 1, 1], [], []>} : vector<2x128xf32>, vector<128x4xf32>, vector<2x4xf32> -> vector<2x4xf32>
    %c0_160 = arith.constant 0 : index
    %c0_161 = arith.constant 0 : index
    %258 = vector.load %arg19[%c0_160, %c0_161] : memref<1x4xf32, #tpu.memory_space<vmem>>, vector<1x4xf32>
    %259 = vector.broadcast %258 : vector<1x4xf32> to vector<2x4xf32>
    %260 = arith.addf %257, %259 : vector<2x4xf32>
    %c0_162 = arith.constant 0 : index
    %c0_163 = arith.constant 0 : index
    %261 = vector.load %arg20[%c0_162, %c0_163] : memref<2x4xf32, #tpu.memory_space<vmem>>, vector<2x4xf32>
    tpu.vector_store %arg20[%c0_162, %c0_163], %260 {strides = array<i32>} : memref<2x4xf32, #tpu.memory_space<vmem>>, vector<2x4xf32>,
    return
  }
  func.func @transform_0(%arg0: i32) -> (i32, i32, i32, i32) {
    %c0_i32 = arith.constant 0 : i32
    %c0_i32_0 = arith.constant 0 : i32
    %c0_i32_1 = arith.constant 0 : i32
    %c0_i32_2 = arith.constant 0 : i32
    %c0_i32_3 = arith.constant 0 : i32
    return %c0_i32, %c0_i32_0, %c0_i32_1, %c0_i32_2 : i32, i32, i32, i32
  }
  func.func @transform_1(%arg0: i32) -> (i32, i32) {
    %c0_i32 = arith.constant 0 : i32
    %c0_i32_0 = arith.constant 0 : i32
    %c0_i32_1 = arith.constant 0 : i32
    return %c0_i32, %c0_i32_0 : i32, i32
  }
  func.func @transform_2(%arg0: i32) -> (i32, i32) {
    %c0_i32 = arith.constant 0 : i32
    %c0_i32_0 = arith.constant 0 : i32
    %c0_i32_1 = arith.constant 0 : i32
    return %c0_i32, %c0_i32_0 : i32, i32
  }
  func.func @transform_3(%arg0: i32) -> (i32, i32) {
    %c0_i32 = arith.constant 0 : i32
    %c0_i32_0 = arith.constant 0 : i32
    %c0_i32_1 = arith.constant 0 : i32
    return %c0_i32, %c0_i32_0 : i32, i32
  }
  func.func @transform_4(%arg0: i32) -> (i32, i32) {
    %c0_i32 = arith.constant 0 : i32
    %c0_i32_0 = arith.constant 0 : i32
    %c0_i32_1 = arith.constant 0 : i32
    return %c0_i32, %c0_i32_0 : i32, i32
  }
  func.func @transform_5(%arg0: i32) -> (i32, i32) {
    %c0_i32 = arith.constant 0 : i32
    %c0_i32_0 = arith.constant 0 : i32
    %c0_i32_1 = arith.constant 0 : i32
    return %c0_i32, %c0_i32_0 : i32, i32
  }
  func.func @transform_6(%arg0: i32) -> (i32, i32) {
    %c0_i32 = arith.constant 0 : i32
    %c0_i32_0 = arith.constant 0 : i32
    %c0_i32_1 = arith.constant 0 : i32
    return %c0_i32, %c0_i32_0 : i32, i32
  }
  func.func @transform_7(%arg0: i32) -> (i32, i32) {
    %c0_i32 = arith.constant 0 : i32
    %c0_i32_0 = arith.constant 0 : i32
    %c0_i32_1 = arith.constant 0 : i32
    return %c0_i32, %c0_i32_0 : i32, i32
  }
  func.func @transform_8(%arg0: i32) -> (i32, i32) {
    %c0_i32 = arith.constant 0 : i32
    %c0_i32_0 = arith.constant 0 : i32
    %c0_i32_1 = arith.constant 0 : i32
    return %c0_i32, %c0_i32_0 : i32, i32
  }
  func.func @transform_9(%arg0: i32) -> (i32, i32) {
    %c0_i32 = arith.constant 0 : i32
    %c0_i32_0 = arith.constant 0 : i32
    %c0_i32_1 = arith.constant 0 : i32
    return %c0_i32, %c0_i32_0 : i32, i32
  }
  func.func @transform_10(%arg0: i32) -> (i32, i32) {
    %c0_i32 = arith.constant 0 : i32
    %c0_i32_0 = arith.constant 0 : i32
    %c0_i32_1 = arith.constant 0 : i32
    return %c0_i32, %c0_i32_0 : i32, i32
  }
  func.func @transform_11(%arg0: i32) -> (i32, i32) {
    %c0_i32 = arith.constant 0 : i32
    %c0_i32_0 = arith.constant 0 : i32
    %c0_i32_1 = arith.constant 0 : i32
    return %c0_i32, %c0_i32_0 : i32, i32
  }
  func.func @transform_12(%arg0: i32) -> (i32, i32) {
    %c0_i32 = arith.constant 0 : i32
    %c0_i32_0 = arith.constant 0 : i32
    %c0_i32_1 = arith.constant 0 : i32
    return %c0_i32, %c0_i32_0 : i32, i32
  }
  func.func @transform_13(%arg0: i32) -> (i32, i32) {
    %c0_i32 = arith.constant 0 : i32
    %c0_i32_0 = arith.constant 0 : i32
    %c0_i32_1 = arith.constant 0 : i32
    return %c0_i32, %c0_i32_0 : i32, i32
  }
  func.func @transform_14(%arg0: i32) -> (i32, i32) {
    %c0_i32 = arith.constant 0 : i32
    %c0_i32_0 = arith.constant 0 : i32
    %c0_i32_1 = arith.constant 0 : i32
    return %c0_i32, %c0_i32_0 : i32, i32
  }
  func.func @transform_15(%arg0: i32) -> (i32, i32) {
    %c0_i32 = arith.constant 0 : i32
    %c0_i32_0 = arith.constant 0 : i32
    %c0_i32_1 = arith.constant 0 : i32
    return %c0_i32, %c0_i32_0 : i32, i32
  }
  func.func @transform_16(%arg0: i32) -> (i32, i32) {
    %c0_i32 = arith.constant 0 : i32
    %c0_i32_0 = arith.constant 0 : i32
    %c0_i32_1 = arith.constant 0 : i32
    return %c0_i32, %c0_i32_0 : i32, i32
  }
  func.func @transform_17(%arg0: i32) -> (i32, i32) {
    %c0_i32 = arith.constant 0 : i32
    %c0_i32_0 = arith.constant 0 : i32
    %c0_i32_1 = arith.constant 0 : i32
    return %c0_i32, %c0_i32_0 : i32, i32
  }
  func.func @transform_18(%arg0: i32) -> (i32, i32) {
    %c0_i32 = arith.constant 0 : i32
    %c0_i32_0 = arith.constant 0 : i32
    %c0_i32_1 = arith.constant 0 : i32
    return %c0_i32, %c0_i32_0 : i32, i32
  }
  func.func @transform_19(%arg0: i32) -> (i32, i32) {
    %c0_i32 = arith.constant 0 : i32
    %c0_i32_0 = arith.constant 0 : i32
    %c0_i32_1 = arith.constant 0 : i32
    return %c0_i32, %c0_i32_0 : i32, i32
  }
}

</mosaic_0001>

<bundles_post_ra>
// kernel: tpu_custom_call.1
= control target key start
LH: loop header
LB: loop body
LE: loop exit
PB: predicated region body
PF: predicated region fallthrough
CT: control target
= control target key end

     0   :  { %s5689_s0 = inlined_call_operand.vmem [shape: f32[4,2,9,9], index: 0, kind: input, shape index: {}]   ;;  %s5690_s1 = inlined_call_operand.vmem [shape: f32[9,8], index: 1, kind: input, shape index: {}]   ;;  %s5691_s2 = inlined_call_operand.vmem [shape: f32[1,8], index: 2, kind: input, shape index: {}]   ;;  %s5692_s3 = inlined_call_operand.vmem [shape: f32[8,32], index: 3, kind: input, shape index: {}]   ;;  %s5693_s4 = inlined_call_operand.vmem [shape: f32[1,32], index: 4, kind: input, shape index: {}]   ;;  %s5694_s5 = inlined_call_operand.vmem [shape: f32[9,32], index: 5, kind: input, shape index: {}]   ;;  %s5695_s6 = inlined_call_operand.vmem [shape: f32[1,32], index: 6, kind: input, shape index: {}]   ;;  %s5696_s7 = inlined_call_operand.vmem [shape: f32[32,8], index: 7, kind: input, shape index: {}]   ;;  %s5697_s8 = inlined_call_operand.vmem [shape: f32[1,8], index: 8, kind: input, shape index: {}]   ;;  %s5698_s9 = inlined_call_operand.vmem [shape: f32[8,32], index: 9, kind: input, shape index: {}]   ;;  %s5699_s10 = inlined_call_operand.vmem [shape: f32[1,32], index: 10, kind: input, shape index: {}]   ;;  %s5700_s11 = inlined_call_operand.vmem [shape: f32[32,8], index: 11, kind: input, shape index: {}]   ;;  %s5701_s12 = inlined_call_operand.vmem [shape: f32[1,8], index: 12, kind: input, shape index: {}]   ;;  %s5702_s13 = inlined_call_operand.vmem [shape: f32[8,32], index: 13, kind: input, shape index: {}]   ;;  %s5703_s14 = inlined_call_operand.vmem [shape: f32[1,32], index: 14, kind: input, shape index: {}]   ;;  %s5704_s15 = inlined_call_operand.vmem [shape: f32[32,128], index: 15, kind: input, shape index: {}]   ;;  %s5705_s16 = inlined_call_operand.vmem [shape: f32[1,128], index: 16, kind: input, shape index: {}]   ;;  %s5706_s17 = inlined_call_operand.vmem [shape: f32[128,4], index: 17, kind: input, shape index: {}]   ;;  %s5707_s18 = inlined_call_operand.vmem [shape: f32[1,4], index: 18, kind: input, shape index: {}]   ;;  %s5708_s19 = inlined_call_operand.hbm [shape: f32[2,4], index: 19, kind: output, shape index: {}]  }
   0x1   :  { %5735 = sst [smem:[#allocation26_spill]] %s5689_s0 }
   0x2   :  { %5736 = sst [smem:[#allocation27_spill]] %s5690_s1 }
   0x3   :  { %5737 = sst [smem:[#allocation28_spill]] %s5691_s2 }
   0x4   :  { %5738 = sst [smem:[#allocation29_spill]] %s5692_s3 }
   0x5   :  { %v67_v0 = vlaneseq  ;;  %s5739_s20 = sld [smem:[#allocation26_spill]] }
   0x7   :  { %v68_v1 = vshrl.u32 %v67_v0, 7 }
   0x9   :  { %v3997_v3 = vsub.s32 1, %v68_v1  ;;  %v3999_v4 = vsub.s32 0, %v68_v1 }
   0xb   :  { %v3995_v2 = vld [vmem:[%s5739_s20] sm:$0xff]  ;;  %5740 = vst [vmem:[#allocation6_spill] sm:$0xff] %v3997_v3  ;;  %5741 = vst [vmem:[#allocation7_spill] sm:$0xff] %v3999_v4 }
   0xc   :  { %v4004_v5 = vld [vmem:[%s5739_s20 + $0x20] sm:$0xff]  ;;  %v77_v6 = vrot.slane %v3995_v2, %v3997_v3  ;;  %v70_v7 = vrot.slane %v3995_v2, %v3999_v4 }
   0xd   :  { %24 = vsyncpa [#allocation4], 0  ;;  %v231_v8 = vrot.slane %v4004_v5, %v3997_v3  ;;  %v224_v9 = vrot.slane %v4004_v5, %v3999_v4  ;;  %v4014_v10 = vsub.s32 7, %v68_v1  ;;  %v4016_v11 = vsub.s32 2, %v68_v1  ;;  %v4025_v13 = vld [vmem:[%s5739_s20 + $0x40] sm:$0xff]  ;;  %v4063_v28 = vld [vmem:[%s5739_s20 + $0x10] sm:$0xff] }
   0xe   :  { %79 = vbcast.lane.b32.xlu1 %v77_v6, 256  ;;  %72 = vbcast.lane.b32.xlu0 %v70_v7, 256  ;;  %v4030_v14 = vld [vmem:[%s5739_s20 + $0x60] sm:$0xff]  ;;  %v4042_v19 = vsub.s32 3, %v68_v1  ;;  %v477_v21 = vrot.slane %v4025_v13, %v3999_v4  ;;  %v484_v22 = vrot.slane %v4025_v13, %v3997_v3  ;;  %v4056_v26 = vsub.s32 4, %v68_v1  ;;  %v4076_v32 = vld [vmem:[%s5739_s20 + $0x30] sm:$0xff] }
   0xf   :  { %v4020_v12 = vrot.slane %v3995_v2, %v4014_v10  ;;  %v4034_v15 = vrot.slane %v4025_v13, %v4014_v10  ;;  %v678_v16 = vrot.slane %v4030_v14, %v4014_v10  ;;  %v238_v17 = vrot.slane %v4004_v5, %v4016_v11  ;;  %v4103_v43 = vld [vmem:[%s5739_s20 + $0x50] sm:$0xff]  ;;  %s5742_s22 = sld [smem:[#allocation29_spill]]  ;;  %s5743_s3 = sld [smem:[#allocation27_spill]] }
  0x10   :  { %v84_v18 = vrot.slane %v3995_v2, %v4016_v11  ;;  %v91_v20 = vrot.slane %v3995_v2, %v4042_v19  ;;  %v245_v23 = vrot.slane %v4004_v5, %v4042_v19  ;;  %v629_v24 = vrot.slane %v4030_v14, %v3999_v4  ;;  %v4122_v49 = vld [vmem:[%s5739_s20 + $0x70] sm:$0xff]  ;;  %s5744_s1 = sld [smem:[#allocation28_spill]] }
  0x11   :  { %v636_v25 = vrot.slane %v4030_v14, %v3997_v3  ;;  %v4058_v27 = vsub.s32 6, %v68_v1  ;;  %v252_v30 = vrot.slane %v4004_v5, %v4056_v26  ;;  %v98_v31 = vrot.slane %v3995_v2, %v4056_v26 }
  0x12   :  { %233 = vbcast.lane.b32.xlu1 %v231_v8, 256  ;;  %226 = vbcast.lane.b32.xlu0 %v224_v9, 256  ;;  %v491_v34 = vrot.slane %v4025_v13, %v4016_v11  ;;  %v4082_v35 = vsub.s32 5, %v68_v1  ;;  %v4086_v36 = vrot.slane %v4063_v28, %v4014_v10  ;;  %v329_v39 = vrot.slane %v4076_v32, %v4014_v10 }
  0x13   :  { %v4067_v29 = vrot.slane %v4063_v28, %v4058_v27  ;;  %v322_v33 = vrot.slane %v4076_v32, %v4058_v27  ;;  %v498_v40 = vrot.slane %v4025_v13, %v4042_v19  ;;  %v643_v41 = vrot.slane %v4030_v14, %v4016_v11 }
  0x14   :  { %v259_v37 = vrot.slane %v4004_v5, %v4082_v35  ;;  %v105_v38 = vrot.slane %v3995_v2, %v4082_v35  ;;  %v650_v42 = vrot.slane %v4030_v14, %v4042_v19  ;;  %v4107_v44 = vrot.slane %v4103_v43, %v4058_v27 }
  0x15   :  { %v266_v45 = vrot.slane %v4004_v5, %v4058_v27  ;;  %v112_v46 = vrot.slane %v3995_v2, %v4058_v27  ;;  %v4115_v47 = vrot.slane %v4103_v43, %v4014_v10  ;;  %v505_v48 = vrot.slane %v4025_v13, %v4056_v26  ;;  %v1158_v55 = vld [vmem:[%s5742_s22] sm:$0xff] }
  0x16   :  { %376 = vbcast.lane.b32.xlu1 %v77_v6, 257  ;;  %372 = vbcast.lane.b32.xlu0 %v70_v7, 257  ;;  %v727_v50 = vrot.slane %v4122_v49, %v4058_v27  ;;  %v273_v51 = vrot.slane %v4004_v5, %v4014_v10  ;;  %v512_v52 = vrot.slane %v4025_v13, %v4082_v35  ;;  %vm1166_vm0 = vcmask 64512  }
  0x17   :  { %v734_v53 = vrot.slane %v4122_v49, %v4014_v10  ;;  %v657_v54 = vrot.slane %v4030_v14, %v4056_v26  ;;  %3402 = vmatprep.subr.mxu0 %v1158_v55  ;;  %3592 = vmatprep.subr.mxu1 %v1158_v55  ;;  %v664_v56 = vrot.slane %v4030_v14, %v4082_v35  ;;  %vm1472_vm1 = vcmask 261120  }
  0x18   :  { %3403 = vmatpush3.msra.mxu0 %v1158_v55  ;;  %3593 = vmatpush3.msra.mxu1 %v1158_v55  ;;  %v280_v57 = vrot.slane %v4076_v32, %v3999_v4  ;;  %v126_v58 = vrot.slane %v4063_v28, %v3999_v4  ;;  %v519_v59 = vrot.slane %v4025_v13, %v4058_v27  ;;  %vm1474_vm2 = vcmask 254976  }
  0x19   :  { %v287_v60 = vrot.slane %v4076_v32, %v3997_v3  ;;  %v133_v61 = vrot.slane %v4063_v28, %v3997_v3  ;;  %v671_v62 = vrot.slane %v4030_v14, %v4058_v27  ;;  %v294_v63 = vrot.slane %v4076_v32, %v4016_v11 }
  0x1a   :  { %240 = vbcast.lane.b32.xlu1 %v238_v17, 256  ;;  %86 = vbcast.lane.b32.xlu0 %v84_v18, 256  ;;  %v140_v0 = vrot.slane %v4063_v28, %v4016_v11  ;;  %v533_v1 = vrot.slane %v4103_v43, %v3999_v4  ;;  %v301_v2 = vrot.slane %v4076_v32, %v4042_v19  ;;  %vm3890_vm3 = vmmov 0  }
  0x1b   :  { %v147_v5 = vrot.slane %v4063_v28, %v4042_v19  ;;  %v540_v6 = vrot.slane %v4103_v43, %v3997_v3  ;;  %v685_v9 = vrot.slane %v4122_v49, %v3999_v4  ;;  %v692_v14 = vrot.slane %v4122_v49, %v3997_v3 }
  0x1c   :  { %vm2188_vm4 = vcmask 1040384   ;;  %vm3147_vm5 = vcmask 25600  }
  0x1e   :  { %93 = vbcast.lane.b32.xlu1 %v91_v20, 256  ;;  %479 = vbcast.lane.b32.xlu0 %v477_v21, 256 }
  0x22   :  { %486 = vbcast.lane.b32.xlu1 %v484_v22, 256  ;;  %247 = vbcast.lane.b32.xlu0 %v245_v23, 256  ;;  %v308_v23 = vrot.slane %v4076_v32, %v4056_v26 }
  0x26   :  { %631 = vbcast.lane.b32.xlu1 %v629_v24, 256  ;;  %380 = vbcast.lane.b32.xlu0 %v84_v18, 257  ;;  %v4185_v18 = vld [vmem:[%s5739_s20 + $0x8] ss:$0 sm:$0xff] }
  0x2a   :  { %638 = vbcast.lane.b32.xlu1 %v636_v25, 256  ;;  %384 = vbcast.lane.b32.xlu0 %v91_v20, 257 }
  0x2e   :  { %254 = vbcast.lane.b32.xlu1 %v252_v30, 256  ;;  %100 = vbcast.lane.b32.xlu0 %v98_v31, 256  ;;  %v161_v30 = vrot.slane %v4063_v28, %v4082_v35 }
  0x32   :  { %777 = vbcast.lane.b32.xlu1 %v477_v21, 257  ;;  %493 = vbcast.lane.b32.xlu0 %v491_v34, 256 }
  0x36   :  { %261 = vbcast.lane.b32.xlu1 %v259_v37, 256  ;;  %107 = vbcast.lane.b32.xlu0 %v105_v38, 256  ;;  %v4207_v37 = vrot.slane %v4103_v43, %v4042_v19 }
  0x3a   :  { %781 = vbcast.lane.b32.xlu1 %v484_v22, 257  ;;  %500 = vbcast.lane.b32.xlu0 %v498_v40, 256  ;;  %v4194_v22 = vrot.slane %v4103_v43, %v4016_v11 }
  0x3e   :  { %645 = vbcast.lane.b32.xlu1 %v643_v41, 256  ;;  %388 = vbcast.lane.b32.xlu0 %v98_v31, 257 }
  0x42   :  { %652 = vbcast.lane.b32.xlu1 %v650_v42, 256  ;;  %392 = vbcast.lane.b32.xlu0 %v105_v38, 257  ;;  %v315_v38 = vrot.slane %v4076_v32, %v4082_v35  ;;  %v713_v32 = vrot.slane %v4122_v49, %v4056_v26 }
  0x46   :  { %268 = vbcast.lane.b32.xlu1 %v266_v45, 256  ;;  %114 = vbcast.lane.b32.xlu0 %v112_v46, 256  ;;  %v4226_v45 = vld [vmem:[%s5743_s3 + $0x2] ss:$0 sm:$0xff] }
  0x4a   :  { %785 = vbcast.lane.b32.xlu1 %v491_v34, 257  ;;  %507 = vbcast.lane.b32.xlu0 %v505_v48, 256 }
  0x4e   :  { %275 = vbcast.lane.b32.xlu1 %v273_v51, 256  ;;  %121 = vbcast.lane.b32.xlu0 %v4020_v12, 256  ;;  %v4236_v51 = vld [vmem:[%s5743_s3 + $0x3] ss:$0 sm:$0xff] }
  0x52   :  { %789 = vbcast.lane.b32.xlu1 %v498_v40, 257  ;;  %514 = vbcast.lane.b32.xlu0 %v512_v52, 256  ;;  %v4214_v40 = vld [vmem:[%s5743_s3 + $0x1] ss:$0 sm:$0xff] }
  0x56   :  { %659 = vbcast.lane.b32.xlu1 %v657_v54, 256  ;;  %396 = vbcast.lane.b32.xlu0 %v112_v46, 257 }
  0x5a   :  { %666 = vbcast.lane.b32.xlu1 %v664_v56, 256  ;;  %400 = vbcast.lane.b32.xlu0 %v4020_v12, 257 }
  0x5e   :  { %282 = vbcast.lane.b32.xlu1 %v280_v57, 256  ;;  %128 = vbcast.lane.b32.xlu0 %v126_v58, 256  ;;  %v4245_v57 = vld [vmem:[%s5743_s3 + $0x4] ss:$0 sm:$0xff] }
  0x62   :  { %793 = vbcast.lane.b32.xlu1 %v505_v48, 257  ;;  %521 = vbcast.lane.b32.xlu0 %v519_v59, 256  ;;  %v3180_v48 = vld [vmem:[%s5739_s20 + $0x28] ss:$0 sm:$0xff] }
  0x66   :  { %289 = vbcast.lane.b32.xlu1 %v287_v60, 256  ;;  %135 = vbcast.lane.b32.xlu0 %v133_v61, 256 }
  0x6a   :  { %797 = vbcast.lane.b32.xlu1 %v512_v52, 257  ;;  %528 = vbcast.lane.b32.xlu0 %v4034_v15, 256 }
  0x6e   :  { %673 = vbcast.lane.b32.xlu1 %v671_v62, 256  ;;  %404 = vbcast.lane.b32.xlu0 %v126_v58, 257  ;;  %v699_v58 = vrot.slane %v4122_v49, %v4016_v11  ;;  %v706_v11 = vrot.slane %v4122_v49, %v4042_v19 }
  0x72   :  { %680 = vbcast.lane.b32.xlu1 %v678_v16, 256  ;;  %408 = vbcast.lane.b32.xlu0 %v133_v61, 257 }
  0x76   :  { %296 = vbcast.lane.b32.xlu1 %v294_v63, 256  ;;  %142 = vbcast.lane.b32.xlu0 %v140_v0, 256 }
  0x7a   :  { %801 = vbcast.lane.b32.xlu1 %v519_v59, 257  ;;  %535 = vbcast.lane.b32.xlu0 %v533_v1, 256 }
  0x7e   :  { %303 = vbcast.lane.b32.xlu1 %v301_v2, 256  ;;  %149 = vbcast.lane.b32.xlu0 %v147_v5, 256 }
  0x80   :  { %v4169_v7 = vpop.permute.xlu1 %79  ;;  %v73_v8 = vpop.permute.xlu0 %72 }
  0x82   :  { %805 = vbcast.lane.b32.xlu1 %v4034_v15, 257  ;;  %542 = vbcast.lane.b32.xlu0 %v540_v6, 256  ;;  %v154_v15 = vrot.slane %v4063_v28, %v4056_v26  ;;  %v4221_v28 = vld [vmem:[%s5743_s3] ss:$0 sm:$0xff] }
  0x83   :  { %v184_v55 = vmul.f32 %v4221_v28, %v73_v8 }
  0x84   :  { %v4174_v12 = vpop.permute.xlu1 %233  ;;  %v227_v13 = vpop.permute.xlu0 %226 }
  0x85   :  { %v338_v46 = vmul.f32 %v4214_v40, %v227_v13  ;;  %v339_v2 = vmul.f32 %v4214_v40, %v4174_v12  ;;  %v185_v13 = vmul.f32 %v4221_v28, %v4169_v7 }
  0x86   :  { %687 = vbcast.lane.b32.xlu1 %v685_v9, 256  ;;  %412 = vbcast.lane.b32.xlu0 %v140_v0, 257 }
  0x87   :  { %v354_v59 = vadd.f32 %v338_v46, %v184_v55  ;;  %v4285_v46 = vld [vmem:[%s5743_s3 + $0x8] ss:$0 sm:$0xff] }
  0x88   :  { %v4178_v16 = vpop.permute.xlu1 %376  ;;  %v373_v17 = vpop.permute.xlu0 %372 }
  0x89   :  { %v439_v56 = vmul.f32 %v4226_v45, %v373_v17 }
  0x8a   :  { %694 = vbcast.lane.b32.xlu1 %v692_v14, 256  ;;  %416 = vbcast.lane.b32.xlu0 %v147_v5, 257  ;;  %v440_v14 = vmul.f32 %v4226_v45, %v4178_v16 }
  0x8b   :  { %v455_v63 = vadd.f32 %v439_v56, %v354_v59  ;;  %v991_v59 = vmul.f32 %v4285_v46, %v4178_v16 }
  0x8c   :  { %v4187_v20 = vpop.permute.xlu1 %240  ;;  %v4189_v21 = vpop.permute.xlu0 %86 }
  0x8e   :  { %156 = vbcast.lane.b32.xlu1 %v154_v15, 256  ;;  %881 = vbcast.lane.b32.xlu0 %v4185_v18, 256 }
  0x90   :  { %v4198_v24 = vpop.permute.xlu1 %93  ;;  %v480_v25 = vpop.permute.xlu0 %479 }
  0x91   :  { %v591_v60 = vmul.f32 %v4236_v51, %v480_v25  ;;  %v355_v25 = vadd.f32 %v339_v2, %v185_v13 }
  0x92   :  { %549 = vbcast.lane.b32.xlu1 %v4194_v22, 256  ;;  %310 = vbcast.lane.b32.xlu0 %v308_v23, 256 }
  0x93   :  { %v607_v5 = vadd.f32 %v591_v60, %v455_v63 }
  0x94   :  { %v487_v31 = vpop.permute.xlu1 %486  ;;  %v4203_v34 = vpop.permute.xlu0 %247 }
  0x96   :  { %163 = vbcast.lane.b32.xlu1 %v161_v30, 256  ;;  %809 = vbcast.lane.b32.xlu0 %v533_v1, 257  ;;  %v4258_v1 = vld [vmem:[%s5743_s3 + $0x5] ss:$0 sm:$0xff] }
  0x98   :  { %v632_v41 = vpop.permute.xlu1 %631  ;;  %v4216_v42 = vpop.permute.xlu0 %380 }
  0x99   :  { %v743_v0 = vmul.f32 %v4245_v57, %v632_v41 }
  0x9a   :  { %556 = vbcast.lane.b32.xlu1 %v4207_v37, 256  ;;  %317 = vbcast.lane.b32.xlu0 %v315_v38, 256  ;;  %v592_v38 = vmul.f32 %v4236_v51, %v487_v31  ;;  %v4298_v31 = vrot.slane %v4103_v43, %v4056_v26  ;;  %v720_v26 = vrot.slane %v4122_v49, %v4082_v35 }
  0x9b   :  { %v759_v17 = vadd.f32 %v743_v0, %v607_v5 }
  0x9c   :  { %v639_v52 = vpop.permute.xlu1 %638  ;;  %v4238_v54 = vpop.permute.xlu0 %384 }
  0x9e   :  { %932 = vbcast.lane.b32.xlu1 %v3180_v48, 256  ;;  %813 = vbcast.lane.b32.xlu0 %v540_v6, 257  ;;  %v4267_v6 = vld [vmem:[%s5743_s3 + $0x6] ss:$0 sm:$0xff] }
  0x9f   :  { %v895_v23 = vmul.f32 %v4267_v6, %v4169_v7  ;;  %v896_v16 = vmul.f32 %v4267_v6, %v4189_v21 }
  0xa0   :  { %v4250_v61 = vpop.permute.xlu1 %254  ;;  %v4252_v62 = vpop.permute.xlu0 %100 }
  0xa2   :  { %701 = vbcast.lane.b32.xlu1 %v699_v58, 256  ;;  %420 = vbcast.lane.b32.xlu0 %v154_v15, 257  ;;  %v4277_v15 = vld [vmem:[%s5743_s3 + $0x7] ss:$0 sm:$0xff]  ;;  %v744_v58 = vmul.f32 %v4245_v57, %v639_v52 }
  0xa3   :  { %v946_v56 = vmul.f32 %v4277_v15, %v4174_v12  ;;  %v4305_v12 = vld [vmem:[%s5744_s1] ss:$0 sm:$0xff] }
  0xa4   :  { %v778_v8 = vpop.permute.xlu1 %777  ;;  %v494_v9 = vpop.permute.xlu0 %493 }
  0xa5   :  { %v844_v19 = vmul.f32 %v4258_v1, %v778_v8 }
  0xa6   :  { %708 = vbcast.lane.b32.xlu1 %v706_v11, 256  ;;  %424 = vbcast.lane.b32.xlu0 %v161_v30, 257  ;;  %v456_v30 = vadd.f32 %v440_v14, %v355_v25  ;;  %v340_v25 = vmul.f32 %v4214_v40, %v4187_v20 }
  0xa7   :  { %v860_v41 = vadd.f32 %v844_v19, %v759_v17  ;;  %v947_v17 = vmul.f32 %v4277_v15, %v4187_v20 }
  0xa8   :  { %v4287_v48 = vpop.permute.xlu1 %261  ;;  %v4289_v55 = vpop.permute.xlu0 %107  ;;  %v608_v60 = vadd.f32 %v592_v38, %v456_v30  ;;  %v186_v38 = vmul.f32 %v4221_v28, %v4189_v21  ;;  %v593_v21 = vmul.f32 %v4236_v51, %v494_v9 }
  0xa9   :  { %v911_v7 = vadd.f32 %v895_v23, %v860_v41  ;;  %v992_v41 = vmul.f32 %v4285_v46, %v4216_v42 }
  0xaa   :  { %170 = vbcast.lane.b32.xlu1 %v4067_v29, 256  ;;  %980 = vbcast.lane.b32.xlu0 %v4185_v18, 257  ;;  %v760_v52 = vadd.f32 %v744_v58, %v608_v60  ;;  %v356_v20 = vadd.f32 %v340_v25, %v186_v38  ;;  %v948_v38 = vmul.f32 %v4277_v15, %v4203_v34 }
  0xab   :  { %v962_v63 = vadd.f32 %v946_v56, %v911_v7 }
  0xac   :  { %v782_v0 = vpop.permute.xlu1 %781  ;;  %v501_v11 = vpop.permute.xlu0 %500 }
  0xad   :  { %v845_v2 = vmul.f32 %v4258_v1, %v782_v0  ;;  %v1007_v18 = vadd.f32 %v991_v59, %v962_v63  ;;  %v341_v0 = vmul.f32 %v4214_v40, %v4203_v34  ;;  %v993_v34 = vmul.f32 %v4285_v46, %v4238_v54 }
  0xae   :  { %563 = vbcast.lane.b32.xlu1 %v4298_v31, 256  ;;  %324 = vbcast.lane.b32.xlu0 %v322_v33, 256  ;;  %v4325_v33 = vrot.slane %v4103_v43, %v4082_v35  ;;  %v441_v43 = vmul.f32 %v4226_v45, %v4216_v42 }
  0xaf   :  { %v861_v5 = vadd.f32 %v845_v2, %v760_v52  ;;  %v4315_v8 = vadd.f32 %v4305_v12, %v1007_v18  ;;  %v187_v52 = vmul.f32 %v4221_v28, %v4198_v24  ;;  %v442_v2 = vmul.f32 %v4226_v45, %v4238_v54 }
  0xb0   :  { %v646_v13 = vpop.permute.xlu1 %645  ;;  %v4317_v14 = vpop.permute.xlu0 %388  ;;  %v457_v63 = vadd.f32 %v441_v43, %v356_v20 }
  0xb1   :  { %v912_v19 = vadd.f32 %v896_v16, %v861_v5  ;;  %v3185_v23 = vmul.f32 -1.442695, %v4315_v8  ;;  %v745_v42 = vmul.f32 %v4245_v57, %v646_v13  ;;  %v357_v13 = vadd.f32 %v341_v0, %v187_v52 }
  0xb2   :  { %177 = vbcast.lane.b32.xlu1 %v4086_v36, 256  ;;  %817 = vbcast.lane.b32.xlu0 %v4194_v22, 257  ;;  %v609_v9 = vadd.f32 %v593_v21, %v457_v63  ;;  %v443_v27 = vmul.f32 %v4226_v45, %v4317_v14 }
  0xb3   :  { %v963_v56 = vadd.f32 %v947_v17, %v912_v19  ;;  %3598 = vpow2.f32 %v3185_v23  ;;  %v897_v17 = vmul.f32 %v4267_v6, %v4198_v24  ;;  %v594_v19 = vmul.f32 %v4236_v51, %v501_v11 }
  0xb4   :  { %v653_v30 = vpop.permute.xlu1 %652  ;;  %v4334_v58 = vpop.permute.xlu0 %392  ;;  %v761_v5 = vadd.f32 %v745_v42, %v609_v9  ;;  %v898_v9 = vmul.f32 %v4267_v6, %v4252_v62 }
  0xb5   :  { %v1008_v22 = vadd.f32 %v992_v41, %v963_v56  ;;  %v458_v41 = vadd.f32 %v442_v2, %v357_v13  ;;  %v342_v13 = vmul.f32 %v4214_v40, %v4250_v61 }
  0xb6   :  { %570 = vbcast.lane.b32.xlu1 %v4325_v33, 256  ;;  %331 = vbcast.lane.b32.xlu0 %v329_v39, 256 }
  0xb7   :  { %v4344_v7 = vadd.f32 %v4305_v12, %v1008_v22  ;;  %v610_v11 = vadd.f32 %v594_v19, %v458_v41 }
  0xb8   :  { %v4346_v59 = vpop.permute.xlu1 %268  ;;  %v4348_v60 = vpop.permute.xlu0 %114 }
  0xb9   :  { %v3186_v39 = vmul.f32 -1.442695, %v4344_v7 }
  0xba   :  { %428 = vbcast.lane.b32.xlu1 %v4067_v29, 257  ;;  %821 = vbcast.lane.b32.xlu0 %v4207_v37, 257 }
  0xbb   :  { %3600 = vpow2.f32 %v3186_v39 }
  0xbc   :  { %v786_v18 = vpop.permute.xlu1 %785  ;;  %v4362_v16 = vpop.permute.xlu0 %507 }
  0xbd   :  { %v846_v29 = vmul.f32 %v4258_v1, %v786_v18  ;;  %v3599_v37 = vpop.eup %3598  ;;  %v595_v41 = vmul.f32 %v4236_v51, %v4362_v16  ;;  %v343_v16 = vmul.f32 %v4214_v40, %v4287_v48 }
  0xbe   :  { %432 = vbcast.lane.b32.xlu1 %v4086_v36, 257  ;;  %715 = vbcast.lane.b32.xlu0 %v713_v32, 256  ;;  %v1094_v25 = vadd.f32 1.0, %v3599_v37  ;;  %v746_v36 = vmul.f32 %v4245_v57, %v653_v30 }
  0xbf   :  { %v862_v23 = vadd.f32 %v846_v29, %v761_v5  ;;  %v949_v29 = vmul.f32 %v4277_v15, %v4250_v61 }
  0xc0   :  { %v4373_v56 = vpop.permute.xlu1 %275  ;;  %v4375_v43 = vpop.permute.xlu0 %121  ;;  %3602 = vrcp.f32 %v1094_v25  ;;  %v762_v30 = vadd.f32 %v746_v36, %v610_v11 }
  0xc1   :  { %v913_v22 = vadd.f32 %v897_v17, %v862_v23  ;;  %v345_v35 = vmul.f32 %v4214_v40, %v4373_v56  ;;  %v191_v24 = vmul.f32 %v4221_v28, %v4375_v43  ;;  %v994_v17 = vmul.f32 %v4285_v46, %v4317_v14  ;;  %v3178_v14 = vld [vmem:[%s5739_s20 + $0x18] ss:$0 sm:$0xff] }
  0xc2   :  { %577 = vbcast.lane.b32.xlu1 %v4107_v44, 256  ;;  %722 = vbcast.lane.b32.xlu0 %v720_v26, 256  ;;  %v188_v26 = vmul.f32 %v4221_v28, %v4252_v62 }
  0xc3   :  { %v964_v20 = vadd.f32 %v948_v38, %v913_v22  ;;  %v361_v21 = vadd.f32 %v345_v35, %v191_v24  ;;  %v189_v35 = vmul.f32 %v4221_v28, %v4289_v55 }
  0xc4   :  { %v790_v63 = vpop.permute.xlu1 %789  ;;  %v4385_v42 = vpop.permute.xlu0 %514  ;;  %v358_v62 = vadd.f32 %v342_v13, %v188_v26 }
  0xc5   :  { %v1009_v0 = vadd.f32 %v993_v34, %v964_v20  ;;  %v847_v32 = vmul.f32 %v4258_v1, %v790_v63  ;;  %v3601_v39 = vpop.eup %3600  ;;  %v3181_v34 = vld [vmem:[%s5739_s20 + $0x38] ss:$0 sm:$0xff]  ;;  %v444_v63 = vmul.f32 %v4226_v45, %v4334_v58 }
  0xc6   :  { %584 = vbcast.lane.b32.xlu1 %v4115_v47, 256  ;;  %825 = vbcast.lane.b32.xlu0 %v4298_v31, 257  ;;  %v1095_v54 = vadd.f32 1.0, %v3601_v39  ;;  %v459_v49 = vadd.f32 %v443_v27, %v358_v62  ;;  %v899_v39 = vmul.f32 %v4267_v6, %v4289_v55 }
  0xc7   :  { %v863_v52 = vadd.f32 %v847_v32, %v762_v30  ;;  %v4393_v2 = vadd.f32 %v4305_v12, %v1009_v0 }
  0xc8   :  { %v660_v18 = vpop.permute.xlu1 %659  ;;  %v4395_v5 = vpop.permute.xlu0 %396  ;;  %3604 = vrcp.f32 %v1095_v54  ;;  %v611_v24 = vadd.f32 %v595_v41, %v459_v49 }
  0xc9   :  { %v914_v37 = vadd.f32 %v898_v9, %v863_v52  ;;  %v3187_v31 = vmul.f32 -1.442695, %v4393_v2  ;;  %v359_v9 = vadd.f32 %v343_v16, %v189_v35  ;;  %v596_v52 = vmul.f32 %v4236_v51, %v4385_v42 }
  0xca   :  { %729 = vbcast.lane.b32.xlu1 %v727_v50, 256  ;;  %829 = vbcast.lane.b32.xlu0 %v4325_v33, 257  ;;  %v3603_v23 = vpop.eup %3602  ;;  %v995_v42 = vmul.f32 %v4285_v46, %v4334_v58  ;;  %v951_v58 = vmul.f32 %v4277_v15, %v4346_v59  ;;  %v344_v35 = vmul.f32 %v4214_v40, %v4346_v59 }
  0xcb   :  { %v965_v19 = vadd.f32 %v949_v29, %v914_v37  ;;  %3606 = vpow2.f32 %v3187_v31  ;;  %v4417_v61 = vmul.f32 %v3603_v23, %v4315_v8  ;;  %v460_v31 = vadd.f32 %v444_v63, %v359_v9 }
  0xcc   :  { %v667_v25 = vpop.permute.xlu1 %666  ;;  %v4410_v38 = vpop.permute.xlu0 %400 }
  0xcd   :  { %v1010_v50 = vadd.f32 %v994_v17, %v965_v19  ;;  %v446_v33 = vmul.f32 %v4226_v45, %v4410_v38  ;;  %5745 = vst [vmem:[#allocation8_spill] sm:$0xff] %v4417_v61  ;;  %3404 = vmatprep.mubr.msk.f32.mxu0 %vm1166_vm0, %v4417_v61  ;;  %v748_v55 = vmul.f32 %v4245_v57, %v667_v25 }
  0xce   :  { %833 = vbcast.lane.b32.xlu1 %v4107_v44, 257  ;;  %736 = vbcast.lane.b32.xlu0 %v734_v53, 256  ;;  %v747_v53 = vmul.f32 %v4245_v57, %v660_v18  ;;  %v612_v26 = vadd.f32 %v596_v52, %v460_v31 }
  0xcf   :  { %v4425_v36 = vadd.f32 %v446_v33, %v361_v21  ;;  %v4431_v22 = vadd.f32 %v4305_v12, %v1010_v50 }
  0xd0   :  { %v4435_v44 = vpop.permute.xlu1 %282  ;;  %v4437_v10 = vpop.permute.xlu0 %128  ;;  %v764_v50 = vadd.f32 %v748_v55, %v612_v26 }
  0xd1   :  { %v3188_v8 = vmul.f32 -1.442695, %v4431_v22 }
  0xd2   :  { %837 = vbcast.lane.b32.xlu0 %v4115_v47, 257  ;;  %888 = vbcast.lane.b32.xlu1 %v3178_v14, 256  ;;  %v3605_v11 = vpop.eup %3604  ;;  %v763_v47 = vadd.f32 %v747_v53, %v611_v24  ;;  %v190_v24 = vmul.f32 %v4221_v28, %v4348_v60 }
  0xd3   :  { %3608 = vpow2.f32 %v3188_v8  ;;  %v4453_v0 = vmul.f32 %v3605_v11, %v4344_v7  ;;  %v950_v7 = vmul.f32 %v4277_v15, %v4287_v48  ;;  %v900_v48 = vmul.f32 %v4267_v6, %v4348_v60 }
  0xd4   :  { %v794_v20 = vpop.permute.xlu1 %793  ;;  %v522_v21 = vpop.permute.xlu0 %521  ;;  %v360_v59 = vadd.f32 %v344_v35, %v190_v24 }
  0xd5   :  { %v848_v30 = vmul.f32 %v4258_v1, %v794_v20  ;;  %5746 = vst [vmem:[#allocation9_spill] sm:$0xff] %v4453_v0  ;;  %v3607_v32 = vpop.eup %3606  ;;  %3405 = vmatmul.mubr.msk.f32.vlgmr.msra.gmra.mrb[0].mxu0 %vm1166_vm0, %v4453_v0  ;;  %v597_v60 = vmul.f32 %v4236_v51, %v522_v21 }
  0xd6   :  { %939 = vbcast.lane.b32.xlu0 %v3181_v34, 256  ;;  %984 = vbcast.lane.b32.xlu1 %v3178_v14, 257  ;;  %v1096_v18 = vadd.f32 1.0, %v3607_v32  ;;  %v996_v34 = vmul.f32 %v4285_v46, %v4395_v5 }
  0xd7   :  { %v864_v54 = vadd.f32 %v848_v30, %v763_v47  ;;  %v445_v30 = vmul.f32 %v4226_v45, %v4395_v5 }
  0xd8   :  { %v4461_v29 = vpop.permute.xlu1 %289  ;;  %v4463_v37 = vpop.permute.xlu0 %135  ;;  %3610 = vrcp.f32 %v1096_v18 }
  0xd9   :  { %v915_v13 = vadd.f32 %v899_v39, %v864_v54  ;;  %v461_v18 = vadd.f32 %v445_v30, %v360_v59  ;;  %v192_v59 = vmul.f32 %v4221_v28, %v4437_v10 }
  0xdb   :  { %v966_v17 = vadd.f32 %v950_v7, %v915_v13  ;;  %v613_v55 = vadd.f32 %v597_v60, %v461_v18 }
  0xdc   :  { %v798_v19 = vpop.permute.xlu1 %797  ;;  %v4470_v23 = vpop.permute.xlu0 %528 }
  0xdd   :  { %v3609_v27 = vpop.eup %3608  ;;  %v1011_v33 = vadd.f32 %v995_v42, %v966_v17  ;;  %v849_v62 = vmul.f32 %v4258_v1, %v798_v19 }
  0xde   :  { %v1097_v41 = vadd.f32 1.0, %v3609_v27  ;;  %v901_v27 = vmul.f32 %v4267_v6, %v4375_v43 }
  0xdf   :  { %v865_v25 = vadd.f32 %v849_v62, %v764_v50  ;;  %v1034_v14 = vadd.f32 %v4305_v12, %v1011_v33 }
  0xe0   :  { %v674_v49 = vpop.permute.xlu1 %673  ;;  %v4476_v53 = vpop.permute.xlu0 %404  ;;  %3612 = vrcp.f32 %v1097_v41 }
  0xe1   :  { %v916_v8 = vadd.f32 %v900_v48, %v865_v25  ;;  %v3189_v16 = vmul.f32 -1.442695, %v1034_v14  ;;  %v749_v7 = vmul.f32 %v4245_v57, %v674_v49  ;;  %v997_v48 = vmul.f32 %v4285_v46, %v4410_v38 }
  0xe2   :  { %v3611_v20 = vpop.eup %3610  ;;  %v346_v38 = vmul.f32 %v4214_v40, %v4435_v44 }
  0xe3   :  { %v967_v11 = vadd.f32 %v951_v58, %v916_v8  ;;  %3614 = vpow2.f32 %v3189_v16  ;;  %v4493_v39 = vmul.f32 %v3611_v20, %v4393_v2  ;;  %v765_v26 = vadd.f32 %v749_v7, %v613_v55 }
  0xe4   :  { %v4486_v63 = vpop.permute.xlu1 %680  ;;  %v4488_v47 = vpop.permute.xlu0 %408 }
  0xe5   :  { %v1012_v32 = vadd.f32 %v996_v34, %v967_v11  ;;  %5747 = vst [vmem:[#allocation10_spill] sm:$0xff] %v4493_v39  ;;  %3407 = vmatprep.mubr.msk.f32.mxu0 %vm1166_vm0, %v4493_v39 }
  0xe7   :  { %v1035_v9 = vadd.f32 %v4305_v12, %v1012_v32 }
  0xe8   :  { %v4499_v52 = vpop.permute.xlu1 %296  ;;  %v4501_v54 = vpop.permute.xlu0 %142 }
  0xe9   :  { %v3190_v31 = vmul.f32 -1.442695, %v1035_v9 }
  0xea   :  { %v3613_v5 = vpop.eup %3612 }
  0xeb   :  { %v4505_v2 = vmul.f32 %v3613_v5, %v4431_v22  ;;  %3616 = vpow2.f32 %v3190_v31  ;;  %v952_v22 = vmul.f32 %v4277_v15, %v4373_v56  ;;  %v362_v5 = vadd.f32 %v346_v38, %v192_v59 }
  0xec   :  { %v802_v13 = vpop.permute.xlu1 %801  ;;  %v536_v21 = vpop.permute.xlu0 %535 }
  0xed   :  { %5748 = vst [vmem:[#allocation11_spill] sm:$0xff] %v4505_v2  ;;  %v3615_v42 = vpop.eup %3614  ;;  %v850_v17 = vmul.f32 %v4258_v1, %v802_v13  ;;  %3408 = vmatmul.mubr.msk.f32.gmra.mrb[2].mxu0 %vm1166_vm0, %v4505_v2  ;;  %v599_v31 = vmul.f32 %v4236_v51, %v536_v21 }
  0xee   :  { %v1098_v19 = vadd.f32 1.0, %v3615_v42 }
  0xef   :  { %v866_v50 = vadd.f32 %v850_v17, %v765_v26  ;;  %v193_v17 = vmul.f32 %v4221_v28, %v4463_v37 }
  0xf0   :  { %v4512_v33 = vpop.permute.xlu1 %303  ;;  %v4514_v62 = vpop.permute.xlu0 %149  ;;  %3618 = vrcp.f32 %v1098_v19 }
  0xf1   :  { %v917_v41 = vadd.f32 %v901_v27, %v866_v50 }
  0xf3   :  { %v968_v25 = vadd.f32 %v952_v22, %v917_v41 }
  0xf4   :  { %v4520_v49 = vpop.permute.xlu1 %805  ;;  %v543_v58 = vpop.permute.xlu0 %542 }
  0xf5   :  { %v1013_v8 = vadd.f32 %v997_v48, %v968_v25  ;;  %v3617_v16 = vpop.eup %3616  ;;  %v903_v25 = vmul.f32 %v4267_v6, %v4463_v37  ;;  %v598_v37 = vmul.f32 %v4236_v51, %v4470_v23 }
  0xf6   :  { %v1099_v43 = vadd.f32 1.0, %v3617_v16 }
  0xf7   :  { %v1036_v35 = vadd.f32 %v4305_v12, %v1013_v8  ;;  %v600_v8 = vmul.f32 %v4236_v51, %v543_v58  ;;  %v614_v23 = vadd.f32 %v598_v37, %v4425_v36 }
  0xf8   :  { %v688_v24 = vpop.permute.xlu1 %687  ;;  %v4523_v34 = vpop.permute.xlu0 %412  ;;  %3620 = vrcp.f32 %v1099_v43 }
  0xf9   :  { %v3191_v20 = vmul.f32 -1.442695, %v1036_v35  ;;  %v751_v26 = vmul.f32 %v4245_v57, %v688_v24  ;;  %v449_v37 = vmul.f32 %v4226_v45, %v4523_v34 }
  0xfa   :  { %v3619_v11 = vpop.eup %3618 }
  0xfb   :  { %v4525_v56 = vmul.f32 %v3619_v11, %v1034_v14  ;;  %3622 = vpow2.f32 %v3191_v20  ;;  %v447_v14 = vmul.f32 %v4226_v45, %v4476_v53  ;;  %v347_v53 = vmul.f32 %v4214_v40, %v4461_v29 }
  0xfc   :  { %v695_v30 = vpop.permute.xlu1 %694  ;;  %v4527_v32 = vpop.permute.xlu0 %416  ;;  %v954_v11 = vmul.f32 %v4277_v15, %v4461_v29  ;;  %v750_v29 = vmul.f32 %v4245_v57, %v4486_v63 }
  0xfd   :  { %5749 = vst [vmem:[#allocation12_spill] sm:$0xff] %v4525_v56  ;;  %3410 = vmatprep.mubr.msk.f32.mxu0 %vm1166_vm0, %v4525_v56  ;;  %v463_v44 = vadd.f32 %v447_v14, %v362_v5  ;;  %v363_v48 = vadd.f32 %v347_v53, %v193_v17  ;;  %v752_v38 = vmul.f32 %v4245_v57, %v695_v30 }
  0xfe   :  { %v904_v30 = vmul.f32 %v4267_v6, %v4501_v54  ;;  %v766_v63 = vadd.f32 %v750_v29, %v614_v23  ;;  %v195_v23 = vmul.f32 %v4221_v28, %v4514_v62 }
  0xff   :  { %v615_v21 = vadd.f32 %v599_v31, %v463_v44 }
 0x100   :  { %v4535_v60 = vpop.permute.xlu1 %156  ;;  %v882_v18 = vpop.permute.xlu0 %881 }
 0x101   :  { %v767_v22 = vadd.f32 %v751_v26, %v615_v21  ;;  %v999_v26 = vmul.f32 %v4285_v46, %v4488_v47 }
 0x102   :  { %v3621_v7 = vpop.eup %3620 }
 0x103   :  { %v4544_v42 = vmul.f32 %v3621_v7, %v1035_v9  ;;  %v448_v9 = vmul.f32 %v4226_v45, %v4488_v47  ;;  %v851_v47 = vmul.f32 %v4258_v1, %v4520_v49 }
 0x104   :  { %v4540_v55 = vpop.permute.xlu1 %549  ;;  %v4542_v13 = vpop.permute.xlu0 %310 }
 0x105   :  { %5750 = vst [vmem:[#allocation13_spill] sm:$0xff] %v4544_v42  ;;  %v3623_v10 = vpop.eup %3622  ;;  %3411 = vmatmul.mubr.msk.f32.gmra.mrb[4].mxu0 %vm1166_vm0, %v4544_v42  ;;  %v464_v20 = vadd.f32 %v448_v9, %v363_v48  ;;  %v955_v9 = vmul.f32 %v4277_v15, %v4499_v52  ;;  %v902_v48 = vmul.f32 %v4267_v6, %v882_v18 }
 0x106   :  { %v1100_v19 = vadd.f32 1.0, %v3623_v10 }
 0x107   :  { %v616_v14 = vadd.f32 %v600_v8, %v464_v20  ;;  %v348_v20 = vmul.f32 %v4214_v40, %v4499_v52 }
 0x108   :  { %v4553_v27 = vpop.permute.xlu1 %163  ;;  %v810_v50 = vpop.permute.xlu0 %809  ;;  %3624 = vrcp.f32 %v1100_v19 }
 0x109   :  { %v852_v41 = vmul.f32 %v4258_v1, %v810_v50  ;;  %v768_v58 = vadd.f32 %v752_v38, %v616_v14  ;;  %v194_v38 = vmul.f32 %v4221_v28, %v4501_v54  ;;  %v601_v54 = vmul.f32 %v4236_v51, %v4540_v55 }
 0x10b   :  { %v868_v16 = vadd.f32 %v852_v41, %v767_v22  ;;  %v1000_v41 = vmul.f32 %v4285_v46, %v4523_v34  ;;  %v349_v34 = vmul.f32 %v4214_v40, %v4512_v33 }
 0x10c   :  { %v4561_v43 = vpop.permute.xlu1 %556  ;;  %v4563_v24 = vpop.permute.xlu0 %317 }
 0x10d   :  { %v919_v59 = vadd.f32 %v903_v25, %v868_v16  ;;  %v867_v16 = vadd.f32 %v851_v47, %v766_v63  ;;  %v450_v63 = vmul.f32 %v4226_v45, %v4527_v32 }
 0x10f   :  { %v970_v7 = vadd.f32 %v954_v11, %v919_v59  ;;  %v918_v59 = vadd.f32 %v902_v48, %v867_v16  ;;  %v365_v48 = vadd.f32 %v349_v34, %v195_v23  ;;  %v602_v16 = vmul.f32 %v4236_v51, %v4561_v43 }
 0x110   :  { %v933_v5 = vpop.permute.xlu1 %932  ;;  %v814_v31 = vpop.permute.xlu0 %813  ;;  %v906_v34 = vmul.f32 %v4267_v6, %v4535_v60 }
 0x111   :  { %v853_v44 = vmul.f32 %v4258_v1, %v814_v31  ;;  %v1015_v17 = vadd.f32 %v999_v26, %v970_v7  ;;  %v953_v49 = vmul.f32 %v4277_v15, %v933_v5 }
 0x112   :  { %v3625_v10 = vpop.eup %3624 }
 0x113   :  { %v869_v53 = vadd.f32 %v853_v44, %v768_v58  ;;  %v4579_v50 = vmul.f32 %v3625_v10, %v1036_v35  ;;  %v4594_v36 = vadd.f32 %v4305_v12, %v1015_v17  ;;  %v969_v5 = vadd.f32 %v953_v49, %v918_v59 }
 0x114   :  { %v702_v21 = vpop.permute.xlu1 %701  ;;  %v4577_v19 = vpop.permute.xlu0 %420  ;;  %v364_v44 = vadd.f32 %v348_v20, %v194_v38  ;;  %v956_v38 = vmul.f32 %v4277_v15, %v4512_v33  ;;  %v466_v59 = vadd.f32 %v450_v63, %v365_v48  ;;  %v350_v33 = vmul.f32 %v4214_v40, %v4542_v13 }
 0x115   :  { %5751 = vst [vmem:[#allocation14_spill] sm:$0xff] %v4579_v50  ;;  %v920_v22 = vadd.f32 %v904_v30, %v869_v53  ;;  %3413 = vmatprep.mubr.msk.f32.mxu0 %vm1166_vm0, %v4579_v50  ;;  %v3193_v31 = vmul.f32 -1.442695, %v4594_v36  ;;  %v753_v53 = vmul.f32 %v4245_v57, %v702_v21  ;;  %v451_v48 = vmul.f32 %v4226_v45, %v4577_v19 }
 0x116   :  { %v465_v30 = vadd.f32 %v449_v37, %v364_v44 }
 0x117   :  { %v971_v35 = vadd.f32 %v955_v9, %v920_v22  ;;  %3626 = vpow2.f32 %v3193_v31 }
 0x118   :  { %v709_v25 = vpop.permute.xlu1 %708  ;;  %v4591_v8 = vpop.permute.xlu0 %424  ;;  %v617_v9 = vadd.f32 %v601_v54, %v465_v30 }
 0x119   :  { %v1016_v11 = vadd.f32 %v1000_v41, %v971_v35  ;;  %v905_v35 = vmul.f32 %v4267_v6, %v4514_v62 }
 0x11a   :  { %v769_v21 = vadd.f32 %v753_v53, %v617_v9 }
 0x11b   :  { %v4602_v18 = vadd.f32 %v4305_v12, %v1016_v11 }
 0x11c   :  { %v4604_v14 = vpop.permute.xlu1 %170  ;;  %v981_v7 = vpop.permute.xlu0 %980 }
 0x11d   :  { %v998_v58 = vmul.f32 %v4285_v46, %v981_v7  ;;  %v3194_v52 = vmul.f32 -1.442695, %v4602_v18  ;;  %v754_v7 = vmul.f32 %v4245_v57, %v709_v25 }
 0x11f   :  { %v1014_v26 = vadd.f32 %v998_v58, %v969_v5  ;;  %3628 = vpow2.f32 %v3194_v52  ;;  %v1001_v5 = vmul.f32 %v4285_v46, %v4527_v32  ;;  %v618_v58 = vadd.f32 %v602_v16, %v466_v59 }
 0x120   :  { %v564_v10 = vpop.permute.xlu1 %563  ;;  %v4613_v29 = vpop.permute.xlu0 %324 }
 0x121   :  { %v4617_v17 = vadd.f32 %v4305_v12, %v1014_v26  ;;  %v3627_v37 = vpop.eup %3626  ;;  %v770_v54 = vadd.f32 %v754_v7, %v618_v58  ;;  %v603_v59 = vmul.f32 %v4236_v51, %v564_v10 }
 0x122   :  { %v1102_v53 = vadd.f32 1.0, %v3627_v37 }
 0x123   :  { %v3192_v55 = vmul.f32 -1.442695, %v4617_v17 }
 0x124   :  { %v4624_v47 = vpop.permute.xlu1 %177  ;;  %v818_v22 = vpop.permute.xlu0 %817 }
 0x125   :  { %3630 = vpow2.f32 %v3192_v55  ;;  %v854_v41 = vmul.f32 %v4258_v1, %v818_v22  ;;  %v196_v55 = vmul.f32 %v4221_v28, %v4535_v60  ;;  %v1002_v60 = vmul.f32 %v4285_v46, %v4577_v19 }
 0x126   :  { %3632 = vrcp.f32 %v1102_v53  ;;  %v352_v19 = vmul.f32 %v4214_v40, %v4613_v29  ;;  %v198_v53 = vmul.f32 %v4221_v28, %v4604_v14 }
 0x127   :  { %v870_v49 = vadd.f32 %v854_v41, %v769_v21  ;;  %v957_v41 = vmul.f32 %v4277_v15, %v4542_v13  ;;  %v366_v16 = vadd.f32 %v350_v33, %v196_v55  ;;  %v197_v13 = vmul.f32 %v4221_v28, %v4553_v27 }
 0x128   :  { %v571_v11 = vpop.permute.xlu1 %570  ;;  %v4633_v20 = vpop.permute.xlu0 %331 }
 0x129   :  { %v921_v31 = vadd.f32 %v905_v35, %v870_v49  ;;  %v3629_v52 = vpop.eup %3628  ;;  %v351_v49 = vmul.f32 %v4214_v40, %v4563_v24  ;;  %v467_v58 = vadd.f32 %v451_v48, %v366_v16  ;;  %v604_v10 = vmul.f32 %v4236_v51, %v571_v11 }
 0x12a   :  { %v1103_v32 = vadd.f32 1.0, %v3629_v52  ;;  %v353_v48 = vmul.f32 %v4214_v40, %v4633_v20 }
 0x12b   :  { %v972_v62 = vadd.f32 %v956_v38, %v921_v31  ;;  %v452_v31 = vmul.f32 %v4226_v45, %v4591_v8 }
 0x12c   :  { %v4640_v44 = vpop.permute.xlu1 %428  ;;  %v822_v43 = vpop.permute.xlu0 %821 }
 0x12d   :  { %v1017_v26 = vadd.f32 %v1001_v5, %v972_v62  ;;  %v855_v30 = vmul.f32 %v4258_v1, %v822_v43  ;;  %v367_v43 = vadd.f32 %v351_v49, %v197_v13  ;;  %v453_v33 = vmul.f32 %v4226_v45, %v4640_v44 }
 0x12e   :  { %v958_v49 = vmul.f32 %v4277_v15, %v4563_v24 }
 0x12f   :  { %v3631_v25 = vpop.eup %3630  ;;  %v871_v23 = vadd.f32 %v855_v30, %v770_v54  ;;  %v4648_v9 = vadd.f32 %v4305_v12, %v1017_v26  ;;  %v619_v54 = vadd.f32 %v603_v59, %v467_v58  ;;  %v468_v30 = vadd.f32 %v452_v31, %v367_v43 }
 0x130   :  { %v1101_v22 = vadd.f32 1.0, %v3631_v25  ;;  %v4652_v63 = vpop.permute.xlu1 %432  ;;  %v716_v21 = vpop.permute.xlu0 %715  ;;  %v199_v59 = vmul.f32 %v4221_v28, %v4624_v47 }
 0x131   :  { %v922_v35 = vadd.f32 %v906_v34, %v871_v23  ;;  %v3195_v38 = vmul.f32 -1.442695, %v4648_v9  ;;  %v755_v52 = vmul.f32 %v4245_v57, %v716_v21  ;;  %v368_v21 = vadd.f32 %v352_v19, %v198_v53  ;;  %v3633_v16 = vpop.eup %3632 }
 0x132   :  { %3634 = vrcp.f32 %v1101_v22  ;;  %v454_v13 = vmul.f32 %v4226_v45, %v4652_v63  ;;  %v369_v43 = vadd.f32 %v353_v48, %v199_v59  ;;  %v908_v45 = vmul.f32 %v4267_v6, %v4604_v14 }
 0x133   :  { %v973_v7 = vadd.f32 %v957_v41, %v922_v35  ;;  %3636 = vrcp.f32 %v1103_v32  ;;  %v907_v32 = vmul.f32 %v4267_v6, %v4553_v27  ;;  %v771_v55 = vadd.f32 %v755_v52, %v619_v54 }
 0x134   :  { %v578_v37 = vpop.permute.xlu1 %577  ;;  %v723_v5 = vpop.permute.xlu0 %722  ;;  %3638 = vpow2.f32 %v3195_v38  ;;  %v620_v41 = vadd.f32 %v604_v10, %v468_v30  ;;  %v1003_v38 = vmul.f32 %v4285_v46, %v4591_v8  ;;  %v4702_v10 = vmul.f32 %v3633_v16, %v4594_v36 }
 0x135   :  { %v1018_v62 = vadd.f32 %v1002_v60, %v973_v7  ;;  %v756_v25 = vmul.f32 %v4245_v57, %v723_v5  ;;  %v605_v35 = vmul.f32 %v4236_v51, %v578_v37  ;;  %v469_v7 = vadd.f32 %v453_v33, %v368_v21 }
 0x136   :  { %5753 = vst [vmem:[#allocation16_spill] sm:$0xff] %v4702_v10  ;;  %v959_v53 = vmul.f32 %v4277_v15, %v4613_v29  ;;  %v470_v33 = vadd.f32 %v454_v13, %v369_v43  ;;  %v909_v29 = vmul.f32 %v4267_v6, %v4624_v47 }
 0x137   :  { %v4673_v26 = vadd.f32 %v4305_v12, %v1018_v62  ;;  %v772_v40 = vadd.f32 %v756_v25, %v620_v41  ;;  %v621_v19 = vadd.f32 %v605_v35, %v469_v7 }
 0x138   :  { %v585_v34 = vpop.permute.xlu1 %584  ;;  %v826_v23 = vpop.permute.xlu0 %825 }
 0x139   :  { %v856_v11 = vmul.f32 %v4258_v1, %v826_v23  ;;  %v3196_v22 = vmul.f32 -1.442695, %v4673_v26  ;;  %v606_v28 = vmul.f32 %v4236_v51, %v585_v34 }
 0x13b   :  { %v872_v27 = vadd.f32 %v856_v11, %v771_v55  ;;  %3640 = vpow2.f32 %v3196_v22  ;;  %v622_v55 = vadd.f32 %v606_v28, %v470_v33  ;;  %v1004_v22 = vmul.f32 %v4285_v46, %v4640_v44 }
 0x13c   :  { %v3635_v60 = vpop.eup %3634  ;;  %v730_v31 = vpop.permute.xlu1 %729 }
 0x13d   :  { %v830_v37 = vpop.permute.xlu0 %829  ;;  %v3637_v5 = vpop.eup %3636  ;;  %v4696_v58 = vmul.f32 %v3635_v60, %v4617_v17  ;;  %v923_v24 = vadd.f32 %v907_v32, %v872_v27  ;;  %v757_v8 = vmul.f32 %v4245_v57, %v730_v31  ;;  %v3862_v31 = vld [vmem:[%s5743_s3 + $0x7] ss:$0 sm:$0xff] }
 0x13e   :  { %v857_v62 = vmul.f32 %v4258_v1, %v830_v37  ;;  %v3639_v52 = vpop.eup %3638  ;;  %v4713_v36 = vmul.f32 %v3637_v5, %v4602_v18  ;;  %v960_v18 = vmul.f32 %v4277_v15, %v4633_v20  ;;  %v3863_v5 = vld [vmem:[%s5743_s3 + $0x8] ss:$0 sm:$0xff] }
 0x13f   :  { %5752 = vst [vmem:[#allocation15_spill] sm:$0xff] %v4696_v58  ;;  %v974_v54 = vadd.f32 %v958_v49, %v923_v24  ;;  %3414 = vmatmul.mubr.msk.f32.gmra.mrb[6].mxu0 %vm1166_vm0, %v4696_v58  ;;  %v1104_v17 = vadd.f32 1.0, %v3639_v52  ;;  %v773_v25 = vadd.f32 %v757_v8, %v621_v19 }
 0x140   :  { %v873_v30 = vadd.f32 %v857_v62, %v772_v40  ;;  %v834_v23 = vpop.permute.xlu1 %833  ;;  %3416 = vmatprep.mubr.msk.f32.mxu0 %vm1166_vm0, %v4702_v10  ;;  %5754 = vst [vmem:[#allocation17_spill] sm:$0xff] %v4713_v36 }
 0x141   :  { %v737_v51 = vpop.permute.xlu0 %736  ;;  %v858_v34 = vmul.f32 %v4258_v1, %v834_v23  ;;  %3642 = vrcp.f32 %v1104_v17  ;;  %v1019_v11 = vadd.f32 %v1003_v38, %v974_v54 }
 0x142   :  { %v924_v14 = vadd.f32 %v908_v45, %v873_v30  ;;  %v758_v32 = vmul.f32 %v4245_v57, %v737_v51  ;;  %v1005_v57 = vmul.f32 %v4285_v46, %v4652_v63  ;;  %v5713_v63 = vmov 0.0  }
 0x143   :  { %v874_v41 = vadd.f32 %v858_v34, %v773_v25  ;;  %3417 = vmatmul.mubr.msk.f32.gmra.mrb[8].mxu0 %vm1166_vm0, %v4713_v36  ;;  %v4728_v49 = vadd.f32 %v4305_v12, %v1019_v11  ;;  %1478 = vst.msk [vmem:[#allocation2 + $0x20] sm:$0xff] %vm1472_vm1, %v5713_v63  ;;  %1473 = vst.msk [vmem:[#allocation2] sm:$0xff] %vm1472_vm1, %v5713_v63 }
 0x144   :  { %v975_v21 = vadd.f32 %v959_v53, %v924_v14  ;;  %v774_v48 = vadd.f32 %v758_v32, %v622_v55  ;;  %v889_v16 = vpop.permute.xlu1 %888  ;;  %1476 = vst.msk [vmem:[#allocation2 + $0x10] sm:$0xff] %vm1472_vm1, %v5713_v63  ;;  %1480 = vst.msk [vmem:[#allocation2 + $0x30] sm:$0xff] %vm1472_vm1, %v5713_v63 }
 0x145   :  { %v838_v35 = vpop.permute.xlu0 %837  ;;  %v3641_v47 = vpop.eup %3640  ;;  %v925_v44 = vadd.f32 %v909_v29, %v874_v41  ;;  %v910_v60 = vmul.f32 %v4267_v6, %v889_v16  ;;  %v3197_v7 = vmul.f32 -1.442695, %v4728_v49  ;;  %1482 = vst.msk [vmem:[#allocation2 + $0x40] sm:$0xff] %vm1472_vm1, %v5713_v63  ;;  %1484 = vst.msk [vmem:[#allocation2 + $0x50] sm:$0xff] %vm1472_vm1, %v5713_v63 }
 0x146   :  { %v1020_v38 = vadd.f32 %v1004_v22, %v975_v21  ;;  %v859_v27 = vmul.f32 %v4258_v1, %v838_v35  ;;  %v1105_v59 = vadd.f32 1.0, %v3641_v47  ;;  %1486 = vst.msk [vmem:[#allocation2 + $0x60] sm:$0xff] %vm1472_vm1, %v5713_v63  ;;  %1488 = vst.msk [vmem:[#allocation2 + $0x70] sm:$0xff] %vm1472_vm1, %v5713_v63 }
 0x147   :  { %v976_v15 = vadd.f32 %v960_v18, %v925_v44  ;;  %1490 = vst.msk [vmem:[#allocation2 + $0x80] sm:$0xff] %vm1472_vm1, %v5713_v63  ;;  %1492 = vst.msk [vmem:[#allocation2 + $0x90] sm:$0xff] %vm1472_vm1, %v5713_v63  ;;  %v4856_v18 = vld [vmem:[%s5693_s4] ss:$0 sm:$0xff]  ;;  %s3891_s4 = smov [#allocation3]  }
 0x148   :  { %v875_v20 = vadd.f32 %v859_v27, %v774_v48  ;;  %v4734_v46 = vadd.f32 %v4305_v12, %v1020_v38  ;;  %1494 = vst.msk [vmem:[#allocation2 + $0xa0] sm:$0xff] %vm1472_vm1, %v5713_v63  ;;  %1496 = vst.msk [vmem:[#allocation2 + $0xb0] sm:$0xff] %vm1472_vm1, %v5713_v63  ;;  %v985_v6 = vpop.permute.xlu1 %984  ;;  %3644 = vrcp.f32 %v1105_v59  ;;  %s3155_s29 = sshll.u32 %s3891_s4, 4  ;;  %s3156_s29 = int_to_ptr.vmem [resolvable:$true] %s3155_s29 }
 0x149   :  { %1498 = vst.msk [vmem:[#allocation2 + $0xc0] sm:$0xff] %vm1472_vm1, %v5713_v63  ;;  %1500 = vst.msk [vmem:[#allocation2 + $0xd0] sm:$0xff] %vm1472_vm1, %v5713_v63  ;;  %v940_v1 = vpop.permute.xlu0 %939  ;;  %v1021_v13 = vadd.f32 %v1005_v57, %v976_v15  ;;  %v1006_v24 = vmul.f32 %v3863_v5, %v985_v6  ;;  %3646 = vpow2.f32 %v3197_v7  ;;  %s3864_s0 = scalar_lea.vmem %s3156_s29, 32  ;;  %p3869_p1 = scmp.lt.s32.totalorder %s3156_s29, %s3156_s29 }
 0x14a   :  { %1502 = vst.msk [vmem:[#allocation2 + $0xe0] sm:$0xff] %vm1472_vm1, %v5713_v63  ;;  %1504 = vst.msk [vmem:[#allocation2 + $0xf0] sm:$0xff] %vm1472_vm1, %v5713_v63  ;;  %v926_v40 = vadd.f32 %v910_v60, %v875_v20  ;;  %v961_v37 = vmul.f32 %v3862_v31, %v940_v1  ;;  %v3198_v8 = vmul.f32 -1.442695, %v4734_v46  ;;  %p3865_p0 = scmp.ne.s32.totalorder %s3156_s29, %s3864_s0  ;;  %p3870_p2 = scmp.lt.s32.totalorder %s3864_s0, %s3864_s0 }
 0x14b   :  { %1506 = vst.msk [vmem:[#allocation2 + $0x100] sm:$0xff] %vm1472_vm1, %v5713_v63  ;;  %1508 = vst.msk [vmem:[#allocation2 + $0x110] sm:$0xff] %vm1472_vm1, %v5713_v63  ;;  %v3643_v62 = vpop.eup %3642  ;;  %v1044_v43 = vadd.f32 %v4305_v12, %v1021_v13 }
 0x14c   :  { %1510 = vst.msk [vmem:[#allocation2 + $0x120] sm:$0xff] %vm1472_vm1, %v5713_v63  ;;  %1512 = vst.msk [vmem:[#allocation2 + $0x130] sm:$0xff] %vm1472_vm1, %v5713_v63  ;;  %v977_v52 = vadd.f32 %v961_v37, %v926_v40  ;;  %v4825_v19 = vmul.f32 %v3643_v62, %v4648_v9  ;;  %3648 = vpow2.f32 %v3198_v8  ;;  %p3871_p3 = por %p3870_p2, %p3869_p1 }
 0x14d   :  { %1479 = vst.msk [vmem:[#allocation2 + $0x28] sm:$0x3] %vm1474_vm2, %v5713_v63  ;;  %1475 = vst.msk [vmem:[#allocation2 + $0x8] sm:$0x3] %vm1474_vm2, %v5713_v63  ;;  %v3199_v45 = vmul.f32 -1.442695, %v1044_v43 }
 0x14e   :  { %1477 = vst.msk [vmem:[#allocation2 + $0x18] sm:$0x3] %vm1474_vm2, %v5713_v63  ;;  %1481 = vst.msk [vmem:[#allocation2 + $0x38] sm:$0x3] %vm1474_vm2, %v5713_v63  ;;  %v1022_v28 = vadd.f32 %v1006_v24, %v977_v52  ;;  %3419 = vmatprep.mubr.msk.f32.mxu0 %vm1166_vm0, %v4825_v19  ;;  %p3872_p4 = pnand %p3871_p3, %p3865_p0 }
 0x14f   :  { %1483 = vst.msk [vmem:[#allocation2 + $0x48] sm:$0x3] %vm1474_vm2, %v5713_v63  ;;  %1485 = vst.msk [vmem:[#allocation2 + $0x58] sm:$0x3] %vm1474_vm2, %v5713_v63  ;;  %3650 = vpow2.f32 %v3199_v45 }
 0x150   :  { %1487 = vst.msk [vmem:[#allocation2 + $0x68] sm:$0x3] %vm1474_vm2, %v5713_v63  ;;  %1489 = vst.msk [vmem:[#allocation2 + $0x78] sm:$0x3] %vm1474_vm2, %v5713_v63  ;;  %v1045_v54 = vadd.f32 %v4305_v12, %v1022_v28 }
 0x151   :  { %1491 = vst.msk [vmem:[#allocation2 + $0x88] sm:$0x3] %vm1474_vm2, %v5713_v63  ;;  %1493 = vst.msk [vmem:[#allocation2 + $0x98] sm:$0x3] %vm1474_vm2, %v5713_v63 }
 0x152   :  { %1495 = vst.msk [vmem:[#allocation2 + $0xa8] sm:$0x3] %vm1474_vm2, %v5713_v63  ;;  %1497 = vst.msk [vmem:[#allocation2 + $0xb8] sm:$0x3] %vm1474_vm2, %v5713_v63  ;;  %v3200_v30 = vmul.f32 -1.442695, %v1045_v54  ;;  %v3645_v17 = vpop.eup %3644 }
 0x153   :  { %1499 = vst.msk [vmem:[#allocation2 + $0xc8] sm:$0x3] %vm1474_vm2, %v5713_v63  ;;  %1501 = vst.msk [vmem:[#allocation2 + $0xd8] sm:$0x3] %vm1474_vm2, %v5713_v63  ;;  %v4831_v53 = vmul.f32 %v3645_v17, %v4673_v26  ;;  %v3647_v33 = vpop.eup %3646 }
 0x154   :  { %1503 = vst.msk [vmem:[#allocation2 + $0xe8] sm:$0x3] %vm1474_vm2, %v5713_v63  ;;  %1505 = vst.msk [vmem:[#allocation2 + $0xf8] sm:$0x3] %vm1474_vm2, %v5713_v63  ;;  %3652 = vpow2.f32 %v3200_v30  ;;  %v1106_v9 = vadd.f32 1.0, %v3647_v33 }
 0x155   :  { %1507 = vst.msk [vmem:[#allocation2 + $0x108] sm:$0x3] %vm1474_vm2, %v5713_v63  ;;  %1509 = vst.msk [vmem:[#allocation2 + $0x118] sm:$0x3] %vm1474_vm2, %v5713_v63  ;;  %3420 = vmatmul.mubr.msk.f32.gmra.mrb[10].mxu0 %vm1166_vm0, %v4831_v53 }
 0x156   :  { %1511 = vst.msk [vmem:[#allocation2 + $0x128] sm:$0x3] %vm1474_vm2, %v5713_v63  ;;  %1513 = vst.msk [vmem:[#allocation2 + $0x138] sm:$0x3] %vm1474_vm2, %v5713_v63  ;;  %v3649_v25 = vpop.eup %3648  ;;  %3654 = vrcp.f32 %v1106_v9 }
 0x157   :  { %5755 = vst [vmem:[#allocation18_spill] sm:$0xff] %v4825_v19  ;;  %5756 = vst [vmem:[#allocation19_spill] sm:$0xff] %v4831_v53  ;;  %v1107_v23 = vadd.f32 1.0, %v3649_v25 }
 0x159   :  { %v3651_v51 = vpop.eup %3650  ;;  %3656 = vrcp.f32 %v1107_v23 }
 0x15a   :  { %v1108_v14 = vadd.f32 1.0, %v3651_v51 }
 0x15c   :  { %3658 = vrcp.f32 %v1108_v14 }
 0x15e   :  { %v3653_v12 = vpop.eup %3652 }
 0x15f   :  { %v1109_v34 = vadd.f32 1.0, %v3653_v12  ;;  %v2190_v12 = vld [vmem:[%s5696_s7] sm:$0xff] }
 0x160   :  { %v3655_v32 = vpop.eup %3654 }
 0x161   :  { %3660 = vrcp.f32 %v1109_v34  ;;  %v4836_v55 = vmul.f32 %v3655_v32, %v4728_v49  ;;  %v2191_v34 = vld [vmem:[%s5696_s7 + $0x8] sm:$0xff]  ;;  %v5711_v32 = vmov 0.0|0.0  }
 0x162   :  { %3548 = vmatprep.subr.bf16.mxu1 %v5711_v32 }
 0x163   :  { %5757 = vst [vmem:[#allocation20_spill] sm:$0xff] %v4836_v55  ;;  %v3657_v26 = vpop.eup %3656  ;;  %3422 = vmatprep.mubr.msk.f32.mxu1 %vm1166_vm0, %v4836_v55 }
 0x164   :  { %v4841_v11 = vmul.f32 %v3657_v26, %v4734_v46  ;;  %v2192_v26 = vld [vmem:[%s5696_s7 + $0x10] sm:$0xff] }
 0x166   :  { %5758 = vst [vmem:[#allocation21_spill] sm:$0xff] %v4841_v11  ;;  %v3659_v29 = vpop.eup %3658  ;;  %3423 = vmatmul.mubr.msk.f32.vlgmr.msra.gmra.mrb[0].mxu1 %vm1166_vm0, %v4841_v11 }
 0x167   :  { %v4845_v22 = vmul.f32 %v3659_v29, %v1044_v43  ;;  %v2193_v29 = vld [vmem:[%s5696_s7 + $0x18] sm:$0xff] }
 0x169   :  { %5759 = vst [vmem:[#allocation22_spill] sm:$0xff] %v4845_v22  ;;  %3425 = vmatprep.mubr.msk.f32.mxu1 %vm1166_vm0, %v4845_v22 }
 0x16b   :  { %v3661_v21 = vpop.eup %3660 }
 0x16c   :  { %v4849_v41 = vmul.f32 %v3661_v21, %v1045_v54  ;;  %v3549_v21 = vpack.c.bf16 %v2191_v34, %v2190_v12 }
 0x16e   :  { %5760 = vst [vmem:[#allocation23_spill] sm:$0xff] %v4849_v41  ;;  %3426 = vmatmul.mubr.msk.f32.gmra.mrb[2].mxu1 %vm1166_vm0, %v4849_v41 }
 0x16f   :  { %3550 = vmatpush3.bf16.msra.mxu1 %v3549_v21  ;;  %3436 = vmatprep.mubr.msk.f32.mxu1 %vm3890_vm3, %v5713_v63 }
 0x170   :  { %3551 = vmatprep.subr.bf16.mxu1 %v5711_v32 }
 0x1a8   :  { %v3406_v57 = vpop.f32.mrb[0].mxu0 }
 0x1a9   :  { %v1287_v48 = vadd.f32 %v3406_v57, %v4856_v18  ;;  %v1281_v35 = vpop.f32.mrb[1].mxu0  ;;  %v3552_v57 = vpack.c.bf16 %v2193_v29, %v2192_v26 }
 0x1aa   :  { %v1282_v16 = vadd.f32 %v4856_v18, %v1281_v35 }
 0x1ab   :  { %v3219_v49 = vmul.f32 -1.442695, %v1287_v48  ;;  %3553 = vmatpush3.bf16.msra.mxu1 %v3552_v57 }
 0x1ac   :  { %v3218_v47 = vmul.f32 -1.442695, %v1282_v16  ;;  %3439 = vmatprep.subr.mxu1 %v5713_v63 }
 0x1ad   :  { %3662 = vpow2.f32 %v3219_v49 }
 0x1ae   :  { %3664 = vpow2.f32 %v3218_v47  ;;  %v4890_v47 = vld [vmem:[%s5694_s5] ss:$0 sm:$0xff] }
 0x1b7   :  { %v3663_v38 = vpop.eup %3662 }
 0x1b8   :  { %v3665_v44 = vpop.eup %3664  ;;  %v1409_v27 = vadd.f32 1.0, %v3663_v38  ;;  %v4895_v38 = vld [vmem:[%s5694_s5 + $0x1] ss:$0 sm:$0xff] }
 0x1b9   :  { %v1408_v60 = vadd.f32 1.0, %v3665_v44  ;;  %v1531_v44 = vld [vmem:[#allocation2] sm:$0xff] }
 0x1ba   :  { %3666 = vrcp.f32 %v1409_v27  ;;  %v1584_v27 = vld [vmem:[#allocation2 + $0x1] sm:$0xff] }
 0x1bb   :  { %3668 = vrcp.f32 %v1408_v60  ;;  %v1552_v60 = vmul.f32 %v4890_v47, %v1531_v44  ;;  %v4948_v44 = vld [vmem:[%s5694_s5 + $0x5] ss:$0 sm:$0xff] }
 0x1c0   :  { %v3409_v59 = vpop.f32.mrb[2].mxu0 }
 0x1c1   :  { %v1297_v7 = vadd.f32 %v3409_v59, %v4856_v18  ;;  %v1291_v15 = vpop.f32.mrb[3].mxu0  ;;  %v1605_v59 = vmul.f32 %v4895_v38, %v1584_v27 }
 0x1c2   :  { %v1292_v20 = vadd.f32 %v4856_v18, %v1291_v15  ;;  %v1637_v15 = vld [vmem:[#allocation2 + $0x2] sm:$0xff] }
 0x1c3   :  { %v3221_v46 = vmul.f32 -1.442695, %v1297_v7 }
 0x1c4   :  { %v3220_v1 = vmul.f32 -1.442695, %v1292_v20  ;;  %v3667_v6 = vpop.eup %3666 }
 0x1c5   :  { %3670 = vpow2.f32 %v3221_v46  ;;  %v3669_v13 = vpop.eup %3668  ;;  %v1457_v40 = vmul.f32 %v3667_v6, %v1287_v48 }
 0x1c6   :  { %3672 = vpow2.f32 %v3220_v1  ;;  %v1456_v31 = vmul.f32 %v3669_v13, %v1282_v16  ;;  %v4908_v1 = vld [vmem:[%s5694_s5 + $0x3] ss:$0 sm:$0xff] }
 0x1c7   :  { %1516 = vst.msk [vmem:[#allocation2 + $0x21] sm:$0xff] %vm1472_vm1, %v1457_v40 }
 0x1c8   :  { %1515 = vst.msk [vmem:[#allocation2 + $0x11] sm:$0xff] %vm1472_vm1, %v1456_v31 }
 0x1ce   :  { %v1533_v40 = vld [vmem:[#allocation2 + $0x20] sm:$0xff] }
 0x1cf   :  { %v3671_v37 = vpop.eup %3670  ;;  %v1532_v6 = vld [vmem:[#allocation2 + $0x10] sm:$0xff]  ;;  %v4910_v31 = vld [vmem:[#allocation2 + $0x21] sm:$0xff] }
 0x1d0   :  { %v1411_v5 = vadd.f32 1.0, %v3671_v37  ;;  %v3673_v24 = vpop.eup %3672  ;;  %v1585_v13 = vld [vmem:[#allocation2 + $0x11] sm:$0xff]  ;;  %v1553_v37 = vmul.f32 %v4890_v47, %v1532_v6 }
 0x1d1   :  { %v1410_v8 = vadd.f32 1.0, %v3673_v24 }
 0x1d2   :  { %3674 = vrcp.f32 %v1411_v5  ;;  %v1606_v5 = vmul.f32 %v4895_v38, %v1585_v13 }
 0x1d3   :  { %3676 = vrcp.f32 %v1410_v8  ;;  %v1711_v8 = vmul.f32 %v4908_v1, %v1532_v6 }
 0x1d8   :  { %v3412_v62 = vpop.f32.mrb[4].mxu0 }
 0x1d9   :  { %v1307_v52 = vadd.f32 %v3412_v62, %v4856_v18  ;;  %v1301_v43 = vpop.f32.mrb[5].mxu0 }
 0x1da   :  { %v1302_v28 = vadd.f32 %v4856_v18, %v1301_v43 }
 0x1db   :  { %v3223_v45 = vmul.f32 -1.442695, %v1307_v52 }
 0x1dc   :  { %v3222_v54 = vmul.f32 -1.442695, %v1302_v28  ;;  %v3675_v30 = vpop.eup %3674 }
 0x1dd   :  { %3678 = vpow2.f32 %v3223_v45  ;;  %v1459_v17 = vmul.f32 %v3675_v30, %v1297_v7  ;;  %v3677_v33 = vpop.eup %3676  ;;  %v4902_v7 = vld [vmem:[%s5694_s5 + $0x2] ss:$0 sm:$0xff]  ;;  %v1554_v45 = vmul.f32 %v4890_v47, %v1533_v40  ;;  %v4927_v30 = vld [vmem:[%s5694_s5 + $0x4] ss:$0 sm:$0xff] }
 0x1de   :  { %3680 = vpow2.f32 %v3222_v54  ;;  %v1458_v9 = vmul.f32 %v3677_v33, %v1292_v20  ;;  %v1621_v20 = vadd.f32 %v1605_v59, %v1552_v60  ;;  %v1658_v46 = vmul.f32 %v4902_v7, %v1637_v15 }
 0x1df   :  { %1518 = vst.msk [vmem:[#allocation2 + $0x41] sm:$0xff] %vm1472_vm1, %v1459_v17  ;;  %v1607_v54 = vmul.f32 %v4895_v38, %v4910_v31  ;;  %v1638_v17 = vld [vmem:[#allocation2 + $0x12] sm:$0xff]  ;;  %v1764_v29 = vmul.f32 %v4927_v30, %v1585_v13 }
 0x1e0   :  { %1517 = vst.msk [vmem:[#allocation2 + $0x31] sm:$0xff] %vm1472_vm1, %v1458_v9  ;;  %v1674_v24 = vadd.f32 %v1658_v46, %v1621_v20  ;;  %v1622_v9 = vadd.f32 %v1606_v5, %v1553_v37  ;;  %v1659_v26 = vmul.f32 %v4902_v7, %v1638_v17  ;;  %v1817_v5 = vmul.f32 %v4948_v44, %v1638_v17 }
 0x1e2   :  { %v1675_v60 = vadd.f32 %v1659_v26, %v1622_v9 }
 0x1e6   :  { %v4938_v21 = vld [vmem:[#allocation2 + $0x41] sm:$0xff] }
 0x1e7   :  { %v3679_v25 = vpop.eup %3678  ;;  %v1534_v57 = vld [vmem:[#allocation2 + $0x30] sm:$0xff]  ;;  %v1609_v46 = vmul.f32 %v4895_v38, %v4938_v21 }
 0x1e8   :  { %v3681_v23 = vpop.eup %3680  ;;  %v1413_v51 = vadd.f32 1.0, %v3679_v25  ;;  %v1727_v25 = vadd.f32 %v1711_v8, %v1674_v24  ;;  %v1555_v6 = vmul.f32 %v4890_v47, %v1534_v57  ;;  %v1713_v24 = vmul.f32 %v4908_v1, %v1534_v57 }
 0x1e9   :  { %v1412_v14 = vadd.f32 1.0, %v3681_v23  ;;  %v1712_v8 = vmul.f32 %v4908_v1, %v1533_v40 }
 0x1ea   :  { %3682 = vrcp.f32 %v1413_v51  ;;  %v1780_v59 = vadd.f32 %v1764_v29, %v1727_v25 }
 0x1eb   :  { %3684 = vrcp.f32 %v1412_v14  ;;  %v4931_v14 = vld [vmem:[#allocation2 + $0x40] sm:$0xff]  ;;  %v1728_v25 = vadd.f32 %v1712_v8, %v1675_v60 }
 0x1ec   :  { %v1556_v15 = vmul.f32 %v4890_v47, %v4931_v14  ;;  %v1833_v9 = vadd.f32 %v1817_v5, %v1780_v59  ;;  %v4986_v60 = vld [vmem:[%s5694_s5 + $0x7] ss:$0 sm:$0xff]  ;;  %v4996_v5 = vld [vmem:[%s5694_s5 + $0x8] ss:$0 sm:$0xff] }
 0x1ee   :  { %v1625_v17 = vadd.f32 %v1609_v46, %v1556_v15 }
 0x1f4   :  { %v3683_v48 = vpop.eup %3682 }
 0x1f5   :  { %v3685_v35 = vpop.eup %3684  ;;  %v1461_v16 = vmul.f32 %v3683_v48, %v1307_v52  ;;  %v4940_v48 = vld [vmem:[#allocation2 + $0x31] sm:$0xff] }
 0x1f6   :  { %v1460_v49 = vmul.f32 %v3685_v35, %v1302_v28  ;;  %v1608_v13 = vmul.f32 %v4895_v38, %v4940_v48  ;;  %v1766_v15 = vmul.f32 %v4927_v30, %v4940_v48 }
 0x1f7   :  { %1520 = vst.msk [vmem:[#allocation2 + $0x61] sm:$0xff] %vm1472_vm1, %v1461_v16  ;;  %v1623_v16 = vadd.f32 %v1607_v54, %v1554_v45  ;;  %v4968_v45 = vld [vmem:[#allocation2 + $0x42] sm:$0xff]  ;;  %v4970_v54 = vld [vmem:[#allocation2 + $0x32] sm:$0xff] }
 0x1f8   :  { %1519 = vst.msk [vmem:[#allocation2 + $0x51] sm:$0xff] %vm1472_vm1, %v1460_v49  ;;  %v1639_v49 = vld [vmem:[#allocation2 + $0x22] sm:$0xff] }
 0x1f9   :  { %v1660_v37 = vmul.f32 %v4902_v7, %v1639_v49  ;;  %v1818_v63 = vmul.f32 %v4948_v44, %v1639_v49 }
 0x1ff   :  { %v4999_v41 = vld [vmem:[#allocation2 + $0x51] sm:$0xff] }
 0x212   :  { %v3415_v62 = vpop.f32.mrb[6].mxu0 }
 0x213   :  { %v4916_v52 = vadd.f32 %v3415_v62, %v4856_v18  ;;  %v1311_v43 = vpop.f32.mrb[7].mxu0  ;;  %v4966_v62 = vld [vmem:[%s5694_s5 + $0x6] ss:$0 sm:$0xff] }
 0x214   :  { %v4919_v28 = vadd.f32 %v4856_v18, %v1311_v43  ;;  %v1676_v43 = vadd.f32 %v1660_v37, %v1623_v16  ;;  %v1662_v16 = vmul.f32 %v4902_v7, %v4968_v45  ;;  %v1956_v37 = vld [vmem:[#allocation2 + $0x22] sm:$0xff]  ;;  %v1872_v49 = vmul.f32 %v4966_v62, %v1534_v57 }
 0x215   :  { %v3225_v33 = vmul.f32 -1.442695, %v4916_v52 }
 0x216   :  { %v3224_v23 = vmul.f32 -1.442695, %v4919_v28  ;;  %v3418_v51 = vpop.f32.mrb[8].mxu0  ;;  %v1729_v26 = vadd.f32 %v1713_v24, %v1676_v43  ;;  %v1678_v43 = vadd.f32 %v1662_v16, %v1625_v17 }
 0x217   :  { %3686 = vpow2.f32 %v3225_v33  ;;  %v4934_v12 = vadd.f32 %v3418_v51, %v4856_v18  ;;  %v1321_v34 = vpop.f32.mrb[9].mxu0  ;;  %v4972_v33 = vld [vmem:[#allocation2 + $0x50] sm:$0xff]  ;;  %v1539_v51 = vld [vmem:[#allocation2 + $0xa0] sm:$0xff] }
 0x218   :  { %3688 = vpow2.f32 %v3224_v23  ;;  %v4943_v35 = vadd.f32 %v4856_v18, %v1321_v34  ;;  %v1624_v23 = vadd.f32 %v1608_v13, %v1555_v6  ;;  %v1871_v34 = vmul.f32 %v4966_v62, %v1533_v40 }
 0x219   :  { %v3227_v27 = vmul.f32 -1.442695, %v4934_v12  ;;  %v1715_v59 = vmul.f32 %v4908_v1, %v4972_v33  ;;  %v4991_v6 = vmul.f32 %v4890_v47, %v1539_v51  ;;  %v1924_v51 = vmul.f32 %v4986_v60, %v4910_v31 }
 0x21a   :  { %v3226_v20 = vmul.f32 -1.442695, %v4943_v35  ;;  %v1887_v13 = vadd.f32 %v1871_v34, %v1833_v9  ;;  %v1714_v34 = vmul.f32 %v4908_v1, %v4931_v14 }
 0x21b   :  { %3690 = vpow2.f32 %v3227_v27  ;;  %v1765_v27 = vmul.f32 %v4927_v30, %v4910_v31  ;;  %v1731_v22 = vadd.f32 %v1715_v59, %v1678_v43  ;;  %v1768_v31 = vmul.f32 %v4927_v30, %v4999_v41 }
 0x21c   :  { %3692 = vpow2.f32 %v3226_v20  ;;  %v1661_v20 = vmul.f32 %v4902_v7, %v4970_v54  ;;  %v1557_v59 = vmul.f32 %v4890_v47, %v4972_v33 }
 0x21d   :  { %v1781_v32 = vadd.f32 %v1765_v27, %v1728_v25  ;;  %v1819_v25 = vmul.f32 %v4948_v44, %v4970_v54  ;;  %v1940_v27 = vadd.f32 %v1924_v51, %v1887_v13  ;;  %v1610_v13 = vmul.f32 %v4895_v38, %v4999_v41 }
 0x21e   :  { %v1677_v24 = vadd.f32 %v1661_v20, %v1624_v23  ;;  %v1977_v23 = vmul.f32 %v4996_v5, %v1956_v37  ;;  %v1592_v37 = vld [vmem:[#allocation2 + $0xa1] sm:$0xff]  ;;  %v1873_v51 = vmul.f32 %v4966_v62, %v4931_v14  ;;  %v1820_v14 = vmul.f32 %v4948_v44, %v4968_v45 }
 0x220   :  { %v1730_v16 = vadd.f32 %v1714_v34, %v1677_v24  ;;  %v1993_v34 = vadd.f32 %v1977_v23, %v1940_v27  ;;  %v1626_v27 = vadd.f32 %v1610_v13, %v1557_v59  ;;  %v1645_v59 = vld [vmem:[#allocation2 + $0xa2] sm:$0xff] }
 0x221   :  { %v3687_v29 = vpop.eup %3686 }
 0x222   :  { %v3689_v40 = vpop.eup %3688  ;;  %v1415_v46 = vadd.f32 1.0, %v3687_v29  ;;  %v1782_v29 = vadd.f32 %v1766_v15, %v1729_v26  ;;  %v1767_v15 = vmul.f32 %v4927_v30, %v4938_v21 }
 0x223   :  { %v1414_v8 = vadd.f32 1.0, %v3689_v40  ;;  %v1834_v40 = vadd.f32 %v1818_v63, %v1781_v32  ;;  %v1784_v32 = vadd.f32 %v1768_v31, %v1731_v22  ;;  %v5034_v22 = vld [vmem:[%s5695_s6] ss:$0 sm:$0xff] }
 0x224   :  { %3694 = vrcp.f32 %v1415_v46  ;;  %v5015_v46 = vld [vmem:[#allocation2 + $0x52] sm:$0xff]  ;;  %v1835_v57 = vadd.f32 %v1819_v25, %v1782_v29  ;;  %v1783_v25 = vadd.f32 %v1767_v15, %v1730_v16 }
 0x225   :  { %v3691_v9 = vpop.eup %3690  ;;  %3696 = vrcp.f32 %v1414_v8 }
 0x226   :  { %v3693_v20 = vpop.eup %3692  ;;  %v1417_v17 = vadd.f32 1.0, %v3691_v9  ;;  %v1888_v9 = vadd.f32 %v1872_v49, %v1834_v40  ;;  %v1889_v23 = vadd.f32 %v1873_v51, %v1835_v57  ;;  %v1925_v49 = vmul.f32 %v4986_v60, %v4940_v48 }
 0x227   :  { %v1416_v26 = vadd.f32 1.0, %v3693_v20  ;;  %v1613_v20 = vmul.f32 %v4895_v38, %v1592_v37  ;;  %v1874_v40 = vmul.f32 %v4966_v62, %v4972_v33  ;;  %v1926_v37 = vmul.f32 %v4986_v60, %v4938_v21  ;;  %v1590_v33 = vld [vmem:[#allocation2 + $0x61] sm:$0xff] }
 0x228   :  { %3698 = vrcp.f32 %v1417_v17  ;;  %v3421_v8 = vpop.f32.mrb[10].mxu0  ;;  %v1821_v17 = vmul.f32 %v4948_v44, %v5015_v46  ;;  %v1663_v57 = vmul.f32 %v4902_v7, %v5015_v46  ;;  %v1836_v13 = vadd.f32 %v1820_v14, %v1783_v25 }
 0x229   :  { %3700 = vrcp.f32 %v1416_v26  ;;  %v5020_v24 = vadd.f32 %v3421_v8, %v4856_v18  ;;  %v1331_v63 = vpop.f32.mrb[11].mxu0  ;;  %v1537_v26 = vld [vmem:[#allocation2 + $0x60] sm:$0xff]  ;;  %v1941_v8 = vadd.f32 %v1925_v49, %v1888_v9  ;;  %v1978_v21 = vmul.f32 %v4996_v5, %v4970_v54 }
 0x22a   :  { %v5023_v43 = vadd.f32 %v4856_v18, %v1331_v63  ;;  %v1837_v16 = vadd.f32 %v1821_v17, %v1784_v32  ;;  %v5046_v63 = vadd.f32 %v5034_v22, %v1993_v34  ;;  %v1875_v32 = vmul.f32 %v4966_v62, %v1537_v26 }
 0x22b   :  { %v3229_v29 = vmul.f32 -1.442695, %v5020_v24  ;;  %v1629_v9 = vadd.f32 %v1613_v20, %v4991_v6  ;;  %v1679_v34 = vadd.f32 %v1663_v57, %v1626_v27  ;;  %v1890_v17 = vadd.f32 %v1874_v40, %v1836_v13  ;;  %v1857_v6 = vld [vmem:[#allocation2 + $0x90] sm:$0xff] }
 0x22c   :  { %v3228_v31 = vmul.f32 -1.442695, %v5023_v43  ;;  %v1979_v25 = vmul.f32 %v4996_v5, %v4968_v45  ;;  %v1910_v20 = vld [vmem:[#allocation2 + $0x91] sm:$0xff]  ;;  %v1927_v27 = vmul.f32 %v4986_v60, %v4999_v41  ;;  %v1558_v40 = vmul.f32 %v4890_v47, %v1537_v26  ;;  %v1643_v45 = vld [vmem:[#allocation2 + $0x62] sm:$0xff] }
 0x22d   :  { %3702 = vpow2.f32 %v3229_v29  ;;  %v1942_v29 = vadd.f32 %v1926_v37, %v1889_v23  ;;  %v1716_v23 = vmul.f32 %v4908_v1, %v1537_v26  ;;  %v5075_v41 = vmul.f32 %v4966_v62, %v1857_v6 }
 0x22e   :  { %v3695_v15 = vpop.eup %3694  ;;  %3704 = vpow2.f32 %v3228_v31  ;;  %v1891_v31 = vadd.f32 %v1875_v32, %v1837_v16  ;;  %v1928_v16 = vmul.f32 %v4986_v60, %v1590_v33  ;;  %v1943_v57 = vadd.f32 %v1927_v27, %v1890_v17 }
 0x22f   :  { %v3697_v11 = vpop.eup %3696  ;;  %v1463_v48 = vmul.f32 %v3695_v15, %v4916_v52  ;;  %v1666_v52 = vmul.f32 %v4902_v7, %v1645_v59  ;;  %v1611_v15 = vmul.f32 %v4895_v38, %v1590_v33  ;;  %v5078_v26 = vmul.f32 %v4986_v60, %v1910_v20 }
 0x230   :  { %v1462_v51 = vmul.f32 %v3697_v11, %v4919_v28  ;;  %v1994_v11 = vadd.f32 %v1978_v21, %v1941_v8  ;;  %v3244_v28 = vmul.f32 -1.442695, %v5046_v63  ;;  %v1995_v8 = vadd.f32 %v1979_v25, %v1942_v29 }
 0x231   :  { %1522 = vst.msk [vmem:[#allocation2 + $0x81] sm:$0xff] %vm1472_vm1, %v1463_v48  ;;  %v1944_v48 = vadd.f32 %v1928_v16, %v1891_v31  ;;  %v5072_v59 = vadd.f32 %v1666_v52, %v1629_v9  ;;  %v1980_v32 = vmul.f32 %v4996_v5, %v5015_v46  ;;  %v1664_v17 = vmul.f32 %v4902_v7, %v1643_v45  ;;  %v1963_v31 = vld [vmem:[#allocation2 + $0x92] sm:$0xff] }
 0x232   :  { %v3699_v49 = vpop.eup %3698  ;;  %1521 = vst.msk [vmem:[#allocation2 + $0x71] sm:$0xff] %vm1472_vm1, %v1462_v51  ;;  %3706 = vpow2.f32 %v3244_v28  ;;  %v1981_v51 = vmul.f32 %v4996_v5, %v1643_v45  ;;  %v5085_v29 = vadd.f32 %v5034_v22, %v1994_v11 }
 0x233   :  { %v3701_v14 = vpop.eup %3700  ;;  %v1465_v54 = vmul.f32 %v3699_v49, %v4934_v12  ;;  %v1732_v12 = vadd.f32 %v1716_v23, %v1679_v34  ;;  %v1627_v34 = vadd.f32 %v1611_v15, %v1558_v40  ;;  %v5089_v49 = vadd.f32 %v5034_v22, %v1995_v8 }
 0x234   :  { %v1464_v37 = vmul.f32 %v3701_v14, %v4943_v35  ;;  %v1769_v35 = vmul.f32 %v4927_v30, %v1590_v33  ;;  %v1996_v14 = vadd.f32 %v1980_v32, %v1943_v57  ;;  %v1822_v40 = vmul.f32 %v4948_v44, %v1643_v45 }
 0x235   :  { %1524 = vst.msk [vmem:[#allocation2 + $0xc1] sm:$0xff] %vm1472_vm1, %v1465_v54  ;;  %v1997_v54 = vadd.f32 %v1981_v51, %v1944_v48  ;;  %v5103_v15 = vmul.f32 %v4996_v5, %v1963_v31  ;;  %v1680_v48 = vadd.f32 %v1664_v17, %v1627_v34 }
 0x236   :  { %1523 = vst.msk [vmem:[#allocation2 + $0xb1] sm:$0xff] %vm1472_vm1, %v1464_v37  ;;  %v1785_v46 = vadd.f32 %v1769_v35, %v1732_v12  ;;  %v5106_v37 = vmul.f32 -1.442695, %v5085_v29  ;;  %v5117_v35 = vmul.f32 -1.442695, %v5089_v49 }
 0x237   :  { %v3703_v13 = vpop.eup %3702  ;;  %v5124_v31 = vadd.f32 %v5034_v22, %v1997_v54 }
 0x238   :  { %v3705_v21 = vpop.eup %3704  ;;  %v1419_v9 = vadd.f32 1.0, %v3703_v13  ;;  %v1697_v27 = vld [vmem:[#allocation2 + $0x80] sm:$0xff] }
 0x239   :  { %v1538_v52 = vld [vmem:[#allocation2 + $0x70] sm:$0xff]  ;;  %v1418_v33 = vadd.f32 1.0, %v3705_v21  ;;  %v3424_v28 = vpop.f32.mrb[0].mxu1  ;;  %v5099_v16 = vld [vmem:[#allocation2 + $0x81] sm:$0xff]  ;;  %v1718_v51 = vmul.f32 %v4908_v1, %v1697_v27  ;;  %v1838_v21 = vadd.f32 %v1822_v40, %v1785_v46 }
 0x23a   :  { %v5091_v25 = vld [vmem:[#allocation2 + $0x71] sm:$0xff]  ;;  %3708 = vrcp.f32 %v1419_v9  ;;  %v5094_v11 = vadd.f32 %v3424_v28, %v4856_v18  ;;  %v1341_v23 = vpop.f32.mrb[1].mxu1  ;;  %v1559_v6 = vmul.f32 %v4890_v47, %v1538_v52  ;;  %v5114_v13 = vld [vmem:[#allocation2 + $0x82] sm:$0xff]  ;;  %v5121_v9 = vadd.f32 %v5034_v22, %v1996_v14 }
 0x23b   :  { %v1612_v20 = vmul.f32 %v4895_v38, %v5091_v25  ;;  %3710 = vrcp.f32 %v1418_v33  ;;  %v5110_v12 = vadd.f32 %v4856_v18, %v1341_v23  ;;  %v5112_v57 = vld [vmem:[#allocation2 + $0x72] sm:$0xff]  ;;  %v1717_v17 = vmul.f32 %v4908_v1, %v1538_v52 }
 0x23c   :  { %v3231_v8 = vmul.f32 -1.442695, %v5094_v11  ;;  %v1771_v23 = vmul.f32 %v4927_v30, %v5099_v16  ;;  %v1665_v46 = vmul.f32 %v4902_v7, %v5112_v57  ;;  %v1824_v14 = vmul.f32 %v4948_v44, %v5114_v13  ;;  %v3707_v54 = vpop.eup %3706  ;;  %v1541_v40 = vld [vmem:[#allocation2 + $0xc0] sm:$0xff] }
 0x23d   :  { %v1540_v45 = vld [vmem:[#allocation2 + $0xb0] sm:$0xff]  ;;  %v1628_v34 = vadd.f32 %v1612_v20, %v1559_v6  ;;  %v3230_v6 = vmul.f32 -1.442695, %v5110_v12  ;;  %v1770_v19 = vmul.f32 %v4927_v30, %v5091_v25  ;;  %v1823_v36 = vmul.f32 %v4948_v44, %v5112_v57  ;;  %v1594_v4 = vld [vmem:[#allocation2 + $0xc1] sm:$0xff] }
 0x23e   :  { %v1593_v32 = vld [vmem:[#allocation2 + $0xb1] sm:$0xff]  ;;  %v1561_v33 = vmul.f32 %v4890_v47, %v1540_v45  ;;  %v1719_v53 = vmul.f32 %v4908_v1, %v1540_v45  ;;  %3712 = vpow2.f32 %v3231_v8  ;;  %v1733_v2 = vadd.f32 %v1717_v17, %v1680_v48 }
 0x23f   :  { %v1646_v28 = vld [vmem:[#allocation2 + $0xb2] sm:$0xff]  ;;  %v1614_v55 = vmul.f32 %v4895_v38, %v1593_v32  ;;  %3714 = vpow2.f32 %v3230_v6  ;;  %v1681_v56 = vadd.f32 %v1665_v46, %v1628_v34  ;;  %v1720_v39 = vmul.f32 %v4908_v1, %v1541_v40 }
 0x240   :  { %v1667_v45 = vmul.f32 %v4902_v7, %v1646_v28  ;;  %v1735_v58 = vadd.f32 %v1719_v53, %v5072_v59  ;;  %v1772_v0 = vmul.f32 %v4927_v30, %v1593_v32  ;;  %v1786_v3 = vadd.f32 %v1770_v19, %v1733_v2 }
 0x241   :  { %v3427_v20 = vpop.f32.mrb[2].mxu1  ;;  %v1630_v10 = vadd.f32 %v1614_v55, %v1561_v33  ;;  %v1876_v33 = vmul.f32 %v4966_v62, %v1538_v52  ;;  %v1877_v48 = vmul.f32 %v4966_v62, %v1697_v27  ;;  %v1562_v52 = vmul.f32 %v4890_v47, %v1541_v40 }
 0x242   :  { %v5144_v50 = vadd.f32 %v3427_v20, %v4856_v18  ;;  %v1351_v42 = vpop.f32.mrb[3].mxu1  ;;  %v1734_v20 = vadd.f32 %v1718_v51, %v1681_v56  ;;  %v1839_v17 = vadd.f32 %v1823_v36, %v1786_v3  ;;  %v1930_v3 = vmul.f32 %v4986_v60, %v5099_v16 }
 0x243   :  { %v5147_v8 = vadd.f32 %v4856_v18, %v1351_v42  ;;  %v1683_v53 = vadd.f32 %v1667_v45, %v1630_v10  ;;  %v1788_v42 = vadd.f32 %v1772_v0, %v1735_v58  ;;  %v1825_v10 = vmul.f32 %v4948_v44, %v1646_v28 }
 0x244   :  { %v3233_v55 = vmul.f32 -1.442695, %v5144_v50  ;;  %v3709_v61 = vpop.eup %3708  ;;  %v1787_v34 = vadd.f32 %v1771_v23, %v1734_v20  ;;  %v1892_v2 = vadd.f32 %v1876_v33, %v1838_v21  ;;  %v1929_v0 = vmul.f32 %v4986_v60, %v5091_v25 }
 0x245   :  { %v3232_v59 = vmul.f32 -1.442695, %v5147_v8  ;;  %v3711_v6 = vpop.eup %3710  ;;  %v1467_v18 = vmul.f32 %v3709_v61, %v5020_v24  ;;  %v1615_v61 = vmul.f32 %v4895_v38, %v1594_v4  ;;  %v1736_v56 = vadd.f32 %v1720_v39, %v1683_v53  ;;  %v1647_v39 = vld [vmem:[#allocation2 + $0xc2] sm:$0xff] }
 0x246   :  { %3716 = vpow2.f32 %v3233_v55  ;;  %v1466_v32 = vmul.f32 %v3711_v6, %v5023_v43  ;;  %v1840_v58 = vadd.f32 %v1824_v14, %v1787_v34  ;;  %v1893_v19 = vadd.f32 %v1877_v48, %v1839_v17 }
 0x247   :  { %3718 = vpow2.f32 %v3232_v59  ;;  %1526 = vst.msk [vmem:[#allocation2 + $0xe1] sm:$0xff] %vm1472_vm1, %v1467_v18  ;;  %v1841_v24 = vadd.f32 %v1825_v10, %v1788_v42  ;;  %v1945_v36 = vadd.f32 %v1929_v0, %v1892_v2  ;;  %v2080_v43 = vadd.f32 1.0, %v3707_v54 }
 0x248   :  { %1525 = vst.msk [vmem:[#allocation2 + $0xd1] sm:$0xff] %vm1472_vm1, %v1466_v32  ;;  %v3713_v27 = vpop.eup %3712  ;;  %v1773_v51 = vmul.f32 %v4927_v30, %v1594_v4  ;;  %v1894_v21 = vadd.f32 %v5075_v41, %v1840_v58  ;;  %3720 = vpow2.f32 %v5106_v37  ;;  %v3247_v25 = vmul.f32 -1.442695, %v5121_v9 }
 0x249   :  { %v1879_v28 = vmul.f32 %v4966_v62, %v1541_v40  ;;  %v1421_v23 = vadd.f32 1.0, %v3713_v27  ;;  %v1946_v46 = vadd.f32 %v1930_v3, %v1893_v19  ;;  %v1982_v14 = vmul.f32 %v4996_v5, %v5112_v57  ;;  %v3715_v16 = vpop.eup %3714 }
 0x24a   :  { %v1631_v45 = vadd.f32 %v1615_v61, %v1562_v52  ;;  %v1789_v54 = vadd.f32 %v1773_v51, %v1736_v56  ;;  %3722 = vpow2.f32 %v5117_v35  ;;  %v3248_v55 = vmul.f32 -1.442695, %v5124_v31 }
 0x24b   :  { %3724 = vrcp.f32 %v1421_v23  ;;  %v1895_v41 = vadd.f32 %v1879_v28, %v1841_v24  ;;  %v1983_v37 = vmul.f32 %v4996_v5, %v5114_v13  ;;  %v1998_v33 = vadd.f32 %v1982_v14, %v1945_v36 }
 0x24c   :  { %v1668_v40 = vmul.f32 %v4902_v7, %v1647_v39  ;;  %v1420_v53 = vadd.f32 1.0, %v3715_v16  ;;  %v1947_v59 = vadd.f32 %v5078_v26, %v1894_v21  ;;  %3726 = vrcp.f32 %v2080_v43 }
 0x24d   :  { %v1826_v20 = vmul.f32 %v4948_v44, %v1647_v39  ;;  %v1932_v35 = vmul.f32 %v4986_v60, %v1594_v4  ;;  %v1999_v18 = vadd.f32 %v1983_v37, %v1946_v46  ;;  %3728 = vpow2.f32 %v3247_v25 }
 0x24e   :  { %v1684_v32 = vadd.f32 %v1668_v40, %v1631_v45  ;;  %3730 = vpow2.f32 %v3248_v55  ;;  %v5185_v10 = vadd.f32 %v5034_v22, %v1998_v33  ;;  %v2000_v61 = vadd.f32 %v5103_v15, %v1947_v59  ;;  %v1543_v56 = vld [vmem:[#allocation2 + $0xe0] sm:$0xff] }
 0x24f   :  { %v1542_v6 = vld [vmem:[#allocation2 + $0xd0] sm:$0xff]  ;;  %v1842_v26 = vadd.f32 %v1826_v20, %v1789_v54  ;;  %v1948_v52 = vadd.f32 %v1932_v35, %v1895_v41  ;;  %3732 = vrcp.f32 %v1420_v53  ;;  %v5191_v3 = vadd.f32 %v5034_v22, %v1999_v18  ;;  %v1596_v23 = vld [vmem:[#allocation2 + $0xe1] sm:$0xff] }
 0x250   :  { %v3717_v57 = vpop.eup %3716  ;;  %v1595_v42 = vld [vmem:[#allocation2 + $0xd1] sm:$0xff]  ;;  %v1563_v13 = vmul.f32 %v4890_v47, %v1542_v6  ;;  %v1721_v17 = vmul.f32 %v4908_v1, %v1542_v6  ;;  %v1880_v0 = vmul.f32 %v4966_v62, %v1542_v6  ;;  %v1985_v51 = vmul.f32 %v4996_v5, %v1647_v39  ;;  %v1649_v40 = vld [vmem:[#allocation2 + $0xe2] sm:$0xff] }
 0x251   :  { %v3719_v48 = vpop.eup %3718  ;;  %v1616_v34 = vmul.f32 %v4895_v38, %v1595_v42  ;;  %v1648_v2 = vld [vmem:[#allocation2 + $0xd2] sm:$0xff]  ;;  %v1423_v4 = vadd.f32 1.0, %v3717_v57  ;;  %v1774_v19 = vmul.f32 %v4927_v30, %v1595_v42  ;;  %v1933_v15 = vmul.f32 %v4986_v60, %v1595_v42 }
 0x252   :  { %v1737_v58 = vadd.f32 %v1721_v17, %v1684_v32  ;;  %v1422_v24 = vadd.f32 1.0, %v3719_v48  ;;  %v3721_v36 = vpop.eup %3720  ;;  %v1896_v27 = vadd.f32 %v1880_v0, %v1842_v26  ;;  %v1827_v21 = vmul.f32 %v4948_v44, %v1648_v2 }
 0x253   :  { %v1632_v43 = vadd.f32 %v1616_v34, %v1563_v13  ;;  %3734 = vrcp.f32 %v1423_v4  ;;  %v1669_v46 = vmul.f32 %v4902_v7, %v1648_v2  ;;  %v1881_v14 = vmul.f32 %v4966_v62, %v1543_v56 }
 0x254   :  { %3736 = vrcp.f32 %v1422_v24  ;;  %v1790_v25 = vadd.f32 %v1774_v19, %v1737_v58  ;;  %v3723_v28 = vpop.eup %3722  ;;  %v1986_v16 = vmul.f32 %v4996_v5, %v1648_v2  ;;  %v5200_v45 = vadd.f32 %v5034_v22, %v2000_v61 }
 0x255   :  { %v3725_v54 = vpop.eup %3724  ;;  %v1949_v39 = vadd.f32 %v1933_v15, %v1896_v27  ;;  %v3249_v41 = vmul.f32 -1.442695, %v5185_v10  ;;  %v3250_v37 = vmul.f32 -1.442695, %v5191_v3  ;;  %v1685_v53 = vadd.f32 %v1669_v46, %v1632_v43  ;;  %v1865_v15 = vld [vmem:[#allocation2 + $0x130] sm:$0xff] }
 0x256   :  { %v1843_v55 = vadd.f32 %v1827_v21, %v1790_v25  ;;  %v5204_v33 = vpop.eup %3726  ;;  %v1469_v59 = vmul.f32 %v3725_v54, %v5094_v11  ;;  %v2001_v57 = vadd.f32 %v1985_v51, %v1948_v52  ;;  %v2081_v20 = vadd.f32 1.0, %v3721_v36  ;;  %v1971_v46 = vld [vmem:[#allocation2 + $0x132] sm:$0xff] }
 0x257   :  { %v3729_v6 = vpop.eup %3728  ;;  %v1934_v35 = vmul.f32 %v4986_v60, %v1596_v23  ;;  %v2002_v18 = vadd.f32 %v1986_v16, %v1949_v39  ;;  %v2082_v48 = vadd.f32 1.0, %v3723_v28  ;;  %v1564_v13 = vmul.f32 %v4890_v47, %v1543_v56  ;;  %v1918_v28 = vld [vmem:[#allocation2 + $0x131] sm:$0xff] }
 0x258   :  { %v1897_v42 = vadd.f32 %v1881_v14, %v1843_v55  ;;  %v3731_v32 = vpop.eup %3730  ;;  %v1722_v34 = vmul.f32 %v4908_v1, %v1543_v56  ;;  %1528 = vst.msk [vmem:[#allocation2 + $0x101] sm:$0xff] %vm1472_vm1, %v1469_v59  ;;  %3738 = vpow2.f32 %v3249_v41  ;;  %v3251_v17 = vmul.f32 -1.442695, %v5200_v45 }
 0x259   :  { %v1617_v11 = vmul.f32 %v4895_v38, %v1596_v23  ;;  %v1987_v52 = vmul.f32 %v4996_v5, %v1649_v40  ;;  %3740 = vpow2.f32 %v3250_v37  ;;  %v3733_v2 = vpop.eup %3732  ;;  %v5215_v4 = vadd.f32 %v5034_v22, %v2001_v57 }
 0x25a   :  { %v1950_v26 = vadd.f32 %v1934_v35, %v1897_v42  ;;  %v1738_v0 = vadd.f32 %v1722_v34, %v1685_v53  ;;  %3742 = vrcp.f32 %v2081_v20  ;;  %v1468_v61 = vmul.f32 %v3733_v2, %v5110_v12 }
 0x25b   :  { %5761 = vst [vmem:[#allocation24_spill] sm:$0xff] %v5215_v4  ;;  %v5219_v58 = vadd.f32 %v5034_v22, %v2002_v18  ;;  %v2083_v19 = vadd.f32 1.0, %v3729_v6  ;;  %v1775_v36 = vmul.f32 %v4927_v30, %v1596_v23  ;;  %3744 = vpow2.f32 %v3251_v17 }
 0x25c   :  { %v2003_v56 = vadd.f32 %v1987_v52, %v1950_v26  ;;  %v1633_v27 = vadd.f32 %v1617_v11, %v1564_v13  ;;  %1527 = vst.msk [vmem:[#allocation2 + $0xf1] sm:$0xff] %vm1472_vm1, %v1468_v61  ;;  %v2084_v21 = vadd.f32 1.0, %v3731_v32  ;;  %3746 = vrcp.f32 %v2082_v48 }
 0x25d   :  { %v3735_v24 = vpop.eup %3734  ;;  %v1791_v12 = vadd.f32 %v1775_v36, %v1738_v0  ;;  %v3252_v23 = vmul.f32 -1.442695, %v5215_v4  ;;  %v3253_v55 = vmul.f32 -1.442695, %v5219_v58  ;;  %3748 = vrcp.f32 %v2083_v19 }
 0x25e   :  { %v3737_v43 = vpop.eup %3736  ;;  %v1471_v51 = vmul.f32 %v3735_v24, %v5144_v50  ;;  %v5226_v14 = vadd.f32 %v5034_v22, %v2003_v56  ;;  %v1670_v50 = vmul.f32 %v4902_v7, %v1649_v40  ;;  %v1828_v37 = vmul.f32 %v4948_v44, %v1649_v40 }
 0x25f   :  { %v1470_v25 = vmul.f32 %v3737_v43, %v5147_v8  ;;  %v1545_v16 = vld [vmem:[#allocation2 + $0x100] sm:$0xff]  ;;  %v5237_v53 = vmul.f32 %v4966_v62, %v1865_v15  ;;  %v5240_v59 = vmul.f32 %v4986_v60, %v1918_v28  ;;  %v5243_v57 = vmul.f32 %v4996_v5, %v1971_v46 }
 0x260   :  { %5762 = vst [vmem:[#allocation25_spill] sm:$0xff] %v5226_v14  ;;  %v1598_v54 = vld [vmem:[#allocation2 + $0x101] sm:$0xff]  ;;  %1530 = vst.msk [vmem:[#allocation2 + $0x121] sm:$0xff] %vm1472_vm1, %v1471_v51  ;;  %v1566_v8 = vmul.f32 %v4890_v47, %v1545_v16  ;;  %3750 = vrcp.f32 %v2084_v21  ;;  %v1686_v6 = vadd.f32 %v1670_v50, %v1633_v27  ;;  %v1844_v42 = vadd.f32 %v1828_v37, %v1791_v12 }
 0x261   :  { %v1619_v39 = vmul.f32 %v4895_v38, %v1598_v54  ;;  %v1651_v41 = vld [vmem:[#allocation2 + $0x102] sm:$0xff]  ;;  %1529 = vst.msk [vmem:[#allocation2 + $0x111] sm:$0xff] %vm1472_vm1, %v1470_v25  ;;  %3752 = vpow2.f32 %v3252_v23  ;;  %v3254_v35 = vmul.f32 -1.442695, %v5226_v14  ;;  %v1724_v40 = vmul.f32 %v4908_v1, %v1545_v16 }
 0x262   :  { %v3739_v20 = vpop.eup %3738  ;;  %v1672_v48 = vmul.f32 %v4902_v7, %v1651_v41  ;;  %v1777_v32 = vmul.f32 %v4927_v30, %v1598_v54  ;;  %3754 = vpow2.f32 %v3253_v55  ;;  %v1830_v52 = vmul.f32 %v4948_v44, %v1651_v41 }
 0x263   :  { %v3741_v18 = vpop.eup %3740  ;;  %v1544_v34 = vld [vmem:[#allocation2 + $0xf0] sm:$0xff]  ;;  %v1635_v26 = vadd.f32 %v1619_v39, %v1566_v8  ;;  %v1883_v2 = vmul.f32 %v4966_v62, %v1545_v16  ;;  %v1936_v0 = vmul.f32 %v4986_v60, %v1598_v54  ;;  %v1989_v24 = vmul.f32 %v4996_v5, %v1651_v41 }
 0x264   :  { %v5249_v13 = vpop.eup %3742  ;;  %v1597_v17 = vld [vmem:[#allocation2 + $0xf1] sm:$0xff]  ;;  %v1565_v61 = vmul.f32 %v4890_v47, %v1544_v34  ;;  %v1723_v19 = vmul.f32 %v4908_v1, %v1544_v34  ;;  %3756 = vpow2.f32 %v3254_v35  ;;  %v2085_v27 = vadd.f32 1.0, %v3739_v20 }
 0x265   :  { %v1650_v11 = vld [vmem:[#allocation2 + $0xf2] sm:$0xff]  ;;  %v1618_v56 = vmul.f32 %v4895_v38, %v1597_v17  ;;  %v3745_v36 = vpop.eup %3744  ;;  %v5259_v51 = vadd.f32 1.0, %v3741_v18  ;;  %v1776_v23 = vmul.f32 %v4927_v30, %v1597_v17  ;;  %v1882_v16 = vmul.f32 %v4966_v62, %v1544_v34 }
 0x266   :  { %v1671_v43 = vmul.f32 %v4902_v7, %v1650_v11  ;;  %v5261_v21 = vpop.eup %3746  ;;  %v1739_v46 = vadd.f32 %v1723_v19, %v1686_v6  ;;  %v1688_v50 = vadd.f32 %v1672_v48, %v1635_v26  ;;  %v1829_v35 = vmul.f32 %v4948_v44, %v1650_v11 }
 0x267   :  { %v1634_v15 = vadd.f32 %v1618_v56, %v1565_v61  ;;  %v5268_v39 = vpop.eup %3748  ;;  %v1705_v37 = vld [vmem:[#allocation2 + $0x120] sm:$0xff]  ;;  %v2087_v18 = vadd.f32 1.0, %v3745_v36  ;;  %v1898_v19 = vadd.f32 %v1882_v16, %v1844_v42  ;;  %v1935_v14 = vmul.f32 %v4986_v60, %v1597_v17 }
 0x268   :  { %v1546_v25 = vld [vmem:[#allocation2 + $0x110] sm:$0xff]  ;;  %v1792_v20 = vadd.f32 %v1776_v23, %v1739_v46  ;;  %v1758_v48 = vld [vmem:[#allocation2 + $0x121] sm:$0xff]  ;;  %v1726_v46 = vmul.f32 %v4908_v1, %v1705_v37  ;;  %v1988_v4 = vmul.f32 %v4996_v5, %v1650_v11  ;;  %v1885_v17 = vmul.f32 %v4966_v62, %v1705_v37 }
 0x269   :  { %v1599_v12 = vld [vmem:[#allocation2 + $0x111] sm:$0xff]  ;;  %v1567_v54 = vmul.f32 %v4890_v47, %v1546_v25  ;;  %v1725_v8 = vmul.f32 %v4908_v1, %v1546_v25  ;;  %v1687_v41 = vadd.f32 %v1671_v43, %v1634_v15  ;;  %3758 = vrcp.f32 %v2085_v27 }
 0x26a   :  { %v1652_v28 = vld [vmem:[#allocation2 + $0x112] sm:$0xff]  ;;  %v1620_v55 = vmul.f32 %v4895_v38, %v1599_v12  ;;  %v1778_v34 = vmul.f32 %v4927_v30, %v1599_v12  ;;  %v5273_v47 = vpop.eup %3750  ;;  %v1845_v26 = vadd.f32 %v1829_v35, %v1792_v20  ;;  %v1884_v20 = vmul.f32 %v4966_v62, %v1546_v25 }
 0x26b   :  { %v1673_v61 = vmul.f32 %v4902_v7, %v1652_v28  ;;  %v1741_v56 = vadd.f32 %v1725_v8, %v1688_v50  ;;  %v1740_v38 = vadd.f32 %v1724_v40, %v1687_v41  ;;  %v3753_v43 = vpop.eup %3752  ;;  %v1831_v36 = vmul.f32 %v4948_v44, %v1652_v28 }
 0x26c   :  { %v1636_v6 = vadd.f32 %v1620_v55, %v1567_v54  ;;  %v3755_v54 = vpop.eup %3754  ;;  %v1811_v55 = vld [vmem:[#allocation2 + $0x122] sm:$0xff]  ;;  %v1899_v50 = vadd.f32 %v1883_v2, %v1845_v26  ;;  %v1951_v8 = vadd.f32 %v1935_v14, %v1898_v19  ;;  %v1779_v41 = vmul.f32 %v4927_v30, %v1758_v48 }
 0x26d   :  { %v1794_v23 = vadd.f32 %v1778_v34, %v1741_v56  ;;  %v1793_v7 = vadd.f32 %v1777_v32, %v1740_v38  ;;  %v1832_v32 = vmul.f32 %v4948_v44, %v1811_v55  ;;  %v1938_v14 = vmul.f32 %v4986_v60, %v1758_v48 }
 0x26e   :  { %v1689_v15 = vadd.f32 %v1673_v61, %v1636_v6  ;;  %v1952_v1 = vadd.f32 %v1936_v0, %v1899_v50  ;;  %v2004_v35 = vadd.f32 %v1988_v4, %v1951_v8  ;;  %v3757_v6 = vpop.eup %3756  ;;  %v1937_v11 = vmul.f32 %v4986_v60, %v1599_v12 }
 0x26f   :  { %v1847_v42 = vadd.f32 %v1831_v36, %v1794_v23  ;;  %v1846_v16 = vadd.f32 %v1830_v52, %v1793_v7  ;;  %v1991_v62 = vmul.f32 %v4996_v5, %v1811_v55  ;;  %v1990_v0 = vmul.f32 %v4996_v5, %v1652_v28 }
 0x270   :  { %v1742_v40 = vadd.f32 %v1726_v46, %v1689_v15  ;;  %v2005_v34 = vadd.f32 %v1989_v24, %v1952_v1  ;;  %v5286_v30 = vadd.f32 %v5034_v22, %v2004_v35  ;;  %v2088_v24 = vadd.f32 1.0, %v3753_v43 }
 0x271   :  { %v1901_v56 = vadd.f32 %v1885_v17, %v1847_v42  ;;  %v1900_v2 = vadd.f32 %v1884_v20, %v1846_v16  ;;  %3760 = vrcp.f32 %v5259_v51  ;;  %v2089_v26 = vadd.f32 1.0, %v3755_v54 }
 0x272   :  { %v1795_v61 = vadd.f32 %v1779_v41, %v1742_v40  ;;  %v5291_v44 = vadd.f32 %v5034_v22, %v2005_v34  ;;  %v3255_v25 = vmul.f32 -1.442695, %v5286_v30  ;;  %v2090_v51 = vadd.f32 1.0, %v3757_v6  ;;  %v5764_v34 = vld [vmem:[#allocation25_spill] sm:$0xff] }
 0x273   :  { %v1954_v52 = vadd.f32 %v1938_v14, %v1901_v56  ;;  %v1953_v4 = vadd.f32 %v1937_v11, %v1900_v2  ;;  %v3759_v46 = vpop.eup %3758  ;;  %v5763_v11 = vld [vmem:[#allocation24_spill] sm:$0xff] }
 0x274   :  { %v1848_v37 = vadd.f32 %v1832_v32, %v1795_v61  ;;  %3762 = vpow2.f32 %v3255_v25  ;;  %v3256_v48 = vmul.f32 -1.442695, %v5291_v44  ;;  %v5338_v7 = vmul.f32 %v3759_v46, %v5185_v10 }
 0x275   :  { %v2007_v60 = vadd.f32 %v1991_v62, %v1954_v52  ;;  %v2006_v12 = vadd.f32 %v1990_v0, %v1953_v4  ;;  %3764 = vrcp.f32 %v2087_v18  ;;  %v5316_v18 = vmul.f32 %v5204_v33, %v5046_v63 }
 0x276   :  { %v1902_v38 = vadd.f32 %v5237_v53, %v1848_v37  ;;  %3766 = vpow2.f32 %v3256_v48  ;;  %v5331_v63 = vmul.f32 %v5273_v47, %v5124_v31  ;;  %v2153_v1 = vsel %vm1472_vm1, %v5338_v7, 0.0 }
 0x277   :  { %v5299_v5 = vadd.f32 %v5034_v22, %v2007_v60  ;;  %v5302_v28 = vadd.f32 %v5034_v22, %v2006_v12  ;;  %3768 = vrcp.f32 %v2088_v24 }
 0x278   :  { %v1955_v27 = vadd.f32 %v5240_v59, %v1902_v38  ;;  %3770 = vrcp.f32 %v2089_v26  ;;  %v5309_v59 = vmul.f32 %v5249_v13, %v5085_v29  ;;  %v5325_v29 = vmul.f32 %v5268_v39, %v5121_v9 }
 0x279   :  { %v3258_v19 = vmul.f32 -1.442695, %v5299_v5  ;;  %v3257_v43 = vmul.f32 -1.442695, %v5302_v28  ;;  %v2151_v41 = vsel %vm1472_vm1, %v5331_v63, 0.0 }
 0x27a   :  { %v2008_v53 = vadd.f32 %v5243_v57, %v1955_v27  ;;  %v5320_v57 = vmul.f32 %v5261_v21, %v5089_v49  ;;  %v2144_v49 = vsel %vm1472_vm1, %v5316_v18, 0.0  ;;  %v2149_v55 = vsel %vm1472_vm1, %v5325_v29, 0.0 }
 0x27b   :  { %3772 = vpow2.f32 %v3258_v19  ;;  %v3761_v13 = vpop.eup %3760 }
 0x27c   :  { %v5312_v15 = vadd.f32 %v5034_v22, %v2008_v53  ;;  %3774 = vpow2.f32 %v3257_v43  ;;  %v2145_v22 = vsel %vm1472_vm1, %v5309_v59, 0.0  ;;  %v2147_v33 = vsel %vm1472_vm1, %v5320_v57, 0.0 }
 0x27d   :  { %3776 = vrcp.f32 %v2090_v51  ;;  %v2146_v9 = vadd.f32 %v2145_v22, %v2144_v49  ;;  %v5343_v40 = vmul.f32 %v3761_v13, %v5191_v3 }
 0x27e   :  { %v3259_v23 = vmul.f32 -1.442695, %v5312_v15  ;;  %v3763_v36 = vpop.eup %3762 }
 0x27f   :  { %v3765_v21 = vpop.eup %3764  ;;  %v2091_v54 = vadd.f32 1.0, %v3763_v36  ;;  %v2148_v31 = vadd.f32 %v2147_v33, %v2146_v9  ;;  %v2155_v32 = vsel %vm1472_vm1, %v5343_v40, 0.0 }
 0x280   :  { %3778 = vpow2.f32 %v3259_v23  ;;  %v3767_v39 = vpop.eup %3766  ;;  %v5348_v20 = vmul.f32 %v3765_v21, %v5200_v45 }
 0x281   :  { %v3769_v50 = vpop.eup %3768  ;;  %v2092_v8 = vadd.f32 1.0, %v3767_v39  ;;  %3780 = vrcp.f32 %v2091_v54  ;;  %v2150_v17 = vadd.f32 %v2149_v55, %v2148_v31 }
 0x282   :  { %v3771_v47 = vpop.eup %3770  ;;  %v5358_v45 = vmul.f32 %v3769_v50, %v5763_v11  ;;  %v2157_v52 = vsel %vm1472_vm1, %v5348_v20, 0.0 }
 0x283   :  { %3782 = vrcp.f32 %v2092_v8  ;;  %v2152_v61 = vadd.f32 %v2151_v41, %v2150_v17  ;;  %v5353_v3 = vmul.f32 %v3771_v47, %v5219_v58 }
 0x284   :  { %v2166_v38 = vsel %vm1472_vm1, %v5358_v45, 0.0 }
 0x285   :  { %v3773_v42 = vpop.eup %3772  ;;  %v2154_v14 = vadd.f32 %v2153_v1, %v2152_v61  ;;  %v2167_v58 = vsel %vm1472_vm1, %v5353_v3, 0.0  ;;  %v5765_v1 = vmov 0.0  }
 0x286   :  { %v3775_v16 = vpop.eup %3774  ;;  %v2094_v10 = vadd.f32 1.0, %v3773_v42  ;;  %v2168_v12 = vadd.f32 %v2167_v58, %v2166_v38  ;;  %v2393_v58 = vld [vmem:[%s5700_s11 + $0x8] sm:$0xff]  ;;  %v2395_v38 = vld [vmem:[%s5700_s11 + $0x18] sm:$0xff] }
 0x287   :  { %v3777_v35 = vpop.eup %3776  ;;  %v2093_v6 = vadd.f32 1.0, %v3775_v16  ;;  %v2156_v62 = vadd.f32 %v2155_v32, %v2154_v14 }
 0x288   :  { %3784 = vrcp.f32 %v2094_v10  ;;  %v5361_v37 = vmul.f32 %v3777_v35, %v5764_v34  ;;  %v2281_v35 = vld [vmem:[%s5698_s9] sm:$0xff] }
 0x289   :  { %3786 = vrcp.f32 %v2093_v6  ;;  %v2158_v0 = vadd.f32 %v2157_v52, %v2156_v62  ;;  %v3260_v6 = vld [vmem:[%s5697_s8] ss:$0 sm:$0xff] }
 0x28a   :  { %v3779_v56 = vpop.eup %3778  ;;  %v2169_v60 = vsel %vm1472_vm1, %v5361_v37, 0.0  ;;  %v2392_v62 = vld [vmem:[%s5700_s11] sm:$0xff] }
 0x28b   :  { %v2095_v2 = vadd.f32 1.0, %v3779_v56  ;;  %v3781_v4 = vpop.eup %3780  ;;  %v2159_v27 = vrot.slane %v2158_v0, 4  ;;  %v2170_v53 = vadd.f32 %v2169_v60, %v2168_v12  ;;  %v2612_v12 = vld [vmem:[%s5702_s13] sm:$0xff] }
 0x28c   :  { %v5368_v25 = vmul.f32 %v3781_v4, %v5286_v30  ;;  %v2394_v4 = vld [vmem:[%s5700_s11 + $0x10] sm:$0xff]  ;;  %3476 = vmatprep.subr.mxu0 %v2612_v12 }
 0x28d   :  { %3788 = vrcp.f32 %v2095_v2  ;;  %v3783_v24 = vpop.eup %3782  ;;  %v2160_v22 = vadd.f32 %v2159_v27, %v2158_v0  ;;  %v3554_v0 = vpack.c.bf16 %v2393_v58, %v2392_v62  ;;  %v3558_v60 = vpack.c.bf16 %v2395_v38, %v2394_v4  ;;  %3477 = vmatpush3.msra.mxu0 %v2612_v12  ;;  %v5775_v4 = vld [vmem:[#allocation14_spill] sm:$0xff] }
 0x28e   :  { %v5375_v48 = vmul.f32 %v3783_v24, %v5291_v44  ;;  %v2171_v26 = vsel %vm1472_vm1, %v5368_v25, 0.0  ;;  %v5766_v24 = vmov 0.0|0.0  }
 0x28f   :  { %v2172_v46 = vadd.f32 %v2171_v26, %v2170_v53  ;;  %v2161_v54 = vrot.slane %v2160_v22, 2  ;;  %3568 = vmatprep.subr.bf16.mxu0 %v5766_v24  ;;  %v3263_v26 = vld [vmem:[%s5699_s10] ss:$0 sm:$0xff] }
 0x290   :  { %v2173_v30 = vsel %vm1472_vm1, %v5375_v48, 0.0 }
 0x291   :  { %v2174_v44 = vadd.f32 %v2173_v30, %v2172_v46  ;;  %v2162_v39 = vadd.f32 %v2161_v54, %v2160_v22 }
 0x292   :  { %v3785_v19 = vpop.eup %3784 }
 0x293   :  { %v3787_v51 = vpop.eup %3786  ;;  %v5382_v43 = vmul.f32 %v3785_v19, %v5299_v5  ;;  %v2163_v8 = vrot.slane %v2162_v39, 1 }
 0x294   :  { %v5385_v23 = vmul.f32 %v3787_v51, %v5302_v28 }
 0x295   :  { %v2177_v49 = vsel %vm1472_vm1, %v5382_v43, 0.0  ;;  %v2164_v41 = vadd.f32 %v2163_v8, %v2162_v39 }
 0x296   :  { %v2175_v36 = vsel %vm1472_vm1, %v5385_v23, 0.0 }
 0x297   :  { %v3789_v13 = vpop.eup %3788  ;;  %v2176_v21 = vadd.f32 %v2175_v36, %v2174_v44  ;;  %v2165_v16 = vmul.f32 0.015625, %v2164_v41  ;;  %v5767_v44 = vld [vmem:[#allocation7_spill] sm:$0xff] }
 0x298   :  { %v5392_v33 = vmul.f32 %v3789_v13, %v5312_v15 }
 0x299   :  { %v2178_v5 = vadd.f32 %v2177_v49, %v2176_v21 }
 0x29a   :  { %v2179_v9 = vsel %vm1472_vm1, %v5392_v33, 0.0 }
 0x29b   :  { %v2180_v28 = vadd.f32 %v2179_v9, %v2178_v5  ;;  %v5768_v9 = vld [vmem:[#allocation6_spill] sm:$0xff] }
 0x29d   :  { %v2181_v55 = vrot.slane %v2180_v28, 4 }
 0x29f   :  { %v2182_v50 = vadd.f32 %v2181_v55, %v2180_v28 }
 0x2a1   :  { %v2183_v31 = vrot.slane %v2182_v50, 2 }
 0x2a3   :  { %v2184_v47 = vadd.f32 %v2183_v31, %v2182_v50  ;;  %v5770_v31 = vld [vmem:[#allocation9_spill] sm:$0xff] }
 0x2a5   :  { %v2185_v42 = vrot.slane %v2184_v47, 1 }
 0x2a7   :  { %v2186_v17 = vadd.f32 %v2185_v42, %v2184_v47 }
 0x2a9   :  { %v2187_v15 = vmul.f32 0.015625, %v2186_v17  ;;  %v5771_v17 = vld [vmem:[#allocation10_spill] sm:$0xff] }
 0x2ab   :  { %v2189_v10 = vsel %vm2188_vm4, %v2165_v16, %v2187_v15 }
 0x2ac   :  { %3437 = vmatmul.mubr.msk.f32.vlgmr.msra.gmra.mrb[4].mxu1 %vm1472_vm1, %v2189_v10  ;;  %v5772_v10 = vld [vmem:[#allocation11_spill] sm:$0xff] }
 0x2ad   :  { %3441 = vmatprep.mubr.msk.f32.mxu1 %vm3890_vm3, %v5765_v1  ;;  %3440 = vmatpush3.msra.mxu1 %v2281_v35 }
 0x2ae   :  { %3555 = vmatprep.subr.bf16.mxu1 %v3554_v0 }
 0x37f   :  { %v2270_v61 = vpop.f32.mrb[4].mxu1 }
 0x380   :  { %v2271_v32 = vadd.f32 %v3260_v6, %v2270_v61  ;;  %v3438_v56 = vpop.f32.mrb[5].mxu1 }
 0x381   :  { %v5773_v56 = vld [vmem:[#allocation12_spill] sm:$0xff] }
 0x382   :  { %v3262_v14 = vmul.f32 -1.442695, %v2271_v32 }
 0x384   :  { %3790 = vpow2.f32 %v3262_v14 }
 0x38e   :  { %v3791_v2 = vpop.eup %3790 }
 0x38f   :  { %v2277_v11 = vadd.f32 1.0, %v3791_v2 }
 0x391   :  { %3792 = vrcp.f32 %v2277_v11  ;;  %v5774_v11 = vld [vmem:[#allocation13_spill] sm:$0xff] }
 0x39b   :  { %v3793_v34 = vpop.eup %3792 }
 0x39c   :  { %v2280_v52 = vmul.f32 %v3793_v34, %v2271_v32 }
 0x39e   :  { %3442 = vmatmul.mubr.msk.f32.vlgmr.msra.gmra.mrb[6].mxu1 %vm1166_vm0, %v2280_v52 }
 0x39f   :  { %3557 = vmatpush3.bf16.msra.mxu1 %v3554_v0 }
 0x3a0   :  { %3559 = vmatprep.subr.bf16.mxu1 %v3558_v60 }
 0x3a3   :  { %3561 = vmatpush3.bf16.msra.mxu1 %v3558_v60  ;;  %v5776_v60 = vld [vmem:[#allocation15_spill] sm:$0xff] }
 0x3a4   :  { %3562 = vmatprep.subr.bf16.mxu1 %v5766_v24 }
 0x471   :  { %v2358_v27 = vpop.f32.mrb[6].mxu1 }
 0x472   :  { %v2359_v53 = vadd.f32 %v3263_v26, %v2358_v27  ;;  %v3443_v19 = vpop.f32.mrb[7].mxu1 }
 0x473   :  { %v5777_v19 = vld [vmem:[#allocation16_spill] sm:$0xff] }
 0x474   :  { %v3265_v30 = vmul.f32 -1.442695, %v2359_v53 }
 0x476   :  { %3794 = vpow2.f32 %v3265_v30 }
 0x480   :  { %v3795_v51 = vpop.eup %3794 }
 0x481   :  { %v2365_v46 = vadd.f32 1.0, %v3795_v51 }
 0x483   :  { %3796 = vrcp.f32 %v2365_v46  ;;  %v5778_v46 = vld [vmem:[#allocation17_spill] sm:$0xff] }
 0x48d   :  { %v3797_v22 = vpop.eup %3796 }
 0x48e   :  { %v2371_v13 = vrot.slane %v3797_v22, %v5767_v44 }
 0x490   :  { %v2372_v36 = vmul.f32 %v2371_v13, %v5316_v18  ;;  %v2373_v49 = vmul.f32 %v2371_v13, %v5309_v59  ;;  %v2374_v21 = vmul.f32 %v2371_v13, %v5320_v57  ;;  %v2375_v54 = vmul.f32 %v2371_v13, %v5325_v29 }
 0x491   :  { %v2376_v5 = vmul.f32 %v2371_v13, %v5331_v63  ;;  %v2377_v18 = vmul.f32 %v2371_v13, %v5338_v7  ;;  %v2383_v59 = vrot.slane %v3797_v22, %v5768_v9  ;;  %v2378_v28 = vmul.f32 %v2371_v13, %v5343_v40 }
 0x492   :  { %3452 = vmatprep.mubr.msk.f32.mxu1 %vm1472_vm1, %v2372_v36  ;;  %v2379_v57 = vmul.f32 %v2371_v13, %v5348_v20 }
 0x493   :  { %3453 = vmatmul.mubr.msk.f32.vlgmr.msra.gmra.mrb[8].mxu1 %vm1472_vm1, %v2373_v49  ;;  %v2384_v29 = vmul.f32 %v2383_v59, %v5358_v45  ;;  %v2385_v63 = vmul.f32 %v2383_v59, %v5353_v3  ;;  %v2386_v7 = vmul.f32 %v2383_v59, %v5361_v37  ;;  %v2387_v40 = vmul.f32 %v2383_v59, %v5368_v25  ;;  %v3266_v37 = vld [vmem:[%s5701_s12] ss:$0 sm:$0xff]  ;;  %v5779_v49 = vld [vmem:[#allocation18_spill] sm:$0xff] }
 0x494   :  { %3455 = vmatprep.mubr.msk.f32.mxu1 %vm1472_vm1, %v2374_v21  ;;  %v2388_v39 = vmul.f32 %v2383_v59, %v5375_v48  ;;  %v2389_v20 = vmul.f32 %v2383_v59, %v5385_v23  ;;  %v2390_v45 = vmul.f32 %v2383_v59, %v5382_v43  ;;  %v2391_v3 = vmul.f32 %v2383_v59, %v5392_v33  ;;  %v5769_v43 = vld [vmem:[#allocation8_spill] sm:$0xff] }
 0x497   :  { %3456 = vmatmul.mubr.msk.f32.gmra.mrb[10].mxu1 %vm1472_vm1, %v2375_v54 }
 0x498   :  { %3458 = vmatprep.mubr.msk.f32.mxu1 %vm1472_vm1, %v2376_v5  ;;  %v5780_v5 = vld [vmem:[#allocation19_spill] sm:$0xff] }
 0x49b   :  { %3459 = vmatmul.mubr.msk.f32.gmra.mrb[12].mxu1 %vm1472_vm1, %v2377_v18 }
 0x49c   :  { %3461 = vmatprep.mubr.msk.f32.mxu1 %vm1472_vm1, %v2378_v28 }
 0x49f   :  { %3462 = vmatmul.mubr.msk.f32.gmra.mrb[14].mxu1 %vm1472_vm1, %v2379_v57  ;;  %v5781_v57 = vld [vmem:[#allocation20_spill] sm:$0xff] }
 0x4a0   :  { %3464 = vmatprep.mubr.msk.f32.mxu1 %vm1472_vm1, %v2384_v29 }
 0x4a3   :  { %3465 = vmatmul.mubr.msk.f32.gmra.mrb[16].mxu1 %vm1472_vm1, %v2385_v63 }
 0x4a4   :  { %3467 = vmatprep.mubr.msk.f32.mxu1 %vm1472_vm1, %v2386_v7  ;;  %v5782_v7 = vld [vmem:[#allocation21_spill] sm:$0xff] }
 0x4a7   :  { %3468 = vmatmul.mubr.msk.f32.gmra.mrb[18].mxu1 %vm1472_vm1, %v2387_v40 }
 0x4a8   :  { %3470 = vmatprep.mubr.msk.f32.mxu1 %vm1472_vm1, %v2388_v39 }
 0x4ab   :  { %3471 = vmatmul.mubr.msk.f32.gmra.mrb[20].mxu1 %vm1472_vm1, %v2389_v20 }
 0x4ac   :  { %3473 = vmatprep.mubr.msk.f32.mxu1 %vm1472_vm1, %v2390_v45 }
 0x4af   :  { %3474 = vmatmul.mubr.msk.f32.gmra.mrb[22].mxu1 %vm1472_vm1, %v2391_v3  ;;  %v5783_v3 = vld [vmem:[#allocation22_spill] sm:$0xff] }
 0x4b0   :  { %3510 = vmatprep.mubr.msk.f32.mxu1 %vm3890_vm3, %v5765_v1 }
 0x566   :  { %v3454_v25 = vpop.f32.mrb[8].mxu1 }
 0x567   :  { %v2523_v48 = vadd.f32 %v3454_v25, %v3266_v37  ;;  %v2517_v23 = vpop.f32.mrb[9].mxu1 }
 0x568   :  { %v2518_v55 = vadd.f32 %v3266_v37, %v2517_v23 }
 0x569   :  { %v2597_v47 = vadd.f32 %v2523_v48, %v5770_v31  ;;  %v5784_v48 = vld [vmem:[#allocation23_spill] sm:$0xff] }
 0x56a   :  { %v2596_v50 = vadd.f32 %v2518_v55, %v5769_v43  ;;  %v3457_v8 = vpop.f32.mrb[10].mxu1  ;;  %v2970_v55 = vld [vmem:[%s5704_s15] sm:$0xff]  ;;  %v2972_v43 = vld [vmem:[%s5704_s15 + $0x10] sm:$0xff] }
 0x56b   :  { %v2533_v41 = vadd.f32 %v3457_v8, %v3266_v37  ;;  %v2527_v33 = vpop.f32.mrb[11].mxu1  ;;  %v2973_v8 = vld [vmem:[%s5704_s15 + $0x18] sm:$0xff] }
 0x56c   :  { %v2528_v42 = vadd.f32 %v3266_v37, %v2527_v33  ;;  %3478 = vmatprep.mubr.msk.f32.mxu0 %vm1166_vm0, %v2596_v50  ;;  %v3566_v31 = vpack.c.bf16 %v2973_v8, %v2972_v43 }
 0x56d   :  { %3479 = vmatmul.mubr.msk.f32.vlgmr.msra.gmra.mrb[12].mxu0 %vm1166_vm0, %v2597_v47  ;;  %v2599_v35 = vadd.f32 %v2533_v41, %v5772_v10  ;;  %v3055_v47 = vld [vmem:[%s5706_s17 + $0x8] sm:$0xff]  ;;  %v3056_v41 = vld [vmem:[%s5706_s17 + $0x10] sm:$0xff] }
 0x56e   :  { %v2598_v16 = vadd.f32 %v2528_v42, %v5771_v17  ;;  %v3460_v15 = vpop.f32.mrb[12].mxu1  ;;  %v3057_v42 = vld [vmem:[%s5706_s17 + $0x18] sm:$0xff] }
 0x56f   :  { %v2543_v6 = vadd.f32 %v3460_v15, %v3266_v37  ;;  %v2537_v61 = vpop.f32.mrb[13].mxu1  ;;  %v3572_v17 = vpack.c.bf16 %v3057_v42, %v3056_v41  ;;  %v3059_v15 = vld [vmem:[%s5706_s17 + $0x28] sm:$0xff] }
 0x570   :  { %v2538_v32 = vadd.f32 %v3266_v37, %v2537_v61  ;;  %3481 = vmatprep.mubr.msk.f32.mxu0 %vm1166_vm0, %v2598_v16  ;;  %v3058_v16 = vld [vmem:[%s5706_s17 + $0x20] sm:$0xff] }
 0x571   :  { %3482 = vmatmul.mubr.msk.f32.gmra.mrb[14].mxu0 %vm1166_vm0, %v2599_v35  ;;  %v2601_v34 = vadd.f32 %v2543_v6, %v5774_v11  ;;  %v3575_v10 = vpack.c.bf16 %v3059_v15, %v3058_v16  ;;  %v3060_v35 = vld [vmem:[%s5706_s17 + $0x30] sm:$0xff]  ;;  %v3061_v6 = vld [vmem:[%s5706_s17 + $0x38] sm:$0xff] }
 0x572   :  { %v2600_v14 = vadd.f32 %v2538_v32, %v5773_v56  ;;  %v3463_v2 = vpop.f32.mrb[14].mxu1  ;;  %v3578_v61 = vpack.c.bf16 %v3061_v6, %v3060_v35  ;;  %v3062_v32 = vld [vmem:[%s5706_s17 + $0x40] sm:$0xff]  ;;  %v3063_v56 = vld [vmem:[%s5706_s17 + $0x48] sm:$0xff]  ;;  %v3065_v11 = vld [vmem:[%s5706_s17 + $0x58] sm:$0xff] }
 0x573   :  { %v2553_v52 = vadd.f32 %v3463_v2, %v3266_v37  ;;  %v2547_v62 = vpop.f32.mrb[15].mxu1  ;;  %v3064_v2 = vld [vmem:[%s5706_s17 + $0x50] sm:$0xff] }
 0x574   :  { %v2548_v58 = vadd.f32 %v3266_v37, %v2547_v62  ;;  %3484 = vmatprep.mubr.msk.f32.mxu0 %vm1166_vm0, %v2600_v14  ;;  %v3581_v14 = vpack.c.bf16 %v3063_v56, %v3062_v32  ;;  %v3067_v62 = vld [vmem:[%s5706_s17 + $0x68] sm:$0xff] }
 0x575   :  { %3485 = vmatmul.mubr.msk.f32.gmra.mrb[16].mxu0 %vm1166_vm0, %v2601_v34  ;;  %v2603_v12 = vadd.f32 %v2553_v52, %v5776_v60  ;;  %v3584_v34 = vpack.c.bf16 %v3065_v11, %v3064_v2  ;;  %v3066_v52 = vld [vmem:[%s5706_s17 + $0x60] sm:$0xff] }
 0x576   :  { %v2602_v0 = vadd.f32 %v2548_v58, %v5775_v4  ;;  %v3466_v38 = vpop.f32.mrb[16].mxu1  ;;  %v3587_v58 = vpack.c.bf16 %v3067_v62, %v3066_v52  ;;  %v3068_v4 = vld [vmem:[%s5706_s17 + $0x70] sm:$0xff]  ;;  %v5571_v60 = vld [vmem:[%s5703_s14] ss:$0 sm:$0xff] }
 0x577   :  { %v2563_v26 = vadd.f32 %v3466_v38, %v3266_v37  ;;  %v2557_v27 = vpop.f32.mrb[17].mxu1 }
 0x578   :  { %v2558_v53 = vadd.f32 %v3266_v37, %v2557_v27  ;;  %3487 = vmatprep.mubr.msk.f32.mxu0 %vm1166_vm0, %v2602_v0  ;;  %v3069_v0 = vld [vmem:[%s5706_s17 + $0x78] sm:$0xff] }
 0x579   :  { %3488 = vmatmul.mubr.msk.f32.gmra.mrb[18].mxu0 %vm1166_vm0, %v2603_v12  ;;  %v2605_v22 = vadd.f32 %v2563_v26, %v5778_v46  ;;  %v3590_v38 = vpack.c.bf16 %v3069_v0, %v3068_v4 }
 0x57a   :  { %v2604_v30 = vadd.f32 %v2558_v53, %v5777_v19  ;;  %v3469_v51 = vpop.f32.mrb[18].mxu1 }
 0x57b   :  { %v2573_v44 = vadd.f32 %v3469_v51, %v3266_v37  ;;  %v2567_v13 = vpop.f32.mrb[19].mxu1 }
 0x57c   :  { %v2568_v36 = vadd.f32 %v3266_v37, %v2567_v13  ;;  %3490 = vmatprep.mubr.msk.f32.mxu0 %vm1166_vm0, %v2604_v30 }
 0x57d   :  { %3491 = vmatmul.mubr.msk.f32.gmra.mrb[20].mxu0 %vm1166_vm0, %v2605_v22  ;;  %v2607_v18 = vadd.f32 %v2573_v44, %v5780_v5 }
 0x57e   :  { %v2606_v21 = vadd.f32 %v2568_v36, %v5779_v49  ;;  %v3472_v54 = vpop.f32.mrb[20].mxu1 }
 0x57f   :  { %v2583_v9 = vadd.f32 %v3472_v54, %v3266_v37  ;;  %v2577_v59 = vpop.f32.mrb[21].mxu1 }
 0x580   :  { %v2578_v28 = vadd.f32 %v3266_v37, %v2577_v59  ;;  %3493 = vmatprep.mubr.msk.f32.mxu0 %vm1166_vm0, %v2606_v21 }
 0x581   :  { %3494 = vmatmul.mubr.msk.f32.gmra.mrb[22].mxu0 %vm1166_vm0, %v2607_v18  ;;  %v2609_v40 = vadd.f32 %v2583_v9, %v5782_v7 }
 0x582   :  { %v2608_v29 = vadd.f32 %v2578_v28, %v5781_v57  ;;  %v3475_v63 = vpop.f32.mrb[22].mxu1 }
 0x583   :  { %v2593_v39 = vadd.f32 %v3475_v63, %v3266_v37  ;;  %v2587_v20 = vpop.f32.mrb[23].mxu1 }
 0x584   :  { %v2588_v45 = vadd.f32 %v3266_v37, %v2587_v20  ;;  %3496 = vmatprep.mubr.msk.f32.mxu0 %vm1166_vm0, %v2608_v29  ;;  %v2971_v37 = vld [vmem:[%s5704_s15 + $0x8] sm:$0xff] }
 0x585   :  { %3497 = vmatmul.mubr.msk.f32.gmra.mrb[24].mxu0 %vm1166_vm0, %v2609_v40  ;;  %v2611_v23 = vadd.f32 %v2593_v39, %v5784_v48  ;;  %v3563_v50 = vpack.c.bf16 %v2971_v37, %v2970_v55 }
 0x586   :  { %v2610_v25 = vadd.f32 %v2588_v45, %v5783_v3 }
 0x587   :  { %3564 = vmatpush3.bf16.msra.mxu1 %v3563_v50 }
 0x588   :  { %3499 = vmatprep.mubr.msk.f32.mxu0 %vm1166_vm0, %v2610_v25  ;;  %3565 = vmatprep.subr.bf16.mxu1 %v5766_v24 }
 0x589   :  { %3500 = vmatmul.mubr.msk.f32.gmra.mrb[26].mxu0 %vm1166_vm0, %v2611_v23 }
 0x58a   :  { %3545 = vmatprep.mubr.msk.f32.mxu0 %vm3890_vm3, %v5765_v1  ;;  %v3054_v1 = vld [vmem:[%s5706_s17] sm:$0xff] }
 0x58b   :  { %3567 = vmatpush3.bf16.msra.mxu1 %v3566_v31  ;;  %v3569_v33 = vpack.c.bf16 %v3055_v47, %v3054_v1 }
 0x58d   :  { %3570 = vmatpush3.bf16.msra.mxu0 %v3569_v33 }
 0x58e   :  { %3571 = vmatprep.subr.bf16.mxu0 %v5766_v24 }
 0x591   :  { %3573 = vmatpush3.bf16.msra.mxu0 %v3572_v17 }
 0x592   :  { %3574 = vmatprep.subr.bf16.mxu0 %v5766_v24 }
 0x595   :  { %3576 = vmatpush3.bf16.msra.mxu0 %v3575_v10 }
 0x596   :  { %3577 = vmatprep.subr.bf16.mxu0 %v5766_v24 }
 0x599   :  { %3579 = vmatpush3.bf16.msra.mxu0 %v3578_v61 }
 0x59a   :  { %3580 = vmatprep.subr.bf16.mxu0 %v5766_v24 }
 0x59d   :  { %3582 = vmatpush3.bf16.msra.mxu0 %v3581_v14 }
 0x59e   :  { %3583 = vmatprep.subr.bf16.mxu0 %v5766_v24 }
 0x5a1   :  { %3585 = vmatpush3.bf16.msra.mxu0 %v3584_v34 }
 0x5a2   :  { %3586 = vmatprep.subr.bf16.mxu0 %v5766_v24 }
 0x5a5   :  { %3588 = vmatpush3.bf16.msra.mxu0 %v3587_v58 }
 0x5a6   :  { %3589 = vmatprep.subr.bf16.mxu0 %v5766_v24 }
 0x5a9   :  { %3591 = vmatpush3.bf16.msra.mxu0 %v3590_v38 }
 0x640   :  { %v3480_v12 = vpop.f32.mrb[12].mxu0 }
 0x641   :  { %v5574_v26 = vadd.f32 %v3480_v12, %v5571_v60  ;;  %v2734_v27 = vpop.f32.mrb[13].mxu0 }
 0x642   :  { %v5577_v53 = vadd.f32 %v5571_v60, %v2734_v27 }
 0x643   :  { %v3301_v19 = vmul.f32 -1.442695, %v5574_v26 }
 0x644   :  { %v3300_v30 = vmul.f32 -1.442695, %v5577_v53  ;;  %v3483_v51 = vpop.f32.mrb[14].mxu0 }
 0x645   :  { %3798 = vpow2.f32 %v3301_v19  ;;  %v5582_v24 = vadd.f32 %v3483_v51, %v5571_v60  ;;  %v2744_v46 = vpop.f32.mrb[15].mxu0 }
 0x646   :  { %3800 = vpow2.f32 %v3300_v30  ;;  %v5585_v22 = vadd.f32 %v5571_v60, %v2744_v46 }
 0x647   :  { %v3303_v44 = vmul.f32 -1.442695, %v5582_v24 }
 0x648   :  { %v3302_v13 = vmul.f32 -1.442695, %v5585_v22  ;;  %v3486_v36 = vpop.f32.mrb[16].mxu0 }
 0x649   :  { %3802 = vpow2.f32 %v3303_v44  ;;  %v5590_v49 = vadd.f32 %v3486_v36, %v5571_v60  ;;  %v2754_v21 = vpop.f32.mrb[17].mxu0 }
 0x64a   :  { %3804 = vpow2.f32 %v3302_v13  ;;  %v5593_v54 = vadd.f32 %v5571_v60, %v2754_v21 }
 0x64b   :  { %v3305_v5 = vmul.f32 -1.442695, %v5590_v49 }
 0x64c   :  { %v3304_v18 = vmul.f32 -1.442695, %v5593_v54  ;;  %v3489_v9 = vpop.f32.mrb[18].mxu0 }
 0x64d   :  { %3806 = vpow2.f32 %v3305_v5  ;;  %v5598_v59 = vadd.f32 %v3489_v9, %v5571_v60  ;;  %v2764_v28 = vpop.f32.mrb[19].mxu0 }
 0x64e   :  { %3808 = vpow2.f32 %v3304_v18  ;;  %v5601_v57 = vadd.f32 %v5571_v60, %v2764_v28 }
 0x64f   :  { %v3799_v29 = vpop.eup %3798  ;;  %v3307_v63 = vmul.f32 -1.442695, %v5598_v59 }
 0x650   :  { %v3801_v7 = vpop.eup %3800  ;;  %v2862_v40 = vadd.f32 1.0, %v3799_v29  ;;  %v3306_v39 = vmul.f32 -1.442695, %v5601_v57  ;;  %v3492_v20 = vpop.f32.mrb[20].mxu0 }
 0x651   :  { %v2861_v45 = vadd.f32 1.0, %v3801_v7  ;;  %3810 = vpow2.f32 %v3307_v63  ;;  %v5606_v3 = vadd.f32 %v3492_v20, %v5571_v60  ;;  %v2774_v25 = vpop.f32.mrb[21].mxu0 }
 0x652   :  { %3812 = vrcp.f32 %v2862_v40  ;;  %v5609_v48 = vadd.f32 %v5571_v60, %v2774_v25 }
 0x653   :  { %v3803_v23 = vpop.eup %3802  ;;  %3814 = vrcp.f32 %v2861_v45  ;;  %v3309_v55 = vmul.f32 -1.442695, %v5606_v3 }
 0x654   :  { %v3805_v37 = vpop.eup %3804  ;;  %v2864_v43 = vadd.f32 1.0, %v3803_v23  ;;  %3816 = vpow2.f32 %v3306_v39  ;;  %v3308_v50 = vmul.f32 -1.442695, %v5609_v48  ;;  %v3495_v8 = vpop.f32.mrb[22].mxu0 }
 0x655   :  { %v2863_v31 = vadd.f32 1.0, %v3805_v37  ;;  %3818 = vpow2.f32 %v3309_v55  ;;  %v5614_v1 = vadd.f32 %v3495_v8, %v5571_v60  ;;  %v2784_v47 = vpop.f32.mrb[23].mxu0 }
 0x656   :  { %3820 = vrcp.f32 %v2864_v43  ;;  %v5617_v41 = vadd.f32 %v5571_v60, %v2784_v47 }
 0x657   :  { %v3807_v33 = vpop.eup %3806  ;;  %3822 = vrcp.f32 %v2863_v31  ;;  %v3311_v42 = vmul.f32 -1.442695, %v5614_v1 }
 0x658   :  { %v3809_v17 = vpop.eup %3808  ;;  %v2866_v16 = vadd.f32 1.0, %v3807_v33  ;;  %3824 = vpow2.f32 %v3308_v50  ;;  %v3310_v15 = vmul.f32 -1.442695, %v5617_v41  ;;  %v3498_v10 = vpop.f32.mrb[24].mxu0 }
 0x659   :  { %v2865_v35 = vadd.f32 1.0, %v3809_v17  ;;  %3826 = vpow2.f32 %v3311_v42  ;;  %v5622_v6 = vadd.f32 %v3498_v10, %v5571_v60  ;;  %v2794_v61 = vpop.f32.mrb[25].mxu0 }
 0x65a   :  { %3828 = vrcp.f32 %v2866_v16  ;;  %v5625_v32 = vadd.f32 %v5571_v60, %v2794_v61 }
 0x65b   :  { %v3811_v56 = vpop.eup %3810  ;;  %3830 = vrcp.f32 %v2865_v35  ;;  %v3313_v14 = vmul.f32 -1.442695, %v5622_v6 }
 0x65c   :  { %v3813_v2 = vpop.eup %3812  ;;  %v2868_v11 = vadd.f32 1.0, %v3811_v56  ;;  %3832 = vpow2.f32 %v3310_v15  ;;  %v3312_v34 = vmul.f32 -1.442695, %v5625_v32  ;;  %v3501_v52 = vpop.f32.mrb[26].mxu0 }
 0x65d   :  { %v3815_v62 = vpop.eup %3814  ;;  %v2910_v58 = vmul.f32 %v3813_v2, %v5574_v26  ;;  %3834 = vpow2.f32 %v3313_v14  ;;  %v5631_v4 = vadd.f32 %v3501_v52, %v5571_v60  ;;  %v2804_v0 = vpop.f32.mrb[27].mxu0 }
 0x65e   :  { %v3817_v38 = vpop.eup %3816  ;;  %v2909_v12 = vmul.f32 %v3815_v62, %v5577_v53  ;;  %3836 = vrcp.f32 %v2868_v11  ;;  %v5635_v27 = vadd.f32 %v5571_v60, %v2804_v0 }
 0x65f   :  { %v3819_v19 = vpop.eup %3818  ;;  %v2926_v30 = vsel %vm1472_vm1, %v2910_v58, 0.0  ;;  %v2867_v51 = vadd.f32 1.0, %v3817_v38  ;;  %3838 = vpow2.f32 %v3312_v34  ;;  %v3315_v46 = vmul.f32 -1.442695, %v5631_v4 }
 0x660   :  { %v3821_v26 = vpop.eup %3820  ;;  %v2925_v44 = vsel %vm1472_vm1, %v2909_v12, 0.0  ;;  %v2870_v13 = vadd.f32 1.0, %v3819_v19  ;;  %v3314_v36 = vmul.f32 -1.442695, %v5635_v27 }
 0x661   :  { %v3823_v21 = vpop.eup %3822  ;;  %v2927_v5 = vadd.f32 %v2926_v30, %v2925_v44  ;;  %3840 = vrcp.f32 %v2867_v51  ;;  %v2912_v60 = vmul.f32 %v3821_v26, %v5582_v24 }
 0x662   :  { %v3825_v53 = vpop.eup %3824  ;;  %v2911_v18 = vmul.f32 %v3823_v21, %v5585_v22  ;;  %3842 = vrcp.f32 %v2870_v13 }
 0x663   :  { %v3827_v9 = vpop.eup %3826  ;;  %v2869_v28 = vadd.f32 1.0, %v3825_v53  ;;  %3844 = vpow2.f32 %v3315_v46  ;;  %v2930_v45 = vsel %vm1472_vm1, %v2912_v60, 0.0 }
 0x664   :  { %v3829_v29 = vpop.eup %3828  ;;  %v2928_v63 = vsel %vm1472_vm1, %v2911_v18, 0.0  ;;  %v2872_v7 = vadd.f32 1.0, %v3827_v9  ;;  %3846 = vpow2.f32 %v3314_v36 }
 0x665   :  { %v3831_v40 = vpop.eup %3830  ;;  %v2929_v39 = vadd.f32 %v2928_v63, %v2927_v5  ;;  %3848 = vrcp.f32 %v2869_v28  ;;  %v2914_v25 = vmul.f32 %v3829_v29, %v5590_v49 }
 0x666   :  { %v3833_v20 = vpop.eup %3832  ;;  %v2913_v24 = vmul.f32 %v3831_v40, %v5593_v54  ;;  %3850 = vrcp.f32 %v2872_v7 }
 0x667   :  { %v3835_v22 = vpop.eup %3834  ;;  %v2931_v23 = vadd.f32 %v2930_v45, %v2929_v39  ;;  %v2871_v55 = vadd.f32 1.0, %v3833_v20  ;;  %v2934_v47 = vsel %vm1472_vm1, %v2914_v25, 0.0 }
 0x668   :  { %v3837_v37 = vpop.eup %3836  ;;  %v2932_v43 = vsel %vm1472_vm1, %v2913_v24, 0.0  ;;  %v2874_v50 = vadd.f32 1.0, %v3835_v22 }
 0x669   :  { %v3839_v8 = vpop.eup %3838  ;;  %v2933_v31 = vadd.f32 %v2932_v43, %v2931_v23  ;;  %3852 = vrcp.f32 %v2871_v55  ;;  %v2916_v54 = vmul.f32 %v3837_v37, %v5598_v59  ;;  %v3316_v43 = vld [vmem:[%s5705_s16] ss:$0 sm:$0xff] }
 0x66a   :  { %v2873_v33 = vadd.f32 1.0, %v3839_v8  ;;  %3854 = vrcp.f32 %v2874_v50 }
 0x66b   :  { %v3841_v42 = vpop.eup %3840  ;;  %v2935_v17 = vadd.f32 %v2934_v47, %v2933_v31  ;;  %v2938_v34 = vsel %vm1472_vm1, %v2916_v54, 0.0  ;;  %v3318_v47 = vld [vmem:[%s5707_s18] ss:$0 sm:$0xff] }
 0x66c   :  { %v3843_v49 = vpop.eup %3842  ;;  %v2915_v16 = vmul.f32 %v3841_v42, %v5601_v57  ;;  %3856 = vrcp.f32 %v2873_v33 }
 0x66d   :  { %v3845_v15 = vpop.eup %3844  ;;  %v2918_v10 = vmul.f32 %v3843_v49, %v5606_v3 }
 0x66e   :  { %v3847_v35 = vpop.eup %3846  ;;  %v2936_v61 = vsel %vm1472_vm1, %v2915_v16, 0.0  ;;  %v2876_v56 = vadd.f32 1.0, %v3845_v15 }
 0x66f   :  { %v3849_v14 = vpop.eup %3848  ;;  %v2937_v2 = vadd.f32 %v2936_v61, %v2935_v17  ;;  %v2875_v11 = vadd.f32 1.0, %v3847_v35  ;;  %v2948_v52 = vsel %vm1472_vm1, %v2918_v10, 0.0 }
 0x670   :  { %v2917_v62 = vmul.f32 %v3849_v14, %v5609_v48  ;;  %3858 = vrcp.f32 %v2876_v56  ;;  %v3851_v59 = vpop.eup %3850 }
 0x671   :  { %v2939_v57 = vadd.f32 %v2938_v34, %v2937_v2  ;;  %3860 = vrcp.f32 %v2875_v11  ;;  %v2920_v38 = vmul.f32 %v3851_v59, %v5614_v1 }
 0x672   :  { %v2947_v58 = vsel %vm1472_vm1, %v2917_v62, 0.0 }
 0x673   :  { %v3853_v3 = vpop.eup %3852  ;;  %v2949_v0 = vadd.f32 %v2948_v52, %v2947_v58  ;;  %v2940_v46 = vrot.slane %v2939_v57, 4  ;;  %v2952_v44 = vsel %vm1472_vm1, %v2920_v38, 0.0 }
 0x674   :  { %v2919_v12 = vmul.f32 %v3853_v3, %v5617_v41  ;;  %v3855_v19 = vpop.eup %3854 }
 0x675   :  { %v2922_v13 = vmul.f32 %v3855_v19, %v5622_v6  ;;  %v2941_v1 = vadd.f32 %v2940_v46, %v2939_v57 }
 0x676   :  { %v3857_v30 = vpop.eup %3856  ;;  %v2950_v51 = vsel %vm1472_vm1, %v2919_v12, 0.0 }
 0x677   :  { %v2951_v26 = vadd.f32 %v2950_v51, %v2949_v0  ;;  %v2921_v48 = vmul.f32 %v3857_v30, %v5625_v32  ;;  %v2956_v41 = vsel %vm1472_vm1, %v2922_v13, 0.0  ;;  %v2942_v29 = vrot.slane %v2941_v1, 2 }
 0x679   :  { %v2953_v36 = vadd.f32 %v2952_v44, %v2951_v26  ;;  %v2954_v21 = vsel %vm1472_vm1, %v2921_v48, 0.0  ;;  %v2943_v40 = vadd.f32 %v2942_v29, %v2941_v1 }
 0x67a   :  { %v3859_v5 = vpop.eup %3858 }
 0x67b   :  { %v3861_v53 = vpop.eup %3860  ;;  %v2955_v60 = vadd.f32 %v2954_v21, %v2953_v36  ;;  %v2924_v18 = vmul.f32 %v3859_v5, %v5631_v4  ;;  %v2944_v45 = vrot.slane %v2943_v40, 1 }
 0x67c   :  { %v2923_v9 = vmul.f32 %v3861_v53, %v5635_v27 }
 0x67d   :  { %v2957_v28 = vadd.f32 %v2956_v41, %v2955_v60  ;;  %v2960_v6 = vsel %vm1472_vm1, %v2924_v18, 0.0  ;;  %v2945_v23 = vadd.f32 %v2944_v45, %v2943_v40 }
 0x67e   :  { %v2958_v32 = vsel %vm1472_vm1, %v2923_v9, 0.0 }
 0x67f   :  { %v2959_v63 = vadd.f32 %v2958_v32, %v2957_v28  ;;  %v2946_v4 = vmul.f32 0.015625, %v2945_v23 }
 0x681   :  { %v2961_v7 = vadd.f32 %v2960_v6, %v2959_v63 }
 0x683   :  { %v2962_v39 = vrot.slane %v2961_v7, 4 }
 0x685   :  { %v2963_v20 = vadd.f32 %v2962_v39, %v2961_v7 }
 0x687   :  { %v2964_v25 = vrot.slane %v2963_v20, 2 }
 0x689   :  { %v2965_v24 = vadd.f32 %v2964_v25, %v2963_v20 }
 0x68b   :  { %v2966_v22 = vrot.slane %v2965_v24, 1 }
 0x68d   :  { %v2967_v55 = vadd.f32 %v2966_v22, %v2965_v24 }
 0x68f   :  { %v2968_v37 = vmul.f32 0.015625, %v2967_v55 }
 0x691   :  { %v2969_v27 = vsel %vm2188_vm4, %v2946_v4, %v2968_v37 }
 0x692   :  { %3511 = vmatmul.mubr.msk.f32.vlgmr.msra.gmra.mrb[24].mxu1 %vm1472_vm1, %v2969_v27 }
 0x765   :  { %v3050_v50 = vpop.f32.mrb[24].mxu1 }
 0x766   :  { %v3051_v8 = vadd.f32 %v3316_v43, %v3050_v50  ;;  %v3512_v31 = vpop.f32.mrb[25].mxu1 }
 0x768   :  { %3546 = vmatmul.mubr.f32.vlgmr.msra.gmra.mrb[28].mxu0 %v3051_v8 }
 0x83b   :  { %v3143_v33 = vpop.f32.mrb[28].mxu0 }
 0x83c   :  { %v3144_v42 = vadd.f32 %v3318_v47, %v3143_v33  ;;  %v3547_v17 = vpop.f32.mrb[29].mxu0 }
 0x83e   :  { %3148 = vst.msk [vmem:[#allocation3] sm:$0x3] %vm3147_vm5, %v3144_v42 }
 0x83f   :  { %3875 = shalt.err (!%p3872_p4)
}
 0x840   :  { %s3876_s21 = scalar_lea.hbm %s5708_s19, 32 }
 0x841   :  { %p3877_p5 = scmp.ne.s32.totalorder %s5708_s19, %s3876_s21  ;;  %p3880_p6 = scmp.lt.u32.totalorder %s3876_s21, %s5708_s19 }
 0x843   :  { %p3882_p7 = pnand %p3880_p6, %p3877_p5 }
 0x845   :  { %3885 = shalt.err (!%p3882_p7)
}
 0x846   :  { %3158 = dma.vmem_to_hbm [thread:$0]  %s3156_s29, 32, %s5708_s19, [#allocation4]  }
 0x847   :  { %3886 = dma.done.wait [#allocation4], 32  }
 0x848   :  { %3887 = vsyncadd [#allocation4], 4294967264 }
 0x849   :  { %3162 = vsyncpa [#allocation4], 1 }

</bundles_post_ra>
